<compile_context>
chip_gen: v6e
topology: v6e:2x2x1
jax: 0.10.0
libtpu: 0.0.40
codegen_flags: <defaults>
</compile_context>

<pallas_src>
import numpy as np
import jax
import jax.numpy as jnp
from jax.experimental import pallas as pl
from jax.experimental.pallas import tpu as pltpu

NUM_LEVELS = 8  # GaussionDecomposeBlock(dimOut=8)

# 1-D normalized Gaussian (k=5, sigma=1); outer(g1, g1) == gaussian_kernel(5, 1).
_t = np.arange(-2.0, 3.0)
_g1 = np.exp(-_t ** 2 / 2.0)
_g1 = (_g1 / _g1.sum()).astype(np.float32)


def _band_matrix(n):
    """(n, n) M with M[i, j] = g1[j - i + 2] for |i - j| <= 2 (else 0).

    M @ x (resp. x @ M) is the 5-tap 1-D Gaussian blur with zero padding along
    the leading (resp. trailing) axis.
    """
    m = np.zeros((n, n), np.float32)
    for i in range(n):
        for t in range(-2, 3):
            j = i + t
            if 0 <= j < n:
                m[i, j] = _g1[t + 2]
    return m


def _block_diag(m, reps, size=None):
    n = m.shape[0]
    if size is None:
        size = n * reps
    out = np.zeros((size, size), np.float32)
    for r in range(reps):
        out[r * n:(r + 1) * n, r * n:(r + 1) * n] = m
    return out


def _lf_split(data, ang_res):
    """LFsplit + rearrange: (b, 1, H, W) -> (b*angRes^2, h, w) in (b, (u v)) order."""
    b, c, H, W = data.shape
    h, w = H // ang_res, W // ang_res
    x = data[:, 0, :h * ang_res, :w * ang_res]
    x = x.reshape(b, ang_res, h, ang_res, w).transpose(0, 1, 3, 2, 4)
    return x.reshape(b * ang_res * ang_res, h, w)


def _pack_rows(views, n_pad, p, h, w, wp):
    """(N, h, w) -> (G*h, wp): P sub-views side-by-side along lanes per group,
    lane-padded with zeros up to wp (a multiple of 128)."""
    n = views.shape[0]
    v = jnp.pad(views, ((0, n_pad - n), (0, 0), (0, 0)))
    g = n_pad // p
    x = v.reshape(g, p, h, w).transpose(0, 2, 1, 3).reshape(g * h, p * w)
    if wp > p * w:
        x = jnp.pad(x, ((0, 0), (0, wp - p * w)))
    return x


def _mxu_is_256_lane():
    """True on 256-wide-MXU chips (v6e / v7x); False on 128-wide (v2-v5)."""
    try:
        kind = jax.devices()[0].device_kind.lower()
    except Exception:
        return True
    return not any(tag in kind for tag in ("v2", "v3", "v4", "v5"))


def _invariant_spec(shape, buffered):
    """BlockSpec for a grid-invariant input (same block every grid step)."""
    index_map = lambda i: (0,) * len(shape)
    if buffered:
        # Single pipeline buffer: the block never changes, so a 2nd buffer is
        # wasted VMEM (helps most on v7x's 64 MiB).
        return pl.BlockSpec(shape, index_map, pipeline_mode=pl.Buffered(1))
    return pl.BlockSpec(shape, index_map)


def _make_kernel(tiles_per_step, tr, wp, wt, split_b):
    """Kernel factory; all tile geometry is baked in at trace time."""

    def kernel(a_ref, b_ref, x_ref, out_ref, cur_ref, d0_ref):
        # a_ref:   (tr, tr)  bf16 block-diag vertical 5-band Gaussian
        # b_ref:   (wt, wt) or (wp, wp) bf16 block-diag horizontal 5-band Gaussian
        # x_ref:   (tiles_per_step*tr, wt) f32, lanes = [SR pack | HR pack]
        # out_ref: (1, 8, wp) f32 per-step folded partial loss sum
        # cur_ref: (tr, wt) bf16 iterated low-freq state; d0_ref: (tr, wp) f32
        step_acc = jnp.zeros((8, wp), jnp.float32)
        for s in range(tiles_per_step):
            r0 = s * tr
            # Hoisted loop-invariant d0 = SR - HR for this row tile (f32).
            d0_ref[...] = x_ref[r0:r0 + tr, 0:wp] - x_ref[r0:r0 + tr, wp:wt]
            cur_ref[...] = x_ref[r0:r0 + tr, :].astype(jnp.bfloat16)
            for _level in range(NUM_LEVELS):
                # Separable zero-padded 5x5 Gaussian as banded bf16 MXU matmuls
                # with f32 accumulation.
                t = jnp.dot(a_ref[...], cur_ref[...],
                            preferred_element_type=jnp.float32)
                if split_b:
                    # 128-wide MXU (v2-v5): two N=128 horizontal matmuls.
                    lf_l = jnp.dot(t[:, 0:wp].astype(jnp.bfloat16), b_ref[...],
                                   preferred_element_type=jnp.float32)
                    lf_r = jnp.dot(t[:, wp:wt].astype(jnp.bfloat16), b_ref[...],
                                   preferred_element_type=jnp.float32)
                    cur_ref[:, 0:wp] = lf_l.astype(jnp.bfloat16)
                    cur_ref[:, wp:wt] = lf_r.astype(jnp.bfloat16)
                    lf_d = lf_l - lf_r
                else:
                    # 256-wide MXU (v6e/v7x): one N=256 horizontal matmul covers
                    # both SR and HR halves (block-diagonal B -> no bleed).
                    lf = jnp.dot(t.astype(jnp.bfloat16), b_ref[...],
                                 preferred_element_type=jnp.float32)
                    cur_ref[...] = lf.astype(jnp.bfloat16)
                    lf_d = lf[:, 0:wp] - lf[:, wp:wt]
                # hf_sr - hf_hr == (sr - hr) - (lf_sr - lf_hr); all f32.
                hf_d = d0_ref[...] - lf_d
                ad = jnp.abs(lf_d)
                loss = jnp.abs(hf_d) + jnp.where(ad < 1.0,
                                                 0.5 * lf_d * lf_d, ad - 0.5)
                # Fold rows to an (8, wp) accumulator while still in vregs
                # (pure VALU adds, no full-tile accumulator stores).
                part = loss[0:8, :]
                for r in range(1, tr // 8):
                    part = part + loss[r * 8:(r + 1) * 8, :]
                step_acc = step_acc + part
        out_ref[0, :, :] = step_acc

    return kernel


def freq_loss(SR, HR, ang_res=3):
    """Pallas TPU implementation of freqloss(angRes=ang_res)(SR, HR)."""
    b, c, H, W = SR.shape
    assert c == 1, "freqloss Gaussian conv expects single-channel input"
    h, w = H // ang_res, W // ang_res
    n_true = b * ang_res * ang_res

    sr_views = _lf_split(SR.astype(jnp.float32), ang_res)   # (n_true, h, w)
    hr_views = _lf_split(HR.astype(jnp.float32), ang_res)

    # ---- lane packing: p sub-views per row, width padded to a 128-multiple --
    p = max(1, -(-128 // w))
    wp = -(-(p * w) // 128) * 128          # per-tensor packed lane width (>=128)
    wt = 2 * wp                            # SR | HR lane-concatenated width
    g = -(-n_true // p)                    # packed sub-view groups

    # ---- row tiling: whole groups per tile, rows a multiple of 8 ------------
    tg = max(1, 128 // h)
    tg = min(tg, g)
    if g >= 2:
        tg = min(tg, -(-g // 2))           # keep >= 2 grid steps (v7x megacore)
    while (tg * h) % 8 != 0:
        tg += 1
    tr = tg * h
    ntiles = -(-g // tg)

    # ---- tiles per grid step: amortize per-step overhead at large sizes -----
    tiles_per_step = 1
    if ntiles >= 4:
        tiles_per_step = min(8, ntiles // 2)
    nsteps = -(-ntiles // tiles_per_step)
    gp = nsteps * tiles_per_step * tg      # padded group count
    n_pad = gp * p                         # padded sub-view count (zeros -> 0 loss)

    sr2d = _pack_rows(sr_views, n_pad, p, h, w, wp)    # (gp*h, wp)
    hr2d = _pack_rows(hr_views, n_pad, p, h, w, wp)
    x2d = jnp.concatenate([sr2d, hr2d], axis=1)        # (gp*h, wt)
    # TODO(synk): for very large b*angRes^2, fold this packing into the kernel
    # (scalar-prefetched row offsets) instead of materializing x2d in HBM.

    wide = _mxu_is_256_lane()
    a_blk = jnp.asarray(_block_diag(_band_matrix(h), tg), jnp.bfloat16)  # (tr,tr)
    b_half_np = _block_diag(_band_matrix(w), p, size=wp)                 # (wp,wp)
    b_np = _block_diag(b_half_np, 2) if wide else b_half_np
    b_blk = jnp.asarray(b_np, jnp.bfloat16)

    kernel = _make_kernel(tiles_per_step, tr, wp, wt, split_b=not wide)

    def run(buffered):
        return pl.pallas_call(
            kernel,
            out_shape=jax.ShapeDtypeStruct((nsteps, 8, wp), jnp.float32),
            grid=(nsteps,),
            in_specs=[
                _invariant_spec((tr, tr), buffered),         # vertical band
                _invariant_spec(tuple(b_np.shape), buffered),  # horizontal band
                pl.BlockSpec((tiles_per_step * tr, wt), lambda i: (i, 0)),
            ],
            out_specs=pl.BlockSpec((1, 8, wp), lambda i: (i, 0, 0)),
            scratch_shapes=[
                pltpu.VMEM((tr, wt), jnp.bfloat16),   # iterated low-freq SR|HR
                pltpu.VMEM((tr, wp), jnp.float32),    # hoisted d0 = SR - HR
            ],
            compiler_params=pltpu.CompilerParams(
                dimension_semantics=("parallel",),    # independent partial sums
            ),
        )(a_blk, b_blk, x2d)

    try:
        partials = run(buffered=True)      # single-buffer the invariant inputs
    except Exception:
        partials = run(buffered=False)     # pallas build w/o pipeline_mode support

    cnt = jnp.float32(NUM_LEVELS * n_true * h * w)
    return jnp.sum(partials) / cnt


# ----------------------------------------------------------------------------
# Pure-JAX f32 reference (same arithmetic structure as the PyTorch module).
def _freq_loss_ref(SR, HR, ang_res=3):
    sr = _lf_split(SR.astype(jnp.float32), ang_res)
    hr = _lf_split(HR.astype(jnp.float32), ang_res)
    gk2d = jnp.asarray(np.outer(_g1, _g1), jnp.float32)

    def conv5(x):
        _, h, w = x.shape
        xp = jnp.pad(x, ((0, 0), (2, 2), (2, 2)))
        out = jnp.zeros_like(x)
        for dy in range(5):
            for dx in range(5):
                out = out + gk2d[dy, dx] * xp[:, dy:dy + h, dx:dx + w]
        return out

    l1 = jnp.float32(0.0)
    sl1 = jnp.float32(0.0)
    cur_sr, cur_hr = sr, hr
    for _ in range(NUM_LEVELS):
        cur_sr = conv5(cur_sr)
        cur_hr = conv5(cur_hr)
        d_hf = (sr - cur_sr) - (hr - cur_hr)
        l1 = l1 + jnp.mean(jnp.abs(d_hf)) / NUM_LEVELS
        d_lf = cur_sr - cur_hr
        ad = jnp.abs(d_lf)
        sl1 = sl1 + jnp.mean(jnp.where(ad < 1.0, 0.5 * d_lf * d_lf, ad - 0.5)) / NUM_LEVELS
    return l1 + sl1


if __name__ == "__main__":
    key = jax.random.PRNGKey(0)
    k1, k2 = jax.random.split(key)
    # batch=2, channel=1, spatial 48x48 -> angRes=3 sub-views of 16x16 each.
    SR = jax.random.normal(k1, (2, 1, 48, 48), dtype=jnp.float32)
    HR = jax.random.normal(k2, (2, 1, 48, 48), dtype=jnp.float32)

    loss = freq_loss(SR, HR, ang_res=3)
    jax.block_until_ready(loss)

    ref = _freq_loss_ref(SR, HR, ang_res=3)
    np.testing.assert_allclose(np.asarray(loss), np.asarray(ref),
                               rtol=5e-3, atol=1e-4)

    print("KERNEL_OK")
</pallas_src>

<mosaic_0001>
module attributes {stable_mosaic.version = 11 : i64} {
  func.func @kernel(%arg0: i32, %arg1: memref<32x32xbf16, #tpu.memory_space<vmem>>, %arg2: memref<256x256xbf16, #tpu.memory_space<vmem>>, %arg3: memref<32x256xf32, #tpu.memory_space<vmem>>, %arg4: memref<1x8x128xf32, #tpu.memory_space<vmem>>, %arg5: memref<32x256xbf16, #tpu.memory_space<vmem>>, %arg6: memref<32x128xf32, #tpu.memory_space<vmem>>) attributes {dimension_semantics = [#tpu.dimension_semantics<parallel>], iteration_bounds = array<i64: 2>, scalar_prefetch = 0 : i64, scratch_operands = 2 : i64, tpu.core_type = #tpu.core_type<tc>, window_params = [{pipeline_mode = #tpu.pipeline_mode<synchronous>, transform_indices = @transform_0, window_bounds = array<i64: 32, 32>}, {pipeline_mode = #tpu.pipeline_mode<synchronous>, transform_indices = @transform_1, window_bounds = array<i64: 256, 256>}, {transform_indices = @transform_2, window_bounds = array<i64: 32, 256>}, {transform_indices = @transform_3, window_bounds = array<i64: 1, 8, 128>}]} {
    %cst = arith.constant 0.000000e+00 : f32
    %0 = vector.broadcast %cst : f32 to vector<8x128xf32>
    %c0 = arith.constant 0 : index
    %c0_0 = arith.constant 0 : index
    %1 = vector.load %arg3[%c0, %c0_0] : memref<32x256xf32, #tpu.memory_space<vmem>>, vector<32x128xf32>
    %c0_1 = arith.constant 0 : index
    %c128 = arith.constant 128 : index
    %2 = vector.load %arg3[%c0_1, %c128] : memref<32x256xf32, #tpu.memory_space<vmem>>, vector<32x128xf32>
    %3 = arith.subf %1, %2 : vector<32x128xf32>
    %c0_2 = arith.constant 0 : index
    %c0_3 = arith.constant 0 : index
    %4 = vector.load %arg6[%c0_2, %c0_3] : memref<32x128xf32, #tpu.memory_space<vmem>>, vector<32x128xf32>
    tpu.vector_store %arg6[%c0_2, %c0_3], %3 {strides = array<i32>} : memref<32x128xf32, #tpu.memory_space<vmem>>, vector<32x128xf32>,
    %c0_4 = arith.constant 0 : index
    %c0_5 = arith.constant 0 : index
    %5 = vector.load %arg3[%c0_4, %c0_5] : memref<32x256xf32, #tpu.memory_space<vmem>>, vector<32x256xf32>
    %6 = arith.truncf %5 : vector<32x256xf32> to vector<32x256xbf16>
    %c0_6 = arith.constant 0 : index
    %c0_7 = arith.constant 0 : index
    %7 = vector.load %arg5[%c0_6, %c0_7] : memref<32x256xbf16, #tpu.memory_space<vmem>>, vector<32x256xbf16>
    tpu.vector_store %arg5[%c0_6, %c0_7], %6 {strides = array<i32>} : memref<32x256xbf16, #tpu.memory_space<vmem>>, vector<32x256xbf16>,
    %c0_8 = arith.constant 0 : index
    %c0_9 = arith.constant 0 : index
    %8 = vector.load %arg1[%c0_8, %c0_9] : memref<32x32xbf16, #tpu.memory_space<vmem>>, vector<32x32xbf16>
    %c0_10 = arith.constant 0 : index
    %c0_11 = arith.constant 0 : index
    %9 = vector.load %arg5[%c0_10, %c0_11] : memref<32x256xbf16, #tpu.memory_space<vmem>>, vector<32x256xbf16>
    %cst_12 = arith.constant dense<0.000000e+00> : vector<32x256xf32>
    %10 = tpu.matmul %8, %9, %cst_12 {dimension_numbers = #tpu.dot_dimension_numbers<[1], [0], [0], [1], [0, 0, 1, 1], [], []>} : vector<32x32xbf16>, vector<32x256xbf16>, vector<32x256xf32> -> vector<32x256xf32>
    %11 = arith.truncf %10 : vector<32x256xf32> to vector<32x256xbf16>
    %c0_13 = arith.constant 0 : index
    %c0_14 = arith.constant 0 : index
    %12 = vector.load %arg2[%c0_13, %c0_14] : memref<256x256xbf16, #tpu.memory_space<vmem>>, vector<256x256xbf16>
    %cst_15 = arith.constant dense<0.000000e+00> : vector<32x256xf32>
    %13 = tpu.matmul %11, %12, %cst_15 {dimension_numbers = #tpu.dot_dimension_numbers<[1], [0], [0], [1], [0, 0, 1, 1], [], []>} : vector<32x256xbf16>, vector<256x256xbf16>, vector<32x256xf32> -> vector<32x256xf32>
    %14 = arith.truncf %13 : vector<32x256xf32> to vector<32x256xbf16>
    %c0_16 = arith.constant 0 : index
    %c0_17 = arith.constant 0 : index
    %15 = vector.load %arg5[%c0_16, %c0_17] : memref<32x256xbf16, #tpu.memory_space<vmem>>, vector<32x256xbf16>
    tpu.vector_store %arg5[%c0_16, %c0_17], %14 {strides = array<i32>} : memref<32x256xbf16, #tpu.memory_space<vmem>>, vector<32x256xbf16>,
    %16 = vector.extract_strided_slice %13 {offsets = [0, 0], sizes = [32, 128], strides = [1, 1]} : vector<32x256xf32> to vector<32x128xf32>
    %17 = vector.extract_strided_slice %13 {offsets = [0, 128], sizes = [32, 128], strides = [1, 1]} : vector<32x256xf32> to vector<32x128xf32>
    %18 = arith.subf %16, %17 : vector<32x128xf32>
    %c0_18 = arith.constant 0 : index
    %c0_19 = arith.constant 0 : index
    %19 = vector.load %arg6[%c0_18, %c0_19] : memref<32x128xf32, #tpu.memory_space<vmem>>, vector<32x128xf32>
    %20 = arith.subf %19, %18 : vector<32x128xf32>
    %21 = math.absf %18 : vector<32x128xf32>
    %22 = math.absf %20 : vector<32x128xf32>
    %cst_20 = arith.constant 1.000000e+00 : f32
    %23 = vector.broadcast %cst_20 : f32 to vector<32x128xf32>
    %24 = arith.cmpf olt, %21, %23 : vector<32x128xf32>
    %cst_21 = arith.constant 5.000000e-01 : f32
    %25 = vector.broadcast %cst_21 : f32 to vector<32x128xf32>
    %26 = arith.mulf %25, %18 : vector<32x128xf32>
    %27 = arith.mulf %26, %18 : vector<32x128xf32>
    %cst_22 = arith.constant 5.000000e-01 : f32
    %28 = vector.broadcast %cst_22 : f32 to vector<32x128xf32>
    %29 = arith.subf %21, %28 : vector<32x128xf32>
    %30 = arith.select %24, %27, %29 : vector<32x128xi1>, vector<32x128xf32>
    %31 = arith.addf %22, %30 : vector<32x128xf32>
    %32 = vector.extract_strided_slice %31 {offsets = [0, 0], sizes = [8, 128], strides = [1, 1]} : vector<32x128xf32> to vector<8x128xf32>
    %33 = vector.extract_strided_slice %31 {offsets = [8, 0], sizes = [8, 128], strides = [1, 1]} : vector<32x128xf32> to vector<8x128xf32>
    %34 = arith.addf %32, %33 : vector<8x128xf32>
    %35 = vector.extract_strided_slice %31 {offsets = [16, 0], sizes = [8, 128], strides = [1, 1]} : vector<32x128xf32> to vector<8x128xf32>
    %36 = arith.addf %34, %35 : vector<8x128xf32>
    %37 = vector.extract_strided_slice %31 {offsets = [24, 0], sizes = [8, 128], strides = [1, 1]} : vector<32x128xf32> to vector<8x128xf32>
    %38 = arith.addf %36, %37 : vector<8x128xf32>
    %39 = arith.addf %0, %38 : vector<8x128xf32>
    %c0_23 = arith.constant 0 : index
    %c0_24 = arith.constant 0 : index
    %40 = vector.load %arg1[%c0_23, %c0_24] : memref<32x32xbf16, #tpu.memory_space<vmem>>, vector<32x32xbf16>
    %c0_25 = arith.constant 0 : index
    %c0_26 = arith.constant 0 : index
    %41 = vector.load %arg5[%c0_25, %c0_26] : memref<32x256xbf16, #tpu.memory_space<vmem>>, vector<32x256xbf16>
    %cst_27 = arith.constant dense<0.000000e+00> : vector<32x256xf32>
    %42 = tpu.matmul %40, %41, %cst_27 {dimension_numbers = #tpu.dot_dimension_numbers<[1], [0], [0], [1], [0, 0, 1, 1], [], []>} : vector<32x32xbf16>, vector<32x256xbf16>, vector<32x256xf32> -> vector<32x256xf32>
    %43 = arith.truncf %42 : vector<32x256xf32> to vector<32x256xbf16>
    %c0_28 = arith.constant 0 : index
    %c0_29 = arith.constant 0 : index
    %44 = vector.load %arg2[%c0_28, %c0_29] : memref<256x256xbf16, #tpu.memory_space<vmem>>, vector<256x256xbf16>
    %cst_30 = arith.constant dense<0.000000e+00> : vector<32x256xf32>
    %45 = tpu.matmul %43, %44, %cst_30 {dimension_numbers = #tpu.dot_dimension_numbers<[1], [0], [0], [1], [0, 0, 1, 1], [], []>} : vector<32x256xbf16>, vector<256x256xbf16>, vector<32x256xf32> -> vector<32x256xf32>
    %46 = arith.truncf %45 : vector<32x256xf32> to vector<32x256xbf16>
    %c0_31 = arith.constant 0 : index
    %c0_32 = arith.constant 0 : index
    %47 = vector.load %arg5[%c0_31, %c0_32] : memref<32x256xbf16, #tpu.memory_space<vmem>>, vector<32x256xbf16>
    tpu.vector_store %arg5[%c0_31, %c0_32], %46 {strides = array<i32>} : memref<32x256xbf16, #tpu.memory_space<vmem>>, vector<32x256xbf16>,
    %48 = vector.extract_strided_slice %45 {offsets = [0, 0], sizes = [32, 128], strides = [1, 1]} : vector<32x256xf32> to vector<32x128xf32>
    %49 = vector.extract_strided_slice %45 {offsets = [0, 128], sizes = [32, 128], strides = [1, 1]} : vector<32x256xf32> to vector<32x128xf32>
    %50 = arith.subf %48, %49 : vector<32x128xf32>
    %c0_33 = arith.constant 0 : index
    %c0_34 = arith.constant 0 : index
    %51 = vector.load %arg6[%c0_33, %c0_34] : memref<32x128xf32, #tpu.memory_space<vmem>>, vector<32x128xf32>
    %52 = arith.subf %51, %50 : vector<32x128xf32>
    %53 = math.absf %50 : vector<32x128xf32>
    %54 = math.absf %52 : vector<32x128xf32>
    %cst_35 = arith.constant 1.000000e+00 : f32
    %55 = vector.broadcast %cst_35 : f32 to vector<32x128xf32>
    %56 = arith.cmpf olt, %53, %55 : vector<32x128xf32>
    %cst_36 = arith.constant 5.000000e-01 : f32
    %57 = vector.broadcast %cst_36 : f32 to vector<32x128xf32>
    %58 = arith.mulf %57, %50 : vector<32x128xf32>
    %59 = arith.mulf %58, %50 : vector<32x128xf32>
    %cst_37 = arith.constant 5.000000e-01 : f32
    %60 = vector.broadcast %cst_37 : f32 to vector<32x128xf32>
    %61 = arith.subf %53, %60 : vector<32x128xf32>
    %62 = arith.select %56, %59, %61 : vector<32x128xi1>, vector<32x128xf32>
    %63 = arith.addf %54, %62 : vector<32x128xf32>
    %64 = vector.extract_strided_slice %63 {offsets = [0, 0], sizes = [8, 128], strides = [1, 1]} : vector<32x128xf32> to vector<8x128xf32>
    %65 = vector.extract_strided_slice %63 {offsets = [8, 0], sizes = [8, 128], strides = [1, 1]} : vector<32x128xf32> to vector<8x128xf32>
    %66 = arith.addf %64, %65 : vector<8x128xf32>
    %67 = vector.extract_strided_slice %63 {offsets = [16, 0], sizes = [8, 128], strides = [1, 1]} : vector<32x128xf32> to vector<8x128xf32>
    %68 = arith.addf %66, %67 : vector<8x128xf32>
    %69 = vector.extract_strided_slice %63 {offsets = [24, 0], sizes = [8, 128], strides = [1, 1]} : vector<32x128xf32> to vector<8x128xf32>
    %70 = arith.addf %68, %69 : vector<8x128xf32>
    %71 = arith.addf %39, %70 : vector<8x128xf32>
    %c0_38 = arith.constant 0 : index
    %c0_39 = arith.constant 0 : index
    %72 = vector.load %arg1[%c0_38, %c0_39] : memref<32x32xbf16, #tpu.memory_space<vmem>>, vector<32x32xbf16>
    %c0_40 = arith.constant 0 : index
    %c0_41 = arith.constant 0 : index
    %73 = vector.load %arg5[%c0_40, %c0_41] : memref<32x256xbf16, #tpu.memory_space<vmem>>, vector<32x256xbf16>
    %cst_42 = arith.constant dense<0.000000e+00> : vector<32x256xf32>
    %74 = tpu.matmul %72, %73, %cst_42 {dimension_numbers = #tpu.dot_dimension_numbers<[1], [0], [0], [1], [0, 0, 1, 1], [], []>} : vector<32x32xbf16>, vector<32x256xbf16>, vector<32x256xf32> -> vector<32x256xf32>
    %75 = arith.truncf %74 : vector<32x256xf32> to vector<32x256xbf16>
    %c0_43 = arith.constant 0 : index
    %c0_44 = arith.constant 0 : index
    %76 = vector.load %arg2[%c0_43, %c0_44] : memref<256x256xbf16, #tpu.memory_space<vmem>>, vector<256x256xbf16>
    %cst_45 = arith.constant dense<0.000000e+00> : vector<32x256xf32>
    %77 = tpu.matmul %75, %76, %cst_45 {dimension_numbers = #tpu.dot_dimension_numbers<[1], [0], [0], [1], [0, 0, 1, 1], [], []>} : vector<32x256xbf16>, vector<256x256xbf16>, vector<32x256xf32> -> vector<32x256xf32>
    %78 = arith.truncf %77 : vector<32x256xf32> to vector<32x256xbf16>
    %c0_46 = arith.constant 0 : index
    %c0_47 = arith.constant 0 : index
    %79 = vector.load %arg5[%c0_46, %c0_47] : memref<32x256xbf16, #tpu.memory_space<vmem>>, vector<32x256xbf16>
    tpu.vector_store %arg5[%c0_46, %c0_47], %78 {strides = array<i32>} : memref<32x256xbf16, #tpu.memory_space<vmem>>, vector<32x256xbf16>,
    %80 = vector.extract_strided_slice %77 {offsets = [0, 0], sizes = [32, 128], strides = [1, 1]} : vector<32x256xf32> to vector<32x128xf32>
    %81 = vector.extract_strided_slice %77 {offsets = [0, 128], sizes = [32, 128], strides = [1, 1]} : vector<32x256xf32> to vector<32x128xf32>
    %82 = arith.subf %80, %81 : vector<32x128xf32>
    %c0_48 = arith.constant 0 : index
    %c0_49 = arith.constant 0 : index
    %83 = vector.load %arg6[%c0_48, %c0_49] : memref<32x128xf32, #tpu.memory_space<vmem>>, vector<32x128xf32>
    %84 = arith.subf %83, %82 : vector<32x128xf32>
    %85 = math.absf %82 : vector<32x128xf32>
    %86 = math.absf %84 : vector<32x128xf32>
    %cst_50 = arith.constant 1.000000e+00 : f32
    %87 = vector.broadcast %cst_50 : f32 to vector<32x128xf32>
    %88 = arith.cmpf olt, %85, %87 : vector<32x128xf32>
    %cst_51 = arith.constant 5.000000e-01 : f32
    %89 = vector.broadcast %cst_51 : f32 to vector<32x128xf32>
    %90 = arith.mulf %89, %82 : vector<32x128xf32>
    %91 = arith.mulf %90, %82 : vector<32x128xf32>
    %cst_52 = arith.constant 5.000000e-01 : f32
    %92 = vector.broadcast %cst_52 : f32 to vector<32x128xf32>
    %93 = arith.subf %85, %92 : vector<32x128xf32>
    %94 = arith.select %88, %91, %93 : vector<32x128xi1>, vector<32x128xf32>
    %95 = arith.addf %86, %94 : vector<32x128xf32>
    %96 = vector.extract_strided_slice %95 {offsets = [0, 0], sizes = [8, 128], strides = [1, 1]} : vector<32x128xf32> to vector<8x128xf32>
    %97 = vector.extract_strided_slice %95 {offsets = [8, 0], sizes = [8, 128], strides = [1, 1]} : vector<32x128xf32> to vector<8x128xf32>
    %98 = arith.addf %96, %97 : vector<8x128xf32>
    %99 = vector.extract_strided_slice %95 {offsets = [16, 0], sizes = [8, 128], strides = [1, 1]} : vector<32x128xf32> to vector<8x128xf32>
    %100 = arith.addf %98, %99 : vector<8x128xf32>
    %101 = vector.extract_strided_slice %95 {offsets = [24, 0], sizes = [8, 128], strides = [1, 1]} : vector<32x128xf32> to vector<8x128xf32>
    %102 = arith.addf %100, %101 : vector<8x128xf32>
    %103 = arith.addf %71, %102 : vector<8x128xf32>
    %c0_53 = arith.constant 0 : index
    %c0_54 = arith.constant 0 : index
    %104 = vector.load %arg1[%c0_53, %c0_54] : memref<32x32xbf16, #tpu.memory_space<vmem>>, vector<32x32xbf16>
    %c0_55 = arith.constant 0 : index
    %c0_56 = arith.constant 0 : index
    %105 = vector.load %arg5[%c0_55, %c0_56] : memref<32x256xbf16, #tpu.memory_space<vmem>>, vector<32x256xbf16>
    %cst_57 = arith.constant dense<0.000000e+00> : vector<32x256xf32>
    %106 = tpu.matmul %104, %105, %cst_57 {dimension_numbers = #tpu.dot_dimension_numbers<[1], [0], [0], [1], [0, 0, 1, 1], [], []>} : vector<32x32xbf16>, vector<32x256xbf16>, vector<32x256xf32> -> vector<32x256xf32>
    %107 = arith.truncf %106 : vector<32x256xf32> to vector<32x256xbf16>
    %c0_58 = arith.constant 0 : index
    %c0_59 = arith.constant 0 : index
    %108 = vector.load %arg2[%c0_58, %c0_59] : memref<256x256xbf16, #tpu.memory_space<vmem>>, vector<256x256xbf16>
    %cst_60 = arith.constant dense<0.000000e+00> : vector<32x256xf32>
    %109 = tpu.matmul %107, %108, %cst_60 {dimension_numbers = #tpu.dot_dimension_numbers<[1], [0], [0], [1], [0, 0, 1, 1], [], []>} : vector<32x256xbf16>, vector<256x256xbf16>, vector<32x256xf32> -> vector<32x256xf32>
    %110 = arith.truncf %109 : vector<32x256xf32> to vector<32x256xbf16>
    %c0_61 = arith.constant 0 : index
    %c0_62 = arith.constant 0 : index
    %111 = vector.load %arg5[%c0_61, %c0_62] : memref<32x256xbf16, #tpu.memory_space<vmem>>, vector<32x256xbf16>
    tpu.vector_store %arg5[%c0_61, %c0_62], %110 {strides = array<i32>} : memref<32x256xbf16, #tpu.memory_space<vmem>>, vector<32x256xbf16>,
    %112 = vector.extract_strided_slice %109 {offsets = [0, 0], sizes = [32, 128], strides = [1, 1]} : vector<32x256xf32> to vector<32x128xf32>
    %113 = vector.extract_strided_slice %109 {offsets = [0, 128], sizes = [32, 128], strides = [1, 1]} : vector<32x256xf32> to vector<32x128xf32>
    %114 = arith.subf %112, %113 : vector<32x128xf32>
    %c0_63 = arith.constant 0 : index
    %c0_64 = arith.constant 0 : index
    %115 = vector.load %arg6[%c0_63, %c0_64] : memref<32x128xf32, #tpu.memory_space<vmem>>, vector<32x128xf32>
    %116 = arith.subf %115, %114 : vector<32x128xf32>
    %117 = math.absf %114 : vector<32x128xf32>
    %118 = math.absf %116 : vector<32x128xf32>
    %cst_65 = arith.constant 1.000000e+00 : f32
    %119 = vector.broadcast %cst_65 : f32 to vector<32x128xf32>
    %120 = arith.cmpf olt, %117, %119 : vector<32x128xf32>
    %cst_66 = arith.constant 5.000000e-01 : f32
    %121 = vector.broadcast %cst_66 : f32 to vector<32x128xf32>
    %122 = arith.mulf %121, %114 : vector<32x128xf32>
    %123 = arith.mulf %122, %114 : vector<32x128xf32>
    %cst_67 = arith.constant 5.000000e-01 : f32
    %124 = vector.broadcast %cst_67 : f32 to vector<32x128xf32>
    %125 = arith.subf %117, %124 : vector<32x128xf32>
    %126 = arith.select %120, %123, %125 : vector<32x128xi1>, vector<32x128xf32>
    %127 = arith.addf %118, %126 : vector<32x128xf32>
    %128 = vector.extract_strided_slice %127 {offsets = [0, 0], sizes = [8, 128], strides = [1, 1]} : vector<32x128xf32> to vector<8x128xf32>
    %129 = vector.extract_strided_slice %127 {offsets = [8, 0], sizes = [8, 128], strides = [1, 1]} : vector<32x128xf32> to vector<8x128xf32>
    %130 = arith.addf %128, %129 : vector<8x128xf32>
    %131 = vector.extract_strided_slice %127 {offsets = [16, 0], sizes = [8, 128], strides = [1, 1]} : vector<32x128xf32> to vector<8x128xf32>
    %132 = arith.addf %130, %131 : vector<8x128xf32>
    %133 = vector.extract_strided_slice %127 {offsets = [24, 0], sizes = [8, 128], strides = [1, 1]} : vector<32x128xf32> to vector<8x128xf32>
    %134 = arith.addf %132, %133 : vector<8x128xf32>
    %135 = arith.addf %103, %134 : vector<8x128xf32>
    %c0_68 = arith.constant 0 : index
    %c0_69 = arith.constant 0 : index
    %136 = vector.load %arg1[%c0_68, %c0_69] : memref<32x32xbf16, #tpu.memory_space<vmem>>, vector<32x32xbf16>
    %c0_70 = arith.constant 0 : index
    %c0_71 = arith.constant 0 : index
    %137 = vector.load %arg5[%c0_70, %c0_71] : memref<32x256xbf16, #tpu.memory_space<vmem>>, vector<32x256xbf16>
    %cst_72 = arith.constant dense<0.000000e+00> : vector<32x256xf32>
    %138 = tpu.matmul %136, %137, %cst_72 {dimension_numbers = #tpu.dot_dimension_numbers<[1], [0], [0], [1], [0, 0, 1, 1], [], []>} : vector<32x32xbf16>, vector<32x256xbf16>, vector<32x256xf32> -> vector<32x256xf32>
    %139 = arith.truncf %138 : vector<32x256xf32> to vector<32x256xbf16>
    %c0_73 = arith.constant 0 : index
    %c0_74 = arith.constant 0 : index
    %140 = vector.load %arg2[%c0_73, %c0_74] : memref<256x256xbf16, #tpu.memory_space<vmem>>, vector<256x256xbf16>
    %cst_75 = arith.constant dense<0.000000e+00> : vector<32x256xf32>
    %141 = tpu.matmul %139, %140, %cst_75 {dimension_numbers = #tpu.dot_dimension_numbers<[1], [0], [0], [1], [0, 0, 1, 1], [], []>} : vector<32x256xbf16>, vector<256x256xbf16>, vector<32x256xf32> -> vector<32x256xf32>
    %142 = arith.truncf %141 : vector<32x256xf32> to vector<32x256xbf16>
    %c0_76 = arith.constant 0 : index
    %c0_77 = arith.constant 0 : index
    %143 = vector.load %arg5[%c0_76, %c0_77] : memref<32x256xbf16, #tpu.memory_space<vmem>>, vector<32x256xbf16>
    tpu.vector_store %arg5[%c0_76, %c0_77], %142 {strides = array<i32>} : memref<32x256xbf16, #tpu.memory_space<vmem>>, vector<32x256xbf16>,
    %144 = vector.extract_strided_slice %141 {offsets = [0, 0], sizes = [32, 128], strides = [1, 1]} : vector<32x256xf32> to vector<32x128xf32>
    %145 = vector.extract_strided_slice %141 {offsets = [0, 128], sizes = [32, 128], strides = [1, 1]} : vector<32x256xf32> to vector<32x128xf32>
    %146 = arith.subf %144, %145 : vector<32x128xf32>
    %c0_78 = arith.constant 0 : index
    %c0_79 = arith.constant 0 : index
    %147 = vector.load %arg6[%c0_78, %c0_79] : memref<32x128xf32, #tpu.memory_space<vmem>>, vector<32x128xf32>
    %148 = arith.subf %147, %146 : vector<32x128xf32>
    %149 = math.absf %146 : vector<32x128xf32>
    %150 = math.absf %148 : vector<32x128xf32>
    %cst_80 = arith.constant 1.000000e+00 : f32
    %151 = vector.broadcast %cst_80 : f32 to vector<32x128xf32>
    %152 = arith.cmpf olt, %149, %151 : vector<32x128xf32>
    %cst_81 = arith.constant 5.000000e-01 : f32
    %153 = vector.broadcast %cst_81 : f32 to vector<32x128xf32>
    %154 = arith.mulf %153, %146 : vector<32x128xf32>
    %155 = arith.mulf %154, %146 : vector<32x128xf32>
    %cst_82 = arith.constant 5.000000e-01 : f32
    %156 = vector.broadcast %cst_82 : f32 to vector<32x128xf32>
    %157 = arith.subf %149, %156 : vector<32x128xf32>
    %158 = arith.select %152, %155, %157 : vector<32x128xi1>, vector<32x128xf32>
    %159 = arith.addf %150, %158 : vector<32x128xf32>
    %160 = vector.extract_strided_slice %159 {offsets = [0, 0], sizes = [8, 128], strides = [1, 1]} : vector<32x128xf32> to vector<8x128xf32>
    %161 = vector.extract_strided_slice %159 {offsets = [8, 0], sizes = [8, 128], strides = [1, 1]} : vector<32x128xf32> to vector<8x128xf32>
    %162 = arith.addf %160, %161 : vector<8x128xf32>
    %163 = vector.extract_strided_slice %159 {offsets = [16, 0], sizes = [8, 128], strides = [1, 1]} : vector<32x128xf32> to vector<8x128xf32>
    %164 = arith.addf %162, %163 : vector<8x128xf32>
    %165 = vector.extract_strided_slice %159 {offsets = [24, 0], sizes = [8, 128], strides = [1, 1]} : vector<32x128xf32> to vector<8x128xf32>
    %166 = arith.addf %164, %165 : vector<8x128xf32>
    %167 = arith.addf %135, %166 : vector<8x128xf32>
    %c0_83 = arith.constant 0 : index
    %c0_84 = arith.constant 0 : index
    %168 = vector.load %arg1[%c0_83, %c0_84] : memref<32x32xbf16, #tpu.memory_space<vmem>>, vector<32x32xbf16>
    %c0_85 = arith.constant 0 : index
    %c0_86 = arith.constant 0 : index
    %169 = vector.load %arg5[%c0_85, %c0_86] : memref<32x256xbf16, #tpu.memory_space<vmem>>, vector<32x256xbf16>
    %cst_87 = arith.constant dense<0.000000e+00> : vector<32x256xf32>
    %170 = tpu.matmul %168, %169, %cst_87 {dimension_numbers = #tpu.dot_dimension_numbers<[1], [0], [0], [1], [0, 0, 1, 1], [], []>} : vector<32x32xbf16>, vector<32x256xbf16>, vector<32x256xf32> -> vector<32x256xf32>
    %171 = arith.truncf %170 : vector<32x256xf32> to vector<32x256xbf16>
    %c0_88 = arith.constant 0 : index
    %c0_89 = arith.constant 0 : index
    %172 = vector.load %arg2[%c0_88, %c0_89] : memref<256x256xbf16, #tpu.memory_space<vmem>>, vector<256x256xbf16>
    %cst_90 = arith.constant dense<0.000000e+00> : vector<32x256xf32>
    %173 = tpu.matmul %171, %172, %cst_90 {dimension_numbers = #tpu.dot_dimension_numbers<[1], [0], [0], [1], [0, 0, 1, 1], [], []>} : vector<32x256xbf16>, vector<256x256xbf16>, vector<32x256xf32> -> vector<32x256xf32>
    %174 = arith.truncf %173 : vector<32x256xf32> to vector<32x256xbf16>
    %c0_91 = arith.constant 0 : index
    %c0_92 = arith.constant 0 : index
    %175 = vector.load %arg5[%c0_91, %c0_92] : memref<32x256xbf16, #tpu.memory_space<vmem>>, vector<32x256xbf16>
    tpu.vector_store %arg5[%c0_91, %c0_92], %174 {strides = array<i32>} : memref<32x256xbf16, #tpu.memory_space<vmem>>, vector<32x256xbf16>,
    %176 = vector.extract_strided_slice %173 {offsets = [0, 0], sizes = [32, 128], strides = [1, 1]} : vector<32x256xf32> to vector<32x128xf32>
    %177 = vector.extract_strided_slice %173 {offsets = [0, 128], sizes = [32, 128], strides = [1, 1]} : vector<32x256xf32> to vector<32x128xf32>
    %178 = arith.subf %176, %177 : vector<32x128xf32>
    %c0_93 = arith.constant 0 : index
    %c0_94 = arith.constant 0 : index
    %179 = vector.load %arg6[%c0_93, %c0_94] : memref<32x128xf32, #tpu.memory_space<vmem>>, vector<32x128xf32>
    %180 = arith.subf %179, %178 : vector<32x128xf32>
    %181 = math.absf %178 : vector<32x128xf32>
    %182 = math.absf %180 : vector<32x128xf32>
    %cst_95 = arith.constant 1.000000e+00 : f32
    %183 = vector.broadcast %cst_95 : f32 to vector<32x128xf32>
    %184 = arith.cmpf olt, %181, %183 : vector<32x128xf32>
    %cst_96 = arith.constant 5.000000e-01 : f32
    %185 = vector.broadcast %cst_96 : f32 to vector<32x128xf32>
    %186 = arith.mulf %185, %178 : vector<32x128xf32>
    %187 = arith.mulf %186, %178 : vector<32x128xf32>
    %cst_97 = arith.constant 5.000000e-01 : f32
    %188 = vector.broadcast %cst_97 : f32 to vector<32x128xf32>
    %189 = arith.subf %181, %188 : vector<32x128xf32>
    %190 = arith.select %184, %187, %189 : vector<32x128xi1>, vector<32x128xf32>
    %191 = arith.addf %182, %190 : vector<32x128xf32>
    %192 = vector.extract_strided_slice %191 {offsets = [0, 0], sizes = [8, 128], strides = [1, 1]} : vector<32x128xf32> to vector<8x128xf32>
    %193 = vector.extract_strided_slice %191 {offsets = [8, 0], sizes = [8, 128], strides = [1, 1]} : vector<32x128xf32> to vector<8x128xf32>
    %194 = arith.addf %192, %193 : vector<8x128xf32>
    %195 = vector.extract_strided_slice %191 {offsets = [16, 0], sizes = [8, 128], strides = [1, 1]} : vector<32x128xf32> to vector<8x128xf32>
    %196 = arith.addf %194, %195 : vector<8x128xf32>
    %197 = vector.extract_strided_slice %191 {offsets = [24, 0], sizes = [8, 128], strides = [1, 1]} : vector<32x128xf32> to vector<8x128xf32>
    %198 = arith.addf %196, %197 : vector<8x128xf32>
    %199 = arith.addf %167, %198 : vector<8x128xf32>
    %c0_98 = arith.constant 0 : index
    %c0_99 = arith.constant 0 : index
    %200 = vector.load %arg1[%c0_98, %c0_99] : memref<32x32xbf16, #tpu.memory_space<vmem>>, vector<32x32xbf16>
    %c0_100 = arith.constant 0 : index
    %c0_101 = arith.constant 0 : index
    %201 = vector.load %arg5[%c0_100, %c0_101] : memref<32x256xbf16, #tpu.memory_space<vmem>>, vector<32x256xbf16>
    %cst_102 = arith.constant dense<0.000000e+00> : vector<32x256xf32>
    %202 = tpu.matmul %200, %201, %cst_102 {dimension_numbers = #tpu.dot_dimension_numbers<[1], [0], [0], [1], [0, 0, 1, 1], [], []>} : vector<32x32xbf16>, vector<32x256xbf16>, vector<32x256xf32> -> vector<32x256xf32>
    %203 = arith.truncf %202 : vector<32x256xf32> to vector<32x256xbf16>
    %c0_103 = arith.constant 0 : index
    %c0_104 = arith.constant 0 : index
    %204 = vector.load %arg2[%c0_103, %c0_104] : memref<256x256xbf16, #tpu.memory_space<vmem>>, vector<256x256xbf16>
    %cst_105 = arith.constant dense<0.000000e+00> : vector<32x256xf32>
    %205 = tpu.matmul %203, %204, %cst_105 {dimension_numbers = #tpu.dot_dimension_numbers<[1], [0], [0], [1], [0, 0, 1, 1], [], []>} : vector<32x256xbf16>, vector<256x256xbf16>, vector<32x256xf32> -> vector<32x256xf32>
    %206 = arith.truncf %205 : vector<32x256xf32> to vector<32x256xbf16>
    %c0_106 = arith.constant 0 : index
    %c0_107 = arith.constant 0 : index
    %207 = vector.load %arg5[%c0_106, %c0_107] : memref<32x256xbf16, #tpu.memory_space<vmem>>, vector<32x256xbf16>
    tpu.vector_store %arg5[%c0_106, %c0_107], %206 {strides = array<i32>} : memref<32x256xbf16, #tpu.memory_space<vmem>>, vector<32x256xbf16>,
    %208 = vector.extract_strided_slice %205 {offsets = [0, 0], sizes = [32, 128], strides = [1, 1]} : vector<32x256xf32> to vector<32x128xf32>
    %209 = vector.extract_strided_slice %205 {offsets = [0, 128], sizes = [32, 128], strides = [1, 1]} : vector<32x256xf32> to vector<32x128xf32>
    %210 = arith.subf %208, %209 : vector<32x128xf32>
    %c0_108 = arith.constant 0 : index
    %c0_109 = arith.constant 0 : index
    %211 = vector.load %arg6[%c0_108, %c0_109] : memref<32x128xf32, #tpu.memory_space<vmem>>, vector<32x128xf32>
    %212 = arith.subf %211, %210 : vector<32x128xf32>
    %213 = math.absf %210 : vector<32x128xf32>
    %214 = math.absf %212 : vector<32x128xf32>
    %cst_110 = arith.constant 1.000000e+00 : f32
    %215 = vector.broadcast %cst_110 : f32 to vector<32x128xf32>
    %216 = arith.cmpf olt, %213, %215 : vector<32x128xf32>
    %cst_111 = arith.constant 5.000000e-01 : f32
    %217 = vector.broadcast %cst_111 : f32 to vector<32x128xf32>
    %218 = arith.mulf %217, %210 : vector<32x128xf32>
    %219 = arith.mulf %218, %210 : vector<32x128xf32>
    %cst_112 = arith.constant 5.000000e-01 : f32
    %220 = vector.broadcast %cst_112 : f32 to vector<32x128xf32>
    %221 = arith.subf %213, %220 : vector<32x128xf32>
    %222 = arith.select %216, %219, %221 : vector<32x128xi1>, vector<32x128xf32>
    %223 = arith.addf %214, %222 : vector<32x128xf32>
    %224 = vector.extract_strided_slice %223 {offsets = [0, 0], sizes = [8, 128], strides = [1, 1]} : vector<32x128xf32> to vector<8x128xf32>
    %225 = vector.extract_strided_slice %223 {offsets = [8, 0], sizes = [8, 128], strides = [1, 1]} : vector<32x128xf32> to vector<8x128xf32>
    %226 = arith.addf %224, %225 : vector<8x128xf32>
    %227 = vector.extract_strided_slice %223 {offsets = [16, 0], sizes = [8, 128], strides = [1, 1]} : vector<32x128xf32> to vector<8x128xf32>
    %228 = arith.addf %226, %227 : vector<8x128xf32>
    %229 = vector.extract_strided_slice %223 {offsets = [24, 0], sizes = [8, 128], strides = [1, 1]} : vector<32x128xf32> to vector<8x128xf32>
    %230 = arith.addf %228, %229 : vector<8x128xf32>
    %231 = arith.addf %199, %230 : vector<8x128xf32>
    %c0_113 = arith.constant 0 : index
    %c0_114 = arith.constant 0 : index
    %232 = vector.load %arg1[%c0_113, %c0_114] : memref<32x32xbf16, #tpu.memory_space<vmem>>, vector<32x32xbf16>
    %c0_115 = arith.constant 0 : index
    %c0_116 = arith.constant 0 : index
    %233 = vector.load %arg5[%c0_115, %c0_116] : memref<32x256xbf16, #tpu.memory_space<vmem>>, vector<32x256xbf16>
    %cst_117 = arith.constant dense<0.000000e+00> : vector<32x256xf32>
    %234 = tpu.matmul %232, %233, %cst_117 {dimension_numbers = #tpu.dot_dimension_numbers<[1], [0], [0], [1], [0, 0, 1, 1], [], []>} : vector<32x32xbf16>, vector<32x256xbf16>, vector<32x256xf32> -> vector<32x256xf32>
    %235 = arith.truncf %234 : vector<32x256xf32> to vector<32x256xbf16>
    %c0_118 = arith.constant 0 : index
    %c0_119 = arith.constant 0 : index
    %236 = vector.load %arg2[%c0_118, %c0_119] : memref<256x256xbf16, #tpu.memory_space<vmem>>, vector<256x256xbf16>
    %cst_120 = arith.constant dense<0.000000e+00> : vector<32x256xf32>
    %237 = tpu.matmul %235, %236, %cst_120 {dimension_numbers = #tpu.dot_dimension_numbers<[1], [0], [0], [1], [0, 0, 1, 1], [], []>} : vector<32x256xbf16>, vector<256x256xbf16>, vector<32x256xf32> -> vector<32x256xf32>
    %238 = arith.truncf %237 : vector<32x256xf32> to vector<32x256xbf16>
    %c0_121 = arith.constant 0 : index
    %c0_122 = arith.constant 0 : index
    %239 = vector.load %arg5[%c0_121, %c0_122] : memref<32x256xbf16, #tpu.memory_space<vmem>>, vector<32x256xbf16>
    tpu.vector_store %arg5[%c0_121, %c0_122], %238 {strides = array<i32>} : memref<32x256xbf16, #tpu.memory_space<vmem>>, vector<32x256xbf16>,
    %240 = vector.extract_strided_slice %237 {offsets = [0, 0], sizes = [32, 128], strides = [1, 1]} : vector<32x256xf32> to vector<32x128xf32>
    %241 = vector.extract_strided_slice %237 {offsets = [0, 128], sizes = [32, 128], strides = [1, 1]} : vector<32x256xf32> to vector<32x128xf32>
    %242 = arith.subf %240, %241 : vector<32x128xf32>
    %c0_123 = arith.constant 0 : index
    %c0_124 = arith.constant 0 : index
    %243 = vector.load %arg6[%c0_123, %c0_124] : memref<32x128xf32, #tpu.memory_space<vmem>>, vector<32x128xf32>
    %244 = arith.subf %243, %242 : vector<32x128xf32>
    %245 = math.absf %242 : vector<32x128xf32>
    %246 = math.absf %244 : vector<32x128xf32>
    %cst_125 = arith.constant 1.000000e+00 : f32
    %247 = vector.broadcast %cst_125 : f32 to vector<32x128xf32>
    %248 = arith.cmpf olt, %245, %247 : vector<32x128xf32>
    %cst_126 = arith.constant 5.000000e-01 : f32
    %249 = vector.broadcast %cst_126 : f32 to vector<32x128xf32>
    %250 = arith.mulf %249, %242 : vector<32x128xf32>
    %251 = arith.mulf %250, %242 : vector<32x128xf32>
    %cst_127 = arith.constant 5.000000e-01 : f32
    %252 = vector.broadcast %cst_127 : f32 to vector<32x128xf32>
    %253 = arith.subf %245, %252 : vector<32x128xf32>
    %254 = arith.select %248, %251, %253 : vector<32x128xi1>, vector<32x128xf32>
    %255 = arith.addf %246, %254 : vector<32x128xf32>
    %256 = vector.extract_strided_slice %255 {offsets = [0, 0], sizes = [8, 128], strides = [1, 1]} : vector<32x128xf32> to vector<8x128xf32>
    %257 = vector.extract_strided_slice %255 {offsets = [8, 0], sizes = [8, 128], strides = [1, 1]} : vector<32x128xf32> to vector<8x128xf32>
    %258 = arith.addf %256, %257 : vector<8x128xf32>
    %259 = vector.extract_strided_slice %255 {offsets = [16, 0], sizes = [8, 128], strides = [1, 1]} : vector<32x128xf32> to vector<8x128xf32>
    %260 = arith.addf %258, %259 : vector<8x128xf32>
    %261 = vector.extract_strided_slice %255 {offsets = [24, 0], sizes = [8, 128], strides = [1, 1]} : vector<32x128xf32> to vector<8x128xf32>
    %262 = arith.addf %260, %261 : vector<8x128xf32>
    %263 = arith.addf %231, %262 : vector<8x128xf32>
    %c0_128 = arith.constant 0 : index
    %c0_129 = arith.constant 0 : index
    %c0_130 = arith.constant 0 : index
    %264 = vector.load %arg4[%c0_128, %c0_129, %c0_130] : memref<1x8x128xf32, #tpu.memory_space<vmem>>, vector<1x8x128xf32>
    %265 = vector.shape_cast %264 : vector<1x8x128xf32> to vector<8x128xf32>
    %266 = vector.shape_cast %263 : vector<8x128xf32> to vector<1x8x128xf32>
    tpu.vector_store %arg4[%c0_128, %c0_129, %c0_130], %266 {strides = array<i32>} : memref<1x8x128xf32, #tpu.memory_space<vmem>>, vector<1x8x128xf32>,
    return
  }
  func.func @transform_0(%arg0: i32) -> (i32, i32) {
    %c0_i32 = arith.constant 0 : i32
    %c0_i32_0 = arith.constant 0 : i32
    %c0_i32_1 = arith.constant 0 : i32
    return %c0_i32, %c0_i32_0 : i32, i32
  }
  func.func @transform_1(%arg0: i32) -> (i32, i32) {
    %c0_i32 = arith.constant 0 : i32
    %c0_i32_0 = arith.constant 0 : i32
    %c0_i32_1 = arith.constant 0 : i32
    return %c0_i32, %c0_i32_0 : i32, i32
  }
  func.func @transform_2(%arg0: i32) -> (i32, i32) {
    %c0_i32 = arith.constant 0 : i32
    %c0_i32_0 = arith.constant 0 : i32
    return %arg0, %c0_i32 : i32, i32
  }
  func.func @transform_3(%arg0: i32) -> (i32, i32, i32) {
    %c0_i32 = arith.constant 0 : i32
    %c0_i32_0 = arith.constant 0 : i32
    %c0_i32_1 = arith.constant 0 : i32
    return %arg0, %c0_i32, %c0_i32_0 : i32, i32, i32
  }
}

module attributes {stable_mosaic.version = 11 : i64} {
  func.func @kernel(%arg0: i32, %arg1: memref<32x32xbf16, #tpu.memory_space<vmem>>, %arg2: memref<256x256xbf16, #tpu.memory_space<vmem>>, %arg3: memref<32x256xf32, #tpu.memory_space<vmem>>, %arg4: memref<1x8x128xf32, #tpu.memory_space<vmem>>, %arg5: memref<32x256xbf16, #tpu.memory_space<vmem>>, %arg6: memref<32x128xf32, #tpu.memory_space<vmem>>) attributes {dimension_semantics = [#tpu.dimension_semantics<parallel>], iteration_bounds = array<i64: 2>, scalar_prefetch = 0 : i64, scratch_operands = 2 : i64, tpu.core_type = #tpu.core_type<tc>, window_params = [{pipeline_mode = #tpu.pipeline_mode<synchronous>, transform_indices = @transform_0, window_bounds = array<i64: 32, 32>}, {pipeline_mode = #tpu.pipeline_mode<synchronous>, transform_indices = @transform_1, window_bounds = array<i64: 256, 256>}, {transform_indices = @transform_2, window_bounds = array<i64: 32, 256>}, {transform_indices = @transform_3, window_bounds = array<i64: 1, 8, 128>}]} {
    %cst = arith.constant 0.000000e+00 : f32
    %0 = vector.broadcast %cst : f32 to vector<8x128xf32>
    %c0 = arith.constant 0 : index
    %c0_0 = arith.constant 0 : index
    %1 = vector.load %arg3[%c0, %c0_0] : memref<32x256xf32, #tpu.memory_space<vmem>>, vector<32x128xf32>
    %c0_1 = arith.constant 0 : index
    %c128 = arith.constant 128 : index
    %2 = vector.load %arg3[%c0_1, %c128] : memref<32x256xf32, #tpu.memory_space<vmem>>, vector<32x128xf32>
    %3 = arith.subf %1, %2 : vector<32x128xf32>
    %c0_2 = arith.constant 0 : index
    %c0_3 = arith.constant 0 : index
    %4 = vector.load %arg6[%c0_2, %c0_3] : memref<32x128xf32, #tpu.memory_space<vmem>>, vector<32x128xf32>
    tpu.vector_store %arg6[%c0_2, %c0_3], %3 {strides = array<i32>} : memref<32x128xf32, #tpu.memory_space<vmem>>, vector<32x128xf32>,
    %c0_4 = arith.constant 0 : index
    %c0_5 = arith.constant 0 : index
    %5 = vector.load %arg3[%c0_4, %c0_5] : memref<32x256xf32, #tpu.memory_space<vmem>>, vector<32x256xf32>
    %6 = arith.truncf %5 : vector<32x256xf32> to vector<32x256xbf16>
    %c0_6 = arith.constant 0 : index
    %c0_7 = arith.constant 0 : index
    %7 = vector.load %arg5[%c0_6, %c0_7] : memref<32x256xbf16, #tpu.memory_space<vmem>>, vector<32x256xbf16>
    tpu.vector_store %arg5[%c0_6, %c0_7], %6 {strides = array<i32>} : memref<32x256xbf16, #tpu.memory_space<vmem>>, vector<32x256xbf16>,
    %c0_8 = arith.constant 0 : index
    %c0_9 = arith.constant 0 : index
    %8 = vector.load %arg1[%c0_8, %c0_9] : memref<32x32xbf16, #tpu.memory_space<vmem>>, vector<32x32xbf16>
    %c0_10 = arith.constant 0 : index
    %c0_11 = arith.constant 0 : index
    %9 = vector.load %arg5[%c0_10, %c0_11] : memref<32x256xbf16, #tpu.memory_space<vmem>>, vector<32x256xbf16>
    %cst_12 = arith.constant dense<0.000000e+00> : vector<32x256xf32>
    %10 = tpu.matmul %8, %9, %cst_12 {dimension_numbers = #tpu.dot_dimension_numbers<[1], [0], [0], [1], [0, 0, 1, 1], [], []>} : vector<32x32xbf16>, vector<32x256xbf16>, vector<32x256xf32> -> vector<32x256xf32>
    %11 = arith.truncf %10 : vector<32x256xf32> to vector<32x256xbf16>
    %c0_13 = arith.constant 0 : index
    %c0_14 = arith.constant 0 : index
    %12 = vector.load %arg2[%c0_13, %c0_14] : memref<256x256xbf16, #tpu.memory_space<vmem>>, vector<256x256xbf16>
    %cst_15 = arith.constant dense<0.000000e+00> : vector<32x256xf32>
    %13 = tpu.matmul %11, %12, %cst_15 {dimension_numbers = #tpu.dot_dimension_numbers<[1], [0], [0], [1], [0, 0, 1, 1], [], []>} : vector<32x256xbf16>, vector<256x256xbf16>, vector<32x256xf32> -> vector<32x256xf32>
    %14 = arith.truncf %13 : vector<32x256xf32> to vector<32x256xbf16>
    %c0_16 = arith.constant 0 : index
    %c0_17 = arith.constant 0 : index
    %15 = vector.load %arg5[%c0_16, %c0_17] : memref<32x256xbf16, #tpu.memory_space<vmem>>, vector<32x256xbf16>
    tpu.vector_store %arg5[%c0_16, %c0_17], %14 {strides = array<i32>} : memref<32x256xbf16, #tpu.memory_space<vmem>>, vector<32x256xbf16>,
    %16 = vector.extract_strided_slice %13 {offsets = [0, 0], sizes = [32, 128], strides = [1, 1]} : vector<32x256xf32> to vector<32x128xf32>
    %17 = vector.extract_strided_slice %13 {offsets = [0, 128], sizes = [32, 128], strides = [1, 1]} : vector<32x256xf32> to vector<32x128xf32>
    %18 = arith.subf %16, %17 : vector<32x128xf32>
    %c0_18 = arith.constant 0 : index
    %c0_19 = arith.constant 0 : index
    %19 = vector.load %arg6[%c0_18, %c0_19] : memref<32x128xf32, #tpu.memory_space<vmem>>, vector<32x128xf32>
    %20 = arith.subf %19, %18 : vector<32x128xf32>
    %21 = math.absf %18 : vector<32x128xf32>
    %22 = math.absf %20 : vector<32x128xf32>
    %cst_20 = arith.constant 1.000000e+00 : f32
    %23 = vector.broadcast %cst_20 : f32 to vector<32x128xf32>
    %24 = arith.cmpf olt, %21, %23 : vector<32x128xf32>
    %cst_21 = arith.constant 5.000000e-01 : f32
    %25 = vector.broadcast %cst_21 : f32 to vector<32x128xf32>
    %26 = arith.mulf %25, %18 : vector<32x128xf32>
    %27 = arith.mulf %26, %18 : vector<32x128xf32>
    %cst_22 = arith.constant 5.000000e-01 : f32
    %28 = vector.broadcast %cst_22 : f32 to vector<32x128xf32>
    %29 = arith.subf %21, %28 : vector<32x128xf32>
    %30 = arith.select %24, %27, %29 : vector<32x128xi1>, vector<32x128xf32>
    %31 = arith.addf %22, %30 : vector<32x128xf32>
    %32 = vector.extract_strided_slice %31 {offsets = [0, 0], sizes = [8, 128], strides = [1, 1]} : vector<32x128xf32> to vector<8x128xf32>
    %33 = vector.extract_strided_slice %31 {offsets = [8, 0], sizes = [8, 128], strides = [1, 1]} : vector<32x128xf32> to vector<8x128xf32>
    %34 = arith.addf %32, %33 : vector<8x128xf32>
    %35 = vector.extract_strided_slice %31 {offsets = [16, 0], sizes = [8, 128], strides = [1, 1]} : vector<32x128xf32> to vector<8x128xf32>
    %36 = arith.addf %34, %35 : vector<8x128xf32>
    %37 = vector.extract_strided_slice %31 {offsets = [24, 0], sizes = [8, 128], strides = [1, 1]} : vector<32x128xf32> to vector<8x128xf32>
    %38 = arith.addf %36, %37 : vector<8x128xf32>
    %39 = arith.addf %0, %38 : vector<8x128xf32>
    %c0_23 = arith.constant 0 : index
    %c0_24 = arith.constant 0 : index
    %40 = vector.load %arg1[%c0_23, %c0_24] : memref<32x32xbf16, #tpu.memory_space<vmem>>, vector<32x32xbf16>
    %c0_25 = arith.constant 0 : index
    %c0_26 = arith.constant 0 : index
    %41 = vector.load %arg5[%c0_25, %c0_26] : memref<32x256xbf16, #tpu.memory_space<vmem>>, vector<32x256xbf16>
    %cst_27 = arith.constant dense<0.000000e+00> : vector<32x256xf32>
    %42 = tpu.matmul %40, %41, %cst_27 {dimension_numbers = #tpu.dot_dimension_numbers<[1], [0], [0], [1], [0, 0, 1, 1], [], []>} : vector<32x32xbf16>, vector<32x256xbf16>, vector<32x256xf32> -> vector<32x256xf32>
    %43 = arith.truncf %42 : vector<32x256xf32> to vector<32x256xbf16>
    %c0_28 = arith.constant 0 : index
    %c0_29 = arith.constant 0 : index
    %44 = vector.load %arg2[%c0_28, %c0_29] : memref<256x256xbf16, #tpu.memory_space<vmem>>, vector<256x256xbf16>
    %cst_30 = arith.constant dense<0.000000e+00> : vector<32x256xf32>
    %45 = tpu.matmul %43, %44, %cst_30 {dimension_numbers = #tpu.dot_dimension_numbers<[1], [0], [0], [1], [0, 0, 1, 1], [], []>} : vector<32x256xbf16>, vector<256x256xbf16>, vector<32x256xf32> -> vector<32x256xf32>
    %46 = arith.truncf %45 : vector<32x256xf32> to vector<32x256xbf16>
    %c0_31 = arith.constant 0 : index
    %c0_32 = arith.constant 0 : index
    %47 = vector.load %arg5[%c0_31, %c0_32] : memref<32x256xbf16, #tpu.memory_space<vmem>>, vector<32x256xbf16>
    tpu.vector_store %arg5[%c0_31, %c0_32], %46 {strides = array<i32>} : memref<32x256xbf16, #tpu.memory_space<vmem>>, vector<32x256xbf16>,
    %48 = vector.extract_strided_slice %45 {offsets = [0, 0], sizes = [32, 128], strides = [1, 1]} : vector<32x256xf32> to vector<32x128xf32>
    %49 = vector.extract_strided_slice %45 {offsets = [0, 128], sizes = [32, 128], strides = [1, 1]} : vector<32x256xf32> to vector<32x128xf32>
    %50 = arith.subf %48, %49 : vector<32x128xf32>
    %c0_33 = arith.constant 0 : index
    %c0_34 = arith.constant 0 : index
    %51 = vector.load %arg6[%c0_33, %c0_34] : memref<32x128xf32, #tpu.memory_space<vmem>>, vector<32x128xf32>
    %52 = arith.subf %51, %50 : vector<32x128xf32>
    %53 = math.absf %50 : vector<32x128xf32>
    %54 = math.absf %52 : vector<32x128xf32>
    %cst_35 = arith.constant 1.000000e+00 : f32
    %55 = vector.broadcast %cst_35 : f32 to vector<32x128xf32>
    %56 = arith.cmpf olt, %53, %55 : vector<32x128xf32>
    %cst_36 = arith.constant 5.000000e-01 : f32
    %57 = vector.broadcast %cst_36 : f32 to vector<32x128xf32>
    %58 = arith.mulf %57, %50 : vector<32x128xf32>
    %59 = arith.mulf %58, %50 : vector<32x128xf32>
    %cst_37 = arith.constant 5.000000e-01 : f32
    %60 = vector.broadcast %cst_37 : f32 to vector<32x128xf32>
    %61 = arith.subf %53, %60 : vector<32x128xf32>
    %62 = arith.select %56, %59, %61 : vector<32x128xi1>, vector<32x128xf32>
    %63 = arith.addf %54, %62 : vector<32x128xf32>
    %64 = vector.extract_strided_slice %63 {offsets = [0, 0], sizes = [8, 128], strides = [1, 1]} : vector<32x128xf32> to vector<8x128xf32>
    %65 = vector.extract_strided_slice %63 {offsets = [8, 0], sizes = [8, 128], strides = [1, 1]} : vector<32x128xf32> to vector<8x128xf32>
    %66 = arith.addf %64, %65 : vector<8x128xf32>
    %67 = vector.extract_strided_slice %63 {offsets = [16, 0], sizes = [8, 128], strides = [1, 1]} : vector<32x128xf32> to vector<8x128xf32>
    %68 = arith.addf %66, %67 : vector<8x128xf32>
    %69 = vector.extract_strided_slice %63 {offsets = [24, 0], sizes = [8, 128], strides = [1, 1]} : vector<32x128xf32> to vector<8x128xf32>
    %70 = arith.addf %68, %69 : vector<8x128xf32>
    %71 = arith.addf %39, %70 : vector<8x128xf32>
    %c0_38 = arith.constant 0 : index
    %c0_39 = arith.constant 0 : index
    %72 = vector.load %arg1[%c0_38, %c0_39] : memref<32x32xbf16, #tpu.memory_space<vmem>>, vector<32x32xbf16>
    %c0_40 = arith.constant 0 : index
    %c0_41 = arith.constant 0 : index
    %73 = vector.load %arg5[%c0_40, %c0_41] : memref<32x256xbf16, #tpu.memory_space<vmem>>, vector<32x256xbf16>
    %cst_42 = arith.constant dense<0.000000e+00> : vector<32x256xf32>
    %74 = tpu.matmul %72, %73, %cst_42 {dimension_numbers = #tpu.dot_dimension_numbers<[1], [0], [0], [1], [0, 0, 1, 1], [], []>} : vector<32x32xbf16>, vector<32x256xbf16>, vector<32x256xf32> -> vector<32x256xf32>
    %75 = arith.truncf %74 : vector<32x256xf32> to vector<32x256xbf16>
    %c0_43 = arith.constant 0 : index
    %c0_44 = arith.constant 0 : index
    %76 = vector.load %arg2[%c0_43, %c0_44] : memref<256x256xbf16, #tpu.memory_space<vmem>>, vector<256x256xbf16>
    %cst_45 = arith.constant dense<0.000000e+00> : vector<32x256xf32>
    %77 = tpu.matmul %75, %76, %cst_45 {dimension_numbers = #tpu.dot_dimension_numbers<[1], [0], [0], [1], [0, 0, 1, 1], [], []>} : vector<32x256xbf16>, vector<256x256xbf16>, vector<32x256xf32> -> vector<32x256xf32>
    %78 = arith.truncf %77 : vector<32x256xf32> to vector<32x256xbf16>
    %c0_46 = arith.constant 0 : index
    %c0_47 = arith.constant 0 : index
    %79 = vector.load %arg5[%c0_46, %c0_47] : memref<32x256xbf16, #tpu.memory_space<vmem>>, vector<32x256xbf16>
    tpu.vector_store %arg5[%c0_46, %c0_47], %78 {strides = array<i32>} : memref<32x256xbf16, #tpu.memory_space<vmem>>, vector<32x256xbf16>,
    %80 = vector.extract_strided_slice %77 {offsets = [0, 0], sizes = [32, 128], strides = [1, 1]} : vector<32x256xf32> to vector<32x128xf32>
    %81 = vector.extract_strided_slice %77 {offsets = [0, 128], sizes = [32, 128], strides = [1, 1]} : vector<32x256xf32> to vector<32x128xf32>
    %82 = arith.subf %80, %81 : vector<32x128xf32>
    %c0_48 = arith.constant 0 : index
    %c0_49 = arith.constant 0 : index
    %83 = vector.load %arg6[%c0_48, %c0_49] : memref<32x128xf32, #tpu.memory_space<vmem>>, vector<32x128xf32>
    %84 = arith.subf %83, %82 : vector<32x128xf32>
    %85 = math.absf %82 : vector<32x128xf32>
    %86 = math.absf %84 : vector<32x128xf32>
    %cst_50 = arith.constant 1.000000e+00 : f32
    %87 = vector.broadcast %cst_50 : f32 to vector<32x128xf32>
    %88 = arith.cmpf olt, %85, %87 : vector<32x128xf32>
    %cst_51 = arith.constant 5.000000e-01 : f32
    %89 = vector.broadcast %cst_51 : f32 to vector<32x128xf32>
    %90 = arith.mulf %89, %82 : vector<32x128xf32>
    %91 = arith.mulf %90, %82 : vector<32x128xf32>
    %cst_52 = arith.constant 5.000000e-01 : f32
    %92 = vector.broadcast %cst_52 : f32 to vector<32x128xf32>
    %93 = arith.subf %85, %92 : vector<32x128xf32>
    %94 = arith.select %88, %91, %93 : vector<32x128xi1>, vector<32x128xf32>
    %95 = arith.addf %86, %94 : vector<32x128xf32>
    %96 = vector.extract_strided_slice %95 {offsets = [0, 0], sizes = [8, 128], strides = [1, 1]} : vector<32x128xf32> to vector<8x128xf32>
    %97 = vector.extract_strided_slice %95 {offsets = [8, 0], sizes = [8, 128], strides = [1, 1]} : vector<32x128xf32> to vector<8x128xf32>
    %98 = arith.addf %96, %97 : vector<8x128xf32>
    %99 = vector.extract_strided_slice %95 {offsets = [16, 0], sizes = [8, 128], strides = [1, 1]} : vector<32x128xf32> to vector<8x128xf32>
    %100 = arith.addf %98, %99 : vector<8x128xf32>
    %101 = vector.extract_strided_slice %95 {offsets = [24, 0], sizes = [8, 128], strides = [1, 1]} : vector<32x128xf32> to vector<8x128xf32>
    %102 = arith.addf %100, %101 : vector<8x128xf32>
    %103 = arith.addf %71, %102 : vector<8x128xf32>
    %c0_53 = arith.constant 0 : index
    %c0_54 = arith.constant 0 : index
    %104 = vector.load %arg1[%c0_53, %c0_54] : memref<32x32xbf16, #tpu.memory_space<vmem>>, vector<32x32xbf16>
    %c0_55 = arith.constant 0 : index
    %c0_56 = arith.constant 0 : index
    %105 = vector.load %arg5[%c0_55, %c0_56] : memref<32x256xbf16, #tpu.memory_space<vmem>>, vector<32x256xbf16>
    %cst_57 = arith.constant dense<0.000000e+00> : vector<32x256xf32>
    %106 = tpu.matmul %104, %105, %cst_57 {dimension_numbers = #tpu.dot_dimension_numbers<[1], [0], [0], [1], [0, 0, 1, 1], [], []>} : vector<32x32xbf16>, vector<32x256xbf16>, vector<32x256xf32> -> vector<32x256xf32>
    %107 = arith.truncf %106 : vector<32x256xf32> to vector<32x256xbf16>
    %c0_58 = arith.constant 0 : index
    %c0_59 = arith.constant 0 : index
    %108 = vector.load %arg2[%c0_58, %c0_59] : memref<256x256xbf16, #tpu.memory_space<vmem>>, vector<256x256xbf16>
    %cst_60 = arith.constant dense<0.000000e+00> : vector<32x256xf32>
    %109 = tpu.matmul %107, %108, %cst_60 {dimension_numbers = #tpu.dot_dimension_numbers<[1], [0], [0], [1], [0, 0, 1, 1], [], []>} : vector<32x256xbf16>, vector<256x256xbf16>, vector<32x256xf32> -> vector<32x256xf32>
    %110 = arith.truncf %109 : vector<32x256xf32> to vector<32x256xbf16>
    %c0_61 = arith.constant 0 : index
    %c0_62 = arith.constant 0 : index
    %111 = vector.load %arg5[%c0_61, %c0_62] : memref<32x256xbf16, #tpu.memory_space<vmem>>, vector<32x256xbf16>
    tpu.vector_store %arg5[%c0_61, %c0_62], %110 {strides = array<i32>} : memref<32x256xbf16, #tpu.memory_space<vmem>>, vector<32x256xbf16>,
    %112 = vector.extract_strided_slice %109 {offsets = [0, 0], sizes = [32, 128], strides = [1, 1]} : vector<32x256xf32> to vector<32x128xf32>
    %113 = vector.extract_strided_slice %109 {offsets = [0, 128], sizes = [32, 128], strides = [1, 1]} : vector<32x256xf32> to vector<32x128xf32>
    %114 = arith.subf %112, %113 : vector<32x128xf32>
    %c0_63 = arith.constant 0 : index
    %c0_64 = arith.constant 0 : index
    %115 = vector.load %arg6[%c0_63, %c0_64] : memref<32x128xf32, #tpu.memory_space<vmem>>, vector<32x128xf32>
    %116 = arith.subf %115, %114 : vector<32x128xf32>
    %117 = math.absf %114 : vector<32x128xf32>
    %118 = math.absf %116 : vector<32x128xf32>
    %cst_65 = arith.constant 1.000000e+00 : f32
    %119 = vector.broadcast %cst_65 : f32 to vector<32x128xf32>
    %120 = arith.cmpf olt, %117, %119 : vector<32x128xf32>
    %cst_66 = arith.constant 5.000000e-01 : f32
    %121 = vector.broadcast %cst_66 : f32 to vector<32x128xf32>
    %122 = arith.mulf %121, %114 : vector<32x128xf32>
    %123 = arith.mulf %122, %114 : vector<32x128xf32>
    %cst_67 = arith.constant 5.000000e-01 : f32
    %124 = vector.broadcast %cst_67 : f32 to vector<32x128xf32>
    %125 = arith.subf %117, %124 : vector<32x128xf32>
    %126 = arith.select %120, %123, %125 : vector<32x128xi1>, vector<32x128xf32>
    %127 = arith.addf %118, %126 : vector<32x128xf32>
    %128 = vector.extract_strided_slice %127 {offsets = [0, 0], sizes = [8, 128], strides = [1, 1]} : vector<32x128xf32> to vector<8x128xf32>
    %129 = vector.extract_strided_slice %127 {offsets = [8, 0], sizes = [8, 128], strides = [1, 1]} : vector<32x128xf32> to vector<8x128xf32>
    %130 = arith.addf %128, %129 : vector<8x128xf32>
    %131 = vector.extract_strided_slice %127 {offsets = [16, 0], sizes = [8, 128], strides = [1, 1]} : vector<32x128xf32> to vector<8x128xf32>
    %132 = arith.addf %130, %131 : vector<8x128xf32>
    %133 = vector.extract_strided_slice %127 {offsets = [24, 0], sizes = [8, 128], strides = [1, 1]} : vector<32x128xf32> to vector<8x128xf32>
    %134 = arith.addf %132, %133 : vector<8x128xf32>
    %135 = arith.addf %103, %134 : vector<8x128xf32>
    %c0_68 = arith.constant 0 : index
    %c0_69 = arith.constant 0 : index
    %136 = vector.load %arg1[%c0_68, %c0_69] : memref<32x32xbf16, #tpu.memory_space<vmem>>, vector<32x32xbf16>
    %c0_70 = arith.constant 0 : index
    %c0_71 = arith.constant 0 : index
    %137 = vector.load %arg5[%c0_70, %c0_71] : memref<32x256xbf16, #tpu.memory_space<vmem>>, vector<32x256xbf16>
    %cst_72 = arith.constant dense<0.000000e+00> : vector<32x256xf32>
    %138 = tpu.matmul %136, %137, %cst_72 {dimension_numbers = #tpu.dot_dimension_numbers<[1], [0], [0], [1], [0, 0, 1, 1], [], []>} : vector<32x32xbf16>, vector<32x256xbf16>, vector<32x256xf32> -> vector<32x256xf32>
    %139 = arith.truncf %138 : vector<32x256xf32> to vector<32x256xbf16>
    %c0_73 = arith.constant 0 : index
    %c0_74 = arith.constant 0 : index
    %140 = vector.load %arg2[%c0_73, %c0_74] : memref<256x256xbf16, #tpu.memory_space<vmem>>, vector<256x256xbf16>
    %cst_75 = arith.constant dense<0.000000e+00> : vector<32x256xf32>
    %141 = tpu.matmul %139, %140, %cst_75 {dimension_numbers = #tpu.dot_dimension_numbers<[1], [0], [0], [1], [0, 0, 1, 1], [], []>} : vector<32x256xbf16>, vector<256x256xbf16>, vector<32x256xf32> -> vector<32x256xf32>
    %142 = arith.truncf %141 : vector<32x256xf32> to vector<32x256xbf16>
    %c0_76 = arith.constant 0 : index
    %c0_77 = arith.constant 0 : index
    %143 = vector.load %arg5[%c0_76, %c0_77] : memref<32x256xbf16, #tpu.memory_space<vmem>>, vector<32x256xbf16>
    tpu.vector_store %arg5[%c0_76, %c0_77], %142 {strides = array<i32>} : memref<32x256xbf16, #tpu.memory_space<vmem>>, vector<32x256xbf16>,
    %144 = vector.extract_strided_slice %141 {offsets = [0, 0], sizes = [32, 128], strides = [1, 1]} : vector<32x256xf32> to vector<32x128xf32>
    %145 = vector.extract_strided_slice %141 {offsets = [0, 128], sizes = [32, 128], strides = [1, 1]} : vector<32x256xf32> to vector<32x128xf32>
    %146 = arith.subf %144, %145 : vector<32x128xf32>
    %c0_78 = arith.constant 0 : index
    %c0_79 = arith.constant 0 : index
    %147 = vector.load %arg6[%c0_78, %c0_79] : memref<32x128xf32, #tpu.memory_space<vmem>>, vector<32x128xf32>
    %148 = arith.subf %147, %146 : vector<32x128xf32>
    %149 = math.absf %146 : vector<32x128xf32>
    %150 = math.absf %148 : vector<32x128xf32>
    %cst_80 = arith.constant 1.000000e+00 : f32
    %151 = vector.broadcast %cst_80 : f32 to vector<32x128xf32>
    %152 = arith.cmpf olt, %149, %151 : vector<32x128xf32>
    %cst_81 = arith.constant 5.000000e-01 : f32
    %153 = vector.broadcast %cst_81 : f32 to vector<32x128xf32>
    %154 = arith.mulf %153, %146 : vector<32x128xf32>
    %155 = arith.mulf %154, %146 : vector<32x128xf32>
    %cst_82 = arith.constant 5.000000e-01 : f32
    %156 = vector.broadcast %cst_82 : f32 to vector<32x128xf32>
    %157 = arith.subf %149, %156 : vector<32x128xf32>
    %158 = arith.select %152, %155, %157 : vector<32x128xi1>, vector<32x128xf32>
    %159 = arith.addf %150, %158 : vector<32x128xf32>
    %160 = vector.extract_strided_slice %159 {offsets = [0, 0], sizes = [8, 128], strides = [1, 1]} : vector<32x128xf32> to vector<8x128xf32>
    %161 = vector.extract_strided_slice %159 {offsets = [8, 0], sizes = [8, 128], strides = [1, 1]} : vector<32x128xf32> to vector<8x128xf32>
    %162 = arith.addf %160, %161 : vector<8x128xf32>
    %163 = vector.extract_strided_slice %159 {offsets = [16, 0], sizes = [8, 128], strides = [1, 1]} : vector<32x128xf32> to vector<8x128xf32>
    %164 = arith.addf %162, %163 : vector<8x128xf32>
    %165 = vector.extract_strided_slice %159 {offsets = [24, 0], sizes = [8, 128], strides = [1, 1]} : vector<32x128xf32> to vector<8x128xf32>
    %166 = arith.addf %164, %165 : vector<8x128xf32>
    %167 = arith.addf %135, %166 : vector<8x128xf32>
    %c0_83 = arith.constant 0 : index
    %c0_84 = arith.constant 0 : index
    %168 = vector.load %arg1[%c0_83, %c0_84] : memref<32x32xbf16, #tpu.memory_space<vmem>>, vector<32x32xbf16>
    %c0_85 = arith.constant 0 : index
    %c0_86 = arith.constant 0 : index
    %169 = vector.load %arg5[%c0_85, %c0_86] : memref<32x256xbf16, #tpu.memory_space<vmem>>, vector<32x256xbf16>
    %cst_87 = arith.constant dense<0.000000e+00> : vector<32x256xf32>
    %170 = tpu.matmul %168, %169, %cst_87 {dimension_numbers = #tpu.dot_dimension_numbers<[1], [0], [0], [1], [0, 0, 1, 1], [], []>} : vector<32x32xbf16>, vector<32x256xbf16>, vector<32x256xf32> -> vector<32x256xf32>
    %171 = arith.truncf %170 : vector<32x256xf32> to vector<32x256xbf16>
    %c0_88 = arith.constant 0 : index
    %c0_89 = arith.constant 0 : index
    %172 = vector.load %arg2[%c0_88, %c0_89] : memref<256x256xbf16, #tpu.memory_space<vmem>>, vector<256x256xbf16>
    %cst_90 = arith.constant dense<0.000000e+00> : vector<32x256xf32>
    %173 = tpu.matmul %171, %172, %cst_90 {dimension_numbers = #tpu.dot_dimension_numbers<[1], [0], [0], [1], [0, 0, 1, 1], [], []>} : vector<32x256xbf16>, vector<256x256xbf16>, vector<32x256xf32> -> vector<32x256xf32>
    %174 = arith.truncf %173 : vector<32x256xf32> to vector<32x256xbf16>
    %c0_91 = arith.constant 0 : index
    %c0_92 = arith.constant 0 : index
    %175 = vector.load %arg5[%c0_91, %c0_92] : memref<32x256xbf16, #tpu.memory_space<vmem>>, vector<32x256xbf16>
    tpu.vector_store %arg5[%c0_91, %c0_92], %174 {strides = array<i32>} : memref<32x256xbf16, #tpu.memory_space<vmem>>, vector<32x256xbf16>,
    %176 = vector.extract_strided_slice %173 {offsets = [0, 0], sizes = [32, 128], strides = [1, 1]} : vector<32x256xf32> to vector<32x128xf32>
    %177 = vector.extract_strided_slice %173 {offsets = [0, 128], sizes = [32, 128], strides = [1, 1]} : vector<32x256xf32> to vector<32x128xf32>
    %178 = arith.subf %176, %177 : vector<32x128xf32>
    %c0_93 = arith.constant 0 : index
    %c0_94 = arith.constant 0 : index
    %179 = vector.load %arg6[%c0_93, %c0_94] : memref<32x128xf32, #tpu.memory_space<vmem>>, vector<32x128xf32>
    %180 = arith.subf %179, %178 : vector<32x128xf32>
    %181 = math.absf %178 : vector<32x128xf32>
    %182 = math.absf %180 : vector<32x128xf32>
    %cst_95 = arith.constant 1.000000e+00 : f32
    %183 = vector.broadcast %cst_95 : f32 to vector<32x128xf32>
    %184 = arith.cmpf olt, %181, %183 : vector<32x128xf32>
    %cst_96 = arith.constant 5.000000e-01 : f32
    %185 = vector.broadcast %cst_96 : f32 to vector<32x128xf32>
    %186 = arith.mulf %185, %178 : vector<32x128xf32>
    %187 = arith.mulf %186, %178 : vector<32x128xf32>
    %cst_97 = arith.constant 5.000000e-01 : f32
    %188 = vector.broadcast %cst_97 : f32 to vector<32x128xf32>
    %189 = arith.subf %181, %188 : vector<32x128xf32>
    %190 = arith.select %184, %187, %189 : vector<32x128xi1>, vector<32x128xf32>
    %191 = arith.addf %182, %190 : vector<32x128xf32>
    %192 = vector.extract_strided_slice %191 {offsets = [0, 0], sizes = [8, 128], strides = [1, 1]} : vector<32x128xf32> to vector<8x128xf32>
    %193 = vector.extract_strided_slice %191 {offsets = [8, 0], sizes = [8, 128], strides = [1, 1]} : vector<32x128xf32> to vector<8x128xf32>
    %194 = arith.addf %192, %193 : vector<8x128xf32>
    %195 = vector.extract_strided_slice %191 {offsets = [16, 0], sizes = [8, 128], strides = [1, 1]} : vector<32x128xf32> to vector<8x128xf32>
    %196 = arith.addf %194, %195 : vector<8x128xf32>
    %197 = vector.extract_strided_slice %191 {offsets = [24, 0], sizes = [8, 128], strides = [1, 1]} : vector<32x128xf32> to vector<8x128xf32>
    %198 = arith.addf %196, %197 : vector<8x128xf32>
    %199 = arith.addf %167, %198 : vector<8x128xf32>
    %c0_98 = arith.constant 0 : index
    %c0_99 = arith.constant 0 : index
    %200 = vector.load %arg1[%c0_98, %c0_99] : memref<32x32xbf16, #tpu.memory_space<vmem>>, vector<32x32xbf16>
    %c0_100 = arith.constant 0 : index
    %c0_101 = arith.constant 0 : index
    %201 = vector.load %arg5[%c0_100, %c0_101] : memref<32x256xbf16, #tpu.memory_space<vmem>>, vector<32x256xbf16>
    %cst_102 = arith.constant dense<0.000000e+00> : vector<32x256xf32>
    %202 = tpu.matmul %200, %201, %cst_102 {dimension_numbers = #tpu.dot_dimension_numbers<[1], [0], [0], [1], [0, 0, 1, 1], [], []>} : vector<32x32xbf16>, vector<32x256xbf16>, vector<32x256xf32> -> vector<32x256xf32>
    %203 = arith.truncf %202 : vector<32x256xf32> to vector<32x256xbf16>
    %c0_103 = arith.constant 0 : index
    %c0_104 = arith.constant 0 : index
    %204 = vector.load %arg2[%c0_103, %c0_104] : memref<256x256xbf16, #tpu.memory_space<vmem>>, vector<256x256xbf16>
    %cst_105 = arith.constant dense<0.000000e+00> : vector<32x256xf32>
    %205 = tpu.matmul %203, %204, %cst_105 {dimension_numbers = #tpu.dot_dimension_numbers<[1], [0], [0], [1], [0, 0, 1, 1], [], []>} : vector<32x256xbf16>, vector<256x256xbf16>, vector<32x256xf32> -> vector<32x256xf32>
    %206 = arith.truncf %205 : vector<32x256xf32> to vector<32x256xbf16>
    %c0_106 = arith.constant 0 : index
    %c0_107 = arith.constant 0 : index
    %207 = vector.load %arg5[%c0_106, %c0_107] : memref<32x256xbf16, #tpu.memory_space<vmem>>, vector<32x256xbf16>
    tpu.vector_store %arg5[%c0_106, %c0_107], %206 {strides = array<i32>} : memref<32x256xbf16, #tpu.memory_space<vmem>>, vector<32x256xbf16>,
    %208 = vector.extract_strided_slice %205 {offsets = [0, 0], sizes = [32, 128], strides = [1, 1]} : vector<32x256xf32> to vector<32x128xf32>
    %209 = vector.extract_strided_slice %205 {offsets = [0, 128], sizes = [32, 128], strides = [1, 1]} : vector<32x256xf32> to vector<32x128xf32>
    %210 = arith.subf %208, %209 : vector<32x128xf32>
    %c0_108 = arith.constant 0 : index
    %c0_109 = arith.constant 0 : index
    %211 = vector.load %arg6[%c0_108, %c0_109] : memref<32x128xf32, #tpu.memory_space<vmem>>, vector<32x128xf32>
    %212 = arith.subf %211, %210 : vector<32x128xf32>
    %213 = math.absf %210 : vector<32x128xf32>
    %214 = math.absf %212 : vector<32x128xf32>
    %cst_110 = arith.constant 1.000000e+00 : f32
    %215 = vector.broadcast %cst_110 : f32 to vector<32x128xf32>
    %216 = arith.cmpf olt, %213, %215 : vector<32x128xf32>
    %cst_111 = arith.constant 5.000000e-01 : f32
    %217 = vector.broadcast %cst_111 : f32 to vector<32x128xf32>
    %218 = arith.mulf %217, %210 : vector<32x128xf32>
    %219 = arith.mulf %218, %210 : vector<32x128xf32>
    %cst_112 = arith.constant 5.000000e-01 : f32
    %220 = vector.broadcast %cst_112 : f32 to vector<32x128xf32>
    %221 = arith.subf %213, %220 : vector<32x128xf32>
    %222 = arith.select %216, %219, %221 : vector<32x128xi1>, vector<32x128xf32>
    %223 = arith.addf %214, %222 : vector<32x128xf32>
    %224 = vector.extract_strided_slice %223 {offsets = [0, 0], sizes = [8, 128], strides = [1, 1]} : vector<32x128xf32> to vector<8x128xf32>
    %225 = vector.extract_strided_slice %223 {offsets = [8, 0], sizes = [8, 128], strides = [1, 1]} : vector<32x128xf32> to vector<8x128xf32>
    %226 = arith.addf %224, %225 : vector<8x128xf32>
    %227 = vector.extract_strided_slice %223 {offsets = [16, 0], sizes = [8, 128], strides = [1, 1]} : vector<32x128xf32> to vector<8x128xf32>
    %228 = arith.addf %226, %227 : vector<8x128xf32>
    %229 = vector.extract_strided_slice %223 {offsets = [24, 0], sizes = [8, 128], strides = [1, 1]} : vector<32x128xf32> to vector<8x128xf32>
    %230 = arith.addf %228, %229 : vector<8x128xf32>
    %231 = arith.addf %199, %230 : vector<8x128xf32>
    %c0_113 = arith.constant 0 : index
    %c0_114 = arith.constant 0 : index
    %232 = vector.load %arg1[%c0_113, %c0_114] : memref<32x32xbf16, #tpu.memory_space<vmem>>, vector<32x32xbf16>
    %c0_115 = arith.constant 0 : index
    %c0_116 = arith.constant 0 : index
    %233 = vector.load %arg5[%c0_115, %c0_116] : memref<32x256xbf16, #tpu.memory_space<vmem>>, vector<32x256xbf16>
    %cst_117 = arith.constant dense<0.000000e+00> : vector<32x256xf32>
    %234 = tpu.matmul %232, %233, %cst_117 {dimension_numbers = #tpu.dot_dimension_numbers<[1], [0], [0], [1], [0, 0, 1, 1], [], []>} : vector<32x32xbf16>, vector<32x256xbf16>, vector<32x256xf32> -> vector<32x256xf32>
    %235 = arith.truncf %234 : vector<32x256xf32> to vector<32x256xbf16>
    %c0_118 = arith.constant 0 : index
    %c0_119 = arith.constant 0 : index
    %236 = vector.load %arg2[%c0_118, %c0_119] : memref<256x256xbf16, #tpu.memory_space<vmem>>, vector<256x256xbf16>
    %cst_120 = arith.constant dense<0.000000e+00> : vector<32x256xf32>
    %237 = tpu.matmul %235, %236, %cst_120 {dimension_numbers = #tpu.dot_dimension_numbers<[1], [0], [0], [1], [0, 0, 1, 1], [], []>} : vector<32x256xbf16>, vector<256x256xbf16>, vector<32x256xf32> -> vector<32x256xf32>
    %238 = arith.truncf %237 : vector<32x256xf32> to vector<32x256xbf16>
    %c0_121 = arith.constant 0 : index
    %c0_122 = arith.constant 0 : index
    %239 = vector.load %arg5[%c0_121, %c0_122] : memref<32x256xbf16, #tpu.memory_space<vmem>>, vector<32x256xbf16>
    tpu.vector_store %arg5[%c0_121, %c0_122], %238 {strides = array<i32>} : memref<32x256xbf16, #tpu.memory_space<vmem>>, vector<32x256xbf16>,
    %240 = vector.extract_strided_slice %237 {offsets = [0, 0], sizes = [32, 128], strides = [1, 1]} : vector<32x256xf32> to vector<32x128xf32>
    %241 = vector.extract_strided_slice %237 {offsets = [0, 128], sizes = [32, 128], strides = [1, 1]} : vector<32x256xf32> to vector<32x128xf32>
    %242 = arith.subf %240, %241 : vector<32x128xf32>
    %c0_123 = arith.constant 0 : index
    %c0_124 = arith.constant 0 : index
    %243 = vector.load %arg6[%c0_123, %c0_124] : memref<32x128xf32, #tpu.memory_space<vmem>>, vector<32x128xf32>
    %244 = arith.subf %243, %242 : vector<32x128xf32>
    %245 = math.absf %242 : vector<32x128xf32>
    %246 = math.absf %244 : vector<32x128xf32>
    %cst_125 = arith.constant 1.000000e+00 : f32
    %247 = vector.broadcast %cst_125 : f32 to vector<32x128xf32>
    %248 = arith.cmpf olt, %245, %247 : vector<32x128xf32>
    %cst_126 = arith.constant 5.000000e-01 : f32
    %249 = vector.broadcast %cst_126 : f32 to vector<32x128xf32>
    %250 = arith.mulf %249, %242 : vector<32x128xf32>
    %251 = arith.mulf %250, %242 : vector<32x128xf32>
    %cst_127 = arith.constant 5.000000e-01 : f32
    %252 = vector.broadcast %cst_127 : f32 to vector<32x128xf32>
    %253 = arith.subf %245, %252 : vector<32x128xf32>
    %254 = arith.select %248, %251, %253 : vector<32x128xi1>, vector<32x128xf32>
    %255 = arith.addf %246, %254 : vector<32x128xf32>
    %256 = vector.extract_strided_slice %255 {offsets = [0, 0], sizes = [8, 128], strides = [1, 1]} : vector<32x128xf32> to vector<8x128xf32>
    %257 = vector.extract_strided_slice %255 {offsets = [8, 0], sizes = [8, 128], strides = [1, 1]} : vector<32x128xf32> to vector<8x128xf32>
    %258 = arith.addf %256, %257 : vector<8x128xf32>
    %259 = vector.extract_strided_slice %255 {offsets = [16, 0], sizes = [8, 128], strides = [1, 1]} : vector<32x128xf32> to vector<8x128xf32>
    %260 = arith.addf %258, %259 : vector<8x128xf32>
    %261 = vector.extract_strided_slice %255 {offsets = [24, 0], sizes = [8, 128], strides = [1, 1]} : vector<32x128xf32> to vector<8x128xf32>
    %262 = arith.addf %260, %261 : vector<8x128xf32>
    %263 = arith.addf %231, %262 : vector<8x128xf32>
    %c0_128 = arith.constant 0 : index
    %c0_129 = arith.constant 0 : index
    %c0_130 = arith.constant 0 : index
    %264 = vector.load %arg4[%c0_128, %c0_129, %c0_130] : memref<1x8x128xf32, #tpu.memory_space<vmem>>, vector<1x8x128xf32>
    %265 = vector.shape_cast %264 : vector<1x8x128xf32> to vector<8x128xf32>
    %266 = vector.shape_cast %263 : vector<8x128xf32> to vector<1x8x128xf32>
    tpu.vector_store %arg4[%c0_128, %c0_129, %c0_130], %266 {strides = array<i32>} : memref<1x8x128xf32, #tpu.memory_space<vmem>>, vector<1x8x128xf32>,
    return
  }
  func.func @transform_0(%arg0: i32) -> (i32, i32) {
    %c0_i32 = arith.constant 0 : i32
    %c0_i32_0 = arith.constant 0 : i32
    %c0_i32_1 = arith.constant 0 : i32
    return %c0_i32, %c0_i32_0 : i32, i32
  }
  func.func @transform_1(%arg0: i32) -> (i32, i32) {
    %c0_i32 = arith.constant 0 : i32
    %c0_i32_0 = arith.constant 0 : i32
    %c0_i32_1 = arith.constant 0 : i32
    return %c0_i32, %c0_i32_0 : i32, i32
  }
  func.func @transform_2(%arg0: i32) -> (i32, i32) {
    %c0_i32 = arith.constant 0 : i32
    %c0_i32_0 = arith.constant 0 : i32
    return %arg0, %c0_i32 : i32, i32
  }
  func.func @transform_3(%arg0: i32) -> (i32, i32, i32) {
    %c0_i32 = arith.constant 0 : i32
    %c0_i32_0 = arith.constant 0 : i32
    %c0_i32_1 = arith.constant 0 : i32
    return %arg0, %c0_i32, %c0_i32_0 : i32, i32, i32
  }
}

</mosaic_0001>

<bundles_post_ra>
// kernel: tpu_custom_call.1
= control target key start
LH: loop header
LB: loop body
LE: loop exit
PB: predicated region body
PF: predicated region fallthrough
CT: control target
= control target key end

     0   :  { %s5460_s0 = inlined_call_operand.hbm [shape: bf16[32,32], index: 0, kind: input, shape index: {}]   ;;  %s5461_s1 = inlined_call_operand.hbm [shape: bf16[256,256], index: 1, kind: input, shape index: {}]   ;;  %s5462_s2 = inlined_call_operand.hbm [shape: f32[64,256], index: 2, kind: input, shape index: {}]   ;;  %s5463_s3 = inlined_call_operand.hbm [shape: f32[2,8,128], index: 3, kind: output, shape index: {}]  }
   0x1   :  { %5499 = sst [smem:[#allocation22_spill]] %s5460_s0 }
   0x2   :  { %8 = vsyncpa [#allocation5], 0 }
   0x3   :  { %9 = vsyncpa [#allocation8], 0 }
   0x4   :  { %10 = vsyncpa [#allocation6], 0 }
   0x5   :  { %12 = vsyncpa [#allocation6 + $0x1], 0  ;;  %s4647_s12 = smov 0   ;;  %s4649_s13 = smov 0  }
   0x6   :  { %s4651_s14 = smov 0   ;;  %s4653_s15 = smov 0  }
   0x7 LB: > { %s4668_s16 = sadd.s32 4294967295, %s4614_s15   ;;  %s3752_s17 = sadd.s32 4294967294, %s4614_s15   ;;  %s4614_s15 = sphi %s4653_s15, %s5586_s15   ;;  %s4610_s14 = sphi %s4651_s14, %s5585_s14   ;;  %s4606_s13 = sphi %s4649_s13, %s5584_s13   ;;  %s4602_s12 = sphi %s4647_s12, %s5583_s12  }
   0x8   : > { %s4672_s18 = sadd.s32 1, %s4614_s15   ;;  %s67_s19 = sadd.s32 1, %s4610_s14 }
   0x9   : > { %s64_s20 = ssub.s32 %s4614_s15, %s4672_s18  ;;  %p74_p0 = scmp.ne.s32.totalorder %s4610_s14, %s4606_s13 }
   0xa   : > { %p65_p1 = scmp.eq.s32.totalorder %s64_s20, 0  ;;  %p75_p2 = scmp.eq.s32.totalorder %s4614_s15, 0 }
   0xb   : > { %p80_p3 = scmp.ne.s32.totalorder %s4606_s13, %s4602_s12  ;;  %p5465_p4 = scmp.eq.s32.totalorder %s4668_s16, 0 }
   0xc   : > { %s4684_s21 = scalar_select %p65_p1, %s4610_s14, %s67_s19  }
   0xd   : > { %p4686_p5 = por %p75_p2, %p74_p0  ;;  %p4692_p6 = por %p5465_p4, %p80_p3 }
   0xe   : > { %p104_p7 = scmp.eq.s32.totalorder %s4668_s16, 1  ;;  %p110_p8 = scmp.eq.s32.totalorder %s3752_s17, 1 }
   0xf   : > { %s5501_s23 = scalar_select %p4692_p6, 1, 0 }
  0x10   : > { %p3753_p9 = scmp.ge.s32.totalorder %s4614_s15, 1  ;;  %p117_p10 = scmp.lt.s32.totalorder %s4614_s15, 3 }
  0x11   : > { %p4699_p11 = por %p104_p7, %p74_p0  ;;  %p4703_p12 = por %p110_p8, %p80_p3 }
  0x12   : > { %p4707_p13 = pnand %p3753_p9, %p117_p10  ;;  %s4616_s27 = smov [#allocation4]  }
  0x13   : > { %s5502_s24 = scalar_select %p4699_p11, 1, 0 }
  0x14   : > { %s5503_s25 = scalar_select %p4703_p12, 1, 0 }
  0x15   : > { %s5504_s26 = scalar_select %p4707_p13, 1, 0 }
  0x16   : > { %p4240_p1 = pneg %p4707_p13  ;;  %s129_s28 = sshll.u32 %s4616_s27, 4  ;;  %s130_s28 = int_to_ptr.vmem [resolvable:$true] %s129_s28 }
  0x17   : > { %p4257_p3 = scmp.lt.s32.totalorder %s4614_s15, 2  ;;  %s4617_s30 = smov [#allocation7]  }
  0x18   : > { %p4715_p2 = pnand %p4240_p1, %p5465_p4  ;;  %s142_s4 = sshll.u32 %s4617_s30, 4  ;;  %s143_s4 = int_to_ptr.vmem [resolvable:$true] %s142_s4 }
  0x19   : > { %s4473_s5 = scalar_lea.vmem %s130_s28, 256  ;;  %p4481_p12 = scmp.lt.s32.totalorder %s130_s28, %s130_s28 }
  0x1a   : > { %p4464_p7 = pneg %p4715_p2  ;;  %p4474_p8 = scmp.ne.s32.totalorder %s130_s28, %s4473_s5 }
  0x1b   : > { %p4482_p11 = scmp.lt.s32.totalorder %s4473_s5, %s4473_s5 }
  0x1c   : > { %p4476_p9 = pnand %p4474_p8, %p4464_p7 }
  0x1d   : > { %p4483_p1 = por %p4482_p11, %p4481_p12 }
  0x1e   : > { %p4477_p10 = pneg %p4476_p9 }
  0x20   : > { %p4484_p4 = pnand %p4483_p1, %p4477_p10 }
  0x22   : > { %4487 = shalt.err (!%p4484_p4)
}
  0x23   : > { %s4618_s6 = smov 64   ;;  %s4619_s7 = smov 4  }
  0x24   : > { %s5506_s0 = sld [smem:[#allocation22_spill]]  ;;  %p4735_p8 = pnand %p4257_p3, %p4686_p5 }
  0x25   : > { %s156_s11 = sand.u32 1, %s4614_s15   ;;  %s4499_s17 = scalar_lea.vmem %s143_s4, 4096 }
  0x26   : > { %p4500_p4 = scmp.ne.s32.totalorder %s143_s4, %s4499_s17  ;;  %p4507_p9 = scmp.lt.s32.totalorder %s143_s4, %s143_s4 }
  0x27   : > { %p4508_p10 = scmp.lt.s32.totalorder %s4499_s17, %s4499_s17 }
  0x28   : > { %p4502_p11 = pnand %p4500_p4, %p4464_p7 }
  0x29   : > { %p4509_p1 = por %p4508_p10, %p4507_p9 }
  0x2a   : > { %4243 = dma.hbm_to_vmem [thread:$0]  (!%p4715_p2), %s5506_s0, 256, %s130_s28, [#allocation5], %s4618_s6, %s4618_s6, %s4619_s7  }
  0x2b   : > { %p4503_p12 = pneg %p4502_p11 }
  0x2d   : > { %p4510_p0 = pnand %p4509_p1, %p4503_p12 }
  0x2f   : > { %4513 = shalt.err (!%p4510_p0)
}
  0x30   : > { %s4620_s19 = smov 128   ;;  %s4621_s20 = smov 8  }
  0x31   : > { %4246 = dma.hbm_to_vmem [thread:$0]  (!%p4715_p2), %s5461_s1, 4096, %s143_s4, [#allocation8], %s4620_s19, %s4620_s19, %s4621_s20  }
  0x32   : > { %s158_s28 = sand.u32 1, %s4610_s14   ;;  %s4159_s5 = sshll.u32 %s4614_s15, 10 }
  0x33   : > { %s3757_s30 = sshll.u32 %s158_s28, 6  ;;  %s4753_s8 = scalar_lea.hbm %s5462_s2, %s4159_s5 }
  0x34   : > { %s160_s9 = scalar_lea.vmem [#allocation9], %s3757_s30  ;;  %s4757_s29 = scalar_lea.sflag [#allocation5], %s156_s11 }
  0x35   : > { %s168_s17 = sshll.u32 %s160_s9, 4  ;;  %s4514_s0 = scalar_lea.hbm %s4753_s8, 1024  ;;  %s4755_s17 = int_to_ptr.vmem [resolvable:$true] %s168_s17 }
  0x36   : > { %p4515_p5 = scmp.ne.s32.totalorder %s4753_s8, %s4514_s0  ;;  %p4516_p2 = pneg %p4735_p8 }
  0x37   : > { %s4519_s20 = scalar_lea.hbm %s5462_s2, 2048  ;;  %p4520_p7 = scmp.lt.s32.totalorder %s4753_s8, %s5462_s2 }
  0x38   : > { %p4517_p0 = pnand %p4516_p2, %p4515_p5  ;;  %p4521_p4 = scmp.lt.s32.totalorder %s4519_s20, %s4514_s0 }
  0x3a   : > { %p4518_p3 = pneg %p4517_p0  ;;  %p4522_p11 = por %p4521_p4, %p4520_p7 }
  0x3c   : > { %p4523_p12 = pnand %p4522_p11, %p4518_p3 }
  0x3e   : > { %4526 = shalt.err (!%p4523_p12)
}
  0x3f   : > { %s4527_s11 = scalar_lea.vmem %s4755_s17, 1024  ;;  %s4622_s28 = smov [#allocation9]  }
  0x40   : > { %p4528_p9 = scmp.ne.s32.totalorder %s4755_s17, %s4527_s11  ;;  %s4532_s30 = sshll.u32 %s4622_s28, 4  ;;  %s4533_s30 = int_to_ptr.vmem [resolvable:$false] %s4532_s30 }
  0x41   : > { %s4534_s5 = scalar_lea.vmem %s4533_s30, 2048  ;;  %p4535_p5 = scmp.lt.s32.totalorder %s4755_s17, %s4533_s30 }
  0x42   : > { %p4530_p10 = pnand %p4528_p9, %p4516_p2  ;;  %p4536_p0 = scmp.lt.s32.totalorder %s4534_s5, %s4527_s11 }
  0x44   : > { %p4531_p1 = pneg %p4530_p10  ;;  %p4537_p6 = por %p4536_p0, %p4535_p5 }
  0x46   : > { %p4538_p13 = pnand %p4537_p6, %p4531_p1 }
  0x48   : > { %4541 = shalt.err (!%p4538_p13)
}
  0x49   : > { %s4623_s0 = smov 256   ;;  %s4624_s6 = smov 16  }
  0x4a   : > { %4250 = dma.hbm_to_vmem [thread:$0]  (!%p4735_p8), %s4753_s8, 1024, %s4755_s17, %s4757_s29, %s4623_s0, %s4623_s0, %s4624_s6  }
  0x4b   : > { %p5508_p2 = scmp.ne.s32.totalorder %s5504_s26, 0 }
  0x4d   : > { %180 = sbr.rel (%p5508_p2) target bundleno = 3480 (0xd98), region = 32 }
  0x52   : > { %p5509_p3 = scmp.eq.s32.totalorder %s4668_s16, 0 }
  0x54   : > { %4585 = dma.done.wait (%p5509_p3), [#allocation5], 256   ;;  %p5510_p7 = pmov %p5509_p3 }
  0x55   : > { %p5511_p6 = pmov %p5509_p3 }
  0x56   : > { %4587 = vsyncadd (%p5510_p7), [#allocation5], 4294967040 }
  0x57   : > { %4589 = dma.done.wait (%p5511_p6), [#allocation8], 4096   ;;  %p5512_p13 = pmov %p5509_p3 }
  0x58   : > { %s190_s10 = sand.u32 1, %s4668_s16   ;;  %s4790_s7 = sand.u32 1, %s4606_s13  }
  0x59   : > { %4591 = vsyncadd (%p5512_p13), [#allocation8], 4294963200  ;;  %s3764_s26 = sshll.u32 %s4790_s7, 6  ;;  %s191_s8 = scalar_lea.sflag [#allocation5], %s190_s10 }
  0x5a   : > { %s194_s9 = scalar_lea.vmem [#allocation9], %s3764_s26  ;;  %p5513_p8 = scmp.ne.s32.totalorder %s5501_s23, 0 }
  0x5c   : > { %4593 = dma.done.wait (%p5513_p8), %s191_s8, 1024  }
  0x5d   : > { %4595 = vsyncadd (%p5513_p8), %s191_s8, 4294966272  ;;  %v5468_v0 = vmov 0   ;;  %v4799_v1 = vld [vmem:[%s194_s9 + $0x28] sm:$0xff]  ;;  %v4801_v2 = vld [vmem:[%s194_s9 + $0x38] sm:$0xff]  ;;  %vm309_vm0 = vcmask 261120   ;;  %s3765_s23 = sshll.u32 %s4790_s7, 3 }
  0x5e   : > { %348 = vmatprep.mubr.bf16.mxu1 %v5468_v0  ;;  %770 = vmatprep.mubr.bf16.mxu0 %v5468_v0  ;;  %v4803_v3 = vld [vmem:[%s194_s9 + $0x20] sm:$0xff]  ;;  %v4199_v4 = vpack.c.bf16 %v4801_v2, %v4799_v1  ;;  %v4807_v5 = vld [vmem:[%s194_s9 + $0x30] sm:$0xff]  ;;  %v4809_v6 = vld [vmem:[%s194_s9 + $0x8] sm:$0xff]  ;;  %s4155_s17 = sshll.u32 %s4668_s16, 7  ;;  %s216_s29 = scalar_lea.vmem [#allocation10], %s3765_s23 }
  0x5f   : > { %v4811_v7 = vld [vmem:[%s194_s9 + $0x18] sm:$0xff]  ;;  %v4198_v8 = vpack.c.bf16 %v4807_v5, %v4803_v3  ;;  %v4817_v10 = vld [vmem:[%s194_s9] sm:$0xff]  ;;  %v4819_v11 = vld [vmem:[%s194_s9 + $0x10] sm:$0xff]  ;;  %s3663_s4 = sshll.u32 %s216_s29, 4  ;;  %s3661_s22 = scalar_lea.hbm %s5463_s3, %s4155_s17  ;;  %s3664_s4 = int_to_ptr.vmem [resolvable:$true] %s3663_s4 }
  0x60   : > { %v4197_v9 = vpack.c.bf16 %v4811_v7, %v4809_v6  ;;  %328 = vmatprep.subr.bf16.mxu1 %v4199_v4  ;;  %v4196_v12 = vpack.c.bf16 %v4819_v11, %v4817_v10  ;;  %v4823_v13 = vld [vmem:[#allocation7 + $0x74] ss:$8 sps:$4 sm:$0xff]   ;;  %v4825_v15 = vld [vmem:[#allocation7 + $0x70] ss:$8 sps:$4 sm:$0xff]   ;;  %v4828_v16 = vld [vmem:[#allocation7 + $0x64] ss:$8 sps:$4 sm:$0xff]   ;;  %v4925_v60 = vsub.f32 %v4817_v10, %v4809_v6 }
  0x61   : > { %329 = vmatpush1.bf16.msra.mxu1 %v4198_v8  ;;  %v4302_v14 = vld [vmem:[#allocation4] sm:$0xff]   ;;  %v4833_v17 = vld [vmem:[#allocation7 + $0x60] ss:$8 sps:$4 sm:$0xff]   ;;  %v4303_v19 = vld [vmem:[#allocation4 + $0x8] sm:$0xff]   ;;  %s3650_s27 = scalar_lea.sflag [#allocation6], %s4790_s7  ;;  %s4542_s11 = scalar_lea.vmem %s3664_s4, 128 }
  0x62   : > { %330 = vmatprep.subr.bf16.mxu1 %v4197_v9  ;;  %v4836_v18 = vld [vmem:[#allocation7 + $0x54] ss:$8 sps:$4 sm:$0xff]   ;;  %v4839_v20 = vld [vmem:[#allocation7 + $0x50] ss:$8 sps:$4 sm:$0xff]   ;;  %v4842_v21 = vld [vmem:[#allocation7 + $0x44] ss:$8 sps:$4 sm:$0xff]   ;;  %p4543_p4 = scmp.ne.s32.totalorder %s3664_s4, %s4542_s11 }
  0x63   : > { %v4846_v22 = vld [vmem:[#allocation7 + $0x40] ss:$8 sps:$4 sm:$0xff]   ;;  %v4849_v23 = vld [vmem:[#allocation7 + $0x34] ss:$8 sps:$4 sm:$0xff]   ;;  %v4851_v24 = vld [vmem:[#allocation7 + $0x30] ss:$8 sps:$4 sm:$0xff]  }
  0x64   : > { %v4853_v25 = vld [vmem:[#allocation7 + $0x24] ss:$8 sps:$4 sm:$0xff]   ;;  %v4857_v26 = vld [vmem:[#allocation7 + $0x20] ss:$8 sps:$4 sm:$0xff]   ;;  %v4859_v27 = vld [vmem:[#allocation7 + $0x14] ss:$8 sps:$4 sm:$0xff]  }
  0x65   : > { %331 = vmatpush1.bf16.msra.mxu1 %v4196_v12  ;;  %v4863_v28 = vld [vmem:[#allocation7 + $0x10] ss:$8 sps:$4 sm:$0xff]   ;;  %v4865_v29 = vld [vmem:[#allocation7 + $0x4] ss:$8 sps:$4 sm:$0xff]   ;;  %v4869_v30 = vld [vmem:[#allocation7] ss:$8 sps:$4 sm:$0xff]   ;;  %v4930_v12 = vsub.f32 %v4819_v11, %v4811_v7 }
  0x66   : > { %565 = vmatprep.subr.bf16.mxu1 %v4823_v13  ;;  %v4871_v31 = vld [vmem:[#allocation7 + $0xf4] ss:$8 sps:$4 sm:$0xff]   ;;  %v4875_v32 = vld [vmem:[#allocation7 + $0xf0] ss:$8 sps:$4 sm:$0xff]   ;;  %v4877_v33 = vld [vmem:[#allocation7 + $0xe4] ss:$8 sps:$4 sm:$0xff]  }
  0x67   : > { %v4881_v34 = vld [vmem:[#allocation7 + $0xe0] ss:$8 sps:$4 sm:$0xff]   ;;  %v4883_v35 = vld [vmem:[#allocation7 + $0xd4] ss:$8 sps:$4 sm:$0xff]   ;;  %v4887_v36 = vld [vmem:[#allocation7 + $0xd0] ss:$8 sps:$4 sm:$0xff]  }
  0x68   : > { %3776 = vmatmul.mubr.msk.bf16.vlgmr.msra.gmra.mxu1 %vm309_vm0, %v4302_v14  ;;  %v4889_v37 = vld [vmem:[#allocation7 + $0xc4] ss:$8 sps:$4 sm:$0xff]   ;;  %v4893_v38 = vld [vmem:[#allocation7 + $0xc0] ss:$8 sps:$4 sm:$0xff]   ;;  %v4895_v39 = vld [vmem:[#allocation7 + $0xb4] ss:$8 sps:$4 sm:$0xff]  }
  0x69   : > { %358 = vmatprep.mubr.bf16.mxu1 %v5468_v0  ;;  %566 = vmatpush1.bf16.msra.mxu1 %v4825_v15  ;;  %v4900_v40 = vld [vmem:[#allocation7 + $0xb0] ss:$8 sps:$4 sm:$0xff]   ;;  %v4903_v41 = vld [vmem:[#allocation7 + $0xa4] ss:$8 sps:$4 sm:$0xff]   ;;  %v4906_v42 = vld [vmem:[#allocation7 + $0xa0] ss:$8 sps:$4 sm:$0xff]  }
  0x6a   : > { %567 = vmatprep.subr.bf16.mxu1 %v4828_v16  ;;  %v4910_v43 = vld [vmem:[#allocation7 + $0x94] ss:$8 sps:$4 sm:$0xff]   ;;  %v4912_v44 = vld [vmem:[#allocation7 + $0x90] ss:$8 sps:$4 sm:$0xff]   ;;  %v4916_v45 = vld [vmem:[#allocation7 + $0x84] ss:$8 sps:$4 sm:$0xff]  }
  0x6b   : > { %5514 = vst [vmem:[#allocation15_spill] sm:$0xff] %v4910_v43  ;;  %5515 = vst [vmem:[#allocation16_spill] sm:$0xff] %v4912_v44  ;;  %v4918_v46 = vld [vmem:[#allocation7 + $0x80] ss:$8 sps:$4 sm:$0xff]   ;;  %p5580_p11 = scmp.ne.s32.totalorder %s5502_s24, 0  ;;  %s4626_s28 = smov [#allocation10]  }
  0x6c   : > { %5516 = vst [vmem:[#allocation17_spill] sm:$0xff] %v4916_v45  ;;  %5517 = vst [vmem:[#allocation18_spill] sm:$0xff] %v4918_v46  ;;  %s4546_s30 = sshll.u32 %s4626_s28, 4  ;;  %s4547_s30 = int_to_ptr.vmem [resolvable:$false] %s4546_s30 }
  0x6d   : > { %568 = vmatpush1.bf16.msra.mxu1 %v4833_v17  ;;  %5518 = vst [vmem:[#allocation19_spill] sm:$0xff] %v4925_v60  ;;  %5519 = vst [vmem:[#allocation20_spill] sm:$0xff] %v4930_v12  ;;  %p4544_p12 = pnand %p4543_p4, %p5580_p11  ;;  %s4548_s16 = scalar_lea.vmem %s4547_s30, 256 }
  0x6e   : > { %569 = vmatprep.subr.bf16.mxu1 %v4836_v18  ;;  %p4549_p10 = scmp.lt.s32.totalorder %s3664_s4, %s4547_s30  ;;  %p4550_p1 = scmp.lt.s32.totalorder %s4548_s16, %s4542_s11 }
  0x6f   : > { %p4545_p9 = pneg %p4544_p12 }
  0x70   : > { %3777 = vmatmul.mubr.msk.bf16.gmra.mxu1 %vm309_vm0, %v4303_v19  ;;  %p4551_p5 = por %p4550_p1, %p4549_p10 }
  0x71   : > { %570 = vmatpush1.bf16.msra.mxu1 %v4839_v20 }
  0x72   : > { %571 = vmatprep.subr.bf16.mxu1 %v4842_v21  ;;  %p4552_p0 = pnand %p4551_p5, %p4545_p9 }
  0x75   : > { %572 = vmatpush1.bf16.msra.mxu1 %v4846_v22 }
  0x76   : > { %573 = vmatprep.subr.bf16.mxu1 %v4849_v23 }
  0x79   : > { %574 = vmatpush1.bf16.msra.mxu1 %v4851_v24 }
  0x7a   : > { %575 = vmatprep.subr.bf16.mxu1 %v4853_v25 }
  0x7d   : > { %576 = vmatpush1.bf16.msra.mxu1 %v4857_v26 }
  0x7e   : > { %577 = vmatprep.subr.bf16.mxu1 %v4859_v27 }
  0x81   : > { %578 = vmatpush1.bf16.msra.mxu1 %v4863_v28 }
  0x82   : > { %579 = vmatprep.subr.bf16.mxu1 %v4865_v29 }
  0x85   : > { %580 = vmatpush1.bf16.msra.mxu1 %v4869_v30 }
  0x86   : > { %581 = vmatprep.subr.bf16.mxu1 %v4871_v31 }
  0x89   : > { %582 = vmatpush2.bf16.msra.mxu1 %v4875_v32 }
  0x8a   : > { %583 = vmatprep.subr.bf16.mxu1 %v4877_v33 }
  0x8d   : > { %584 = vmatpush2.bf16.msra.mxu1 %v4881_v34 }
  0x8e   : > { %585 = vmatprep.subr.bf16.mxu1 %v4883_v35 }
  0x91   : > { %586 = vmatpush2.bf16.msra.mxu1 %v4887_v36 }
  0x92   : > { %587 = vmatprep.subr.bf16.mxu1 %v4889_v37 }
  0x95   : > { %588 = vmatpush2.bf16.msra.mxu1 %v4893_v38 }
  0x96   : > { %589 = vmatprep.subr.bf16.mxu1 %v4895_v39 }
  0x99   : > { %590 = vmatpush2.bf16.msra.mxu1 %v4900_v40 }
  0x9a   : > { %591 = vmatprep.subr.bf16.mxu1 %v4903_v41 }
  0x9d   : > { %592 = vmatpush2.bf16.msra.mxu1 %v4906_v42 }
  0x9e   : > { %593 = vmatprep.subr.bf16.mxu1 %v4910_v43 }
  0xa1   : > { %594 = vmatpush2.bf16.msra.mxu1 %v4912_v44 }
  0xa2   : > { %595 = vmatprep.subr.bf16.mxu1 %v4916_v45 }
  0xa5   : > { %596 = vmatpush2.bf16.msra.mxu1 %v4918_v46 }
 0x128   : > { %v350_v47 = vpop.f32.mrf.mxu1 }
 0x12a   : > { %v352_v48 = vpop.f32.mrf.mxu1 }
 0x12c   : > { %v354_v49 = vpop.f32.mrf.mxu1 }
 0x12d   : > { %v369_v52 = vpack.c.bf16 %v354_v49, %v350_v47  ;;  %v4938_v49 = vsub.f32 %v4803_v3, %v4799_v1 }
 0x12e   : > { %v356_v50 = vpop.f32.mrf.mxu1 }
 0x12f   : > { %v370_v51 = vpack.c.bf16 %v356_v50, %v352_v48  ;;  %5522 = vst [vmem:[#allocation21_spill] sm:$0xff] %v4938_v49 }
 0x130   : > { %v360_v53 = vpop.f32.mrf.mxu1 }
 0x131   : > { %597 = vmatprep.mubr.bf16.mxu1 %v370_v51 }
 0x132   : > { %v362_v54 = vpop.f32.mrf.mxu1  ;;  %598 = vmatmul.mubr.bf16.vlgmr.msra.gmra.mxu1 %v369_v52 }
 0x134   : > { %v364_v55 = vpop.f32.mrf.mxu1 }
 0x135   : > { %v371_v58 = vpack.c.bf16 %v364_v55, %v360_v53 }
 0x136   : > { %v366_v56 = vpop.f32.mrf.mxu1 }
 0x137   : > { %v372_v57 = vpack.c.bf16 %v366_v56, %v362_v54 }
 0x139   : > { %607 = vmatprep.mubr.bf16.mxu1 %v372_v57 }
 0x13a   : > { %608 = vmatmul.mubr.bf16.gmra.mxu1 %v371_v58 }
 0x13b   : > { %1192 = vmatprep.mubr.bf16.mxu1 %v5468_v0 }
 0x1f2   : > { %v599_v59 = vpop.f32.mrf.mxu1 }
 0x1f4   : > { %v601_v61 = vpop.f32.mrf.mxu1 }
 0x1f5   : > { %v646_v62 = vsub.f32 %v599_v59, %v601_v61 }
 0x1f6   : > { %v603_v63 = vpop.f32.mrf.mxu1 }
 0x1f7   : > { %v658_v4 = vand.u32 2147483647, %v646_v62  ;;  %v670_v8 = vmul.f32 0.5, %v646_v62  ;;  %v654_v9 = vsub.f32 %v4925_v60, %v646_v62 }
 0x1f8   : > { %v605_v14 = vpop.f32.mrf.mxu1 }
 0x1f9   : > { %v674_v19 = vmul.f32 %v670_v8, %v646_v62  ;;  %v3814_v47 = vadd.f32 -0.5, %v658_v4  ;;  %vm4932_vm1 = vcmp.lt.f32.partialorder %v658_v4, 1.0  ;;  %v647_v6 = vsub.f32 %v603_v63, %v605_v14 }
 0x1fa   : > { %v609_v10 = vpop.f32.mrf.mxu1  ;;  %v662_v50 = vand.u32 2147483647, %v654_v9  ;;  %v4946_v9 = vsub.f32 %v4807_v5, %v4801_v2 }
 0x1fb   : > { %v655_v51 = vsub.f32 %v4930_v12, %v647_v6  ;;  %v659_v52 = vand.u32 2147483647, %v647_v6  ;;  %v671_v53 = vmul.f32 0.5, %v647_v6  ;;  %v682_v11 = vsel %vm4932_vm1, %v674_v19, %v3814_v47 }
 0x1fc   : > { %v611_v7 = vpop.f32.mrf.mxu1  ;;  %v686_v3 = vadd.f32 %v682_v11, %v662_v50 }
 0x1fd   : > { %v648_v54 = vsub.f32 %v609_v10, %v611_v7  ;;  %v663_v55 = vand.u32 2147483647, %v655_v51  ;;  %vm667_vm2 = vcmp.lt.f32.partialorder %v659_v52, 1.0  ;;  %v675_v56 = vmul.f32 %v671_v53, %v647_v6 }
 0x1fe   : > { %v3815_v57 = vadd.f32 -0.5, %v659_v52  ;;  %v613_v58 = vpop.f32.mrf.mxu1  ;;  %v4201_v53 = vpack.c.bf16 %v605_v14, %v601_v61  ;;  %v5523_v14 = vmov 0  }
 0x1ff   : > { %v656_v62 = vsub.f32 %v4938_v49, %v648_v54  ;;  %v660_v4 = vand.u32 2147483647, %v648_v54  ;;  %v672_v1 = vmul.f32 0.5, %v648_v54  ;;  %v4202_v60 = vpack.c.bf16 %v613_v58, %v609_v10 }
 0x200   : > { %v683_v8 = vsel %vm667_vm2, %v675_v56, %v3815_v57  ;;  %v615_v0 = vpop.f32.mrf.mxu1 }
 0x201   : > { %v687_v12 = vadd.f32 %v683_v8, %v663_v55  ;;  %v664_v48 = vand.u32 2147483647, %v656_v62  ;;  %vm668_vm3 = vcmp.lt.f32.partialorder %v660_v4, 1.0  ;;  %v676_v19 = vmul.f32 %v672_v1, %v648_v54 }
 0x202   : > { %v3816_v47 = vadd.f32 -0.5, %v660_v4  ;;  %v649_v51 = vsub.f32 %v613_v58, %v615_v0  ;;  %v4203_v6 = vpack.c.bf16 %v615_v0, %v611_v7  ;;  %v4200_v54 = vpack.c.bf16 %v603_v63, %v599_v59  ;;  %v4352_v0 = vld [vmem:[#allocation4] sm:$0xff]   ;;  %v5524_v59 = vld [vmem:[#allocation18_spill] sm:$0xff] }
 0x203   : > { %v690_v52 = vadd.f32 %v687_v12, %v686_v3 }
 0x204   : > { %v684_v49 = vsel %vm668_vm3, %v676_v19, %v3816_v47  ;;  %v657_v46 = vsub.f32 %v4946_v9, %v649_v51  ;;  %v661_v50 = vand.u32 2147483647, %v649_v51  ;;  %v673_v11 = vmul.f32 0.5, %v649_v51  ;;  %750 = vmatprep.subr.bf16.mxu0 %v4203_v6 }
 0x205   : > { %v688_v56 = vadd.f32 %v684_v49, %v664_v48  ;;  %751 = vmatpush1.bf16.msra.mxu0 %v4202_v60 }
 0x206   : > { %v665_v2 = vand.u32 2147483647, %v657_v46  ;;  %vm669_vm4 = vcmp.lt.f32.partialorder %v661_v50, 1.0  ;;  %v677_v5 = vmul.f32 %v673_v11, %v649_v51  ;;  %v3817_v55 = vadd.f32 -0.5, %v661_v50  ;;  %752 = vmatprep.subr.bf16.mxu0 %v4201_v53  ;;  %v4353_v46 = vld [vmem:[#allocation4 + $0x8] sm:$0xff]   ;;  %v5525_v11 = vld [vmem:[#allocation19_spill] sm:$0xff] }
 0x207   : > { %v691_v57 = vadd.f32 %v690_v52, %v688_v56 }
 0x208   : > { %v685_v62 = vsel %vm669_vm4, %v677_v5, %v3817_v55 }
 0x209   : > { %v689_v12 = vadd.f32 %v685_v62, %v665_v2  ;;  %753 = vmatpush1.bf16.msra.mxu0 %v4200_v54 }
 0x20a   : > { %987 = vmatprep.subr.bf16.mxu0 %v4823_v13 }
 0x20b   : > { %v4950_v61 = vadd.f32 %v691_v57, %v689_v12  ;;  %v5528_v12 = vld [vmem:[#allocation20_spill] sm:$0xff] }
 0x20c   : > { %3824 = vmatmul.mubr.msk.bf16.vlgmr.msra.gmra.mxu0 %vm309_vm0, %v4352_v0 }
 0x20d   : > { %780 = vmatprep.mubr.bf16.mxu0 %v5523_v14  ;;  %988 = vmatpush1.bf16.msra.mxu0 %v4825_v15 }
 0x20e   : > { %989 = vmatprep.subr.bf16.mxu0 %v4828_v16 }
 0x211   : > { %990 = vmatpush1.bf16.msra.mxu0 %v4833_v17 }
 0x212   : > { %991 = vmatprep.subr.bf16.mxu0 %v4836_v18 }
 0x214   : > { %3825 = vmatmul.mubr.msk.bf16.gmra.mxu0 %vm309_vm0, %v4353_v46 }
 0x215   : > { %992 = vmatpush1.bf16.msra.mxu0 %v4839_v20 }
 0x216   : > { %993 = vmatprep.subr.bf16.mxu0 %v4842_v21 }
 0x219   : > { %994 = vmatpush1.bf16.msra.mxu0 %v4846_v22 }
 0x21a   : > { %995 = vmatprep.subr.bf16.mxu0 %v4849_v23 }
 0x21d   : > { %996 = vmatpush1.bf16.msra.mxu0 %v4851_v24 }
 0x21e   : > { %997 = vmatprep.subr.bf16.mxu0 %v4853_v25 }
 0x221   : > { %998 = vmatpush1.bf16.msra.mxu0 %v4857_v26 }
 0x222   : > { %999 = vmatprep.subr.bf16.mxu0 %v4859_v27 }
 0x225   : > { %1000 = vmatpush1.bf16.msra.mxu0 %v4863_v28 }
 0x226   : > { %1001 = vmatprep.subr.bf16.mxu0 %v4865_v29 }
 0x229   : > { %1002 = vmatpush1.bf16.msra.mxu0 %v4869_v30 }
 0x22a   : > { %1003 = vmatprep.subr.bf16.mxu0 %v4871_v31 }
 0x22d   : > { %1004 = vmatpush2.bf16.msra.mxu0 %v4875_v32 }
 0x22e   : > { %1005 = vmatprep.subr.bf16.mxu0 %v4877_v33 }
 0x231   : > { %1006 = vmatpush2.bf16.msra.mxu0 %v4881_v34 }
 0x232   : > { %1007 = vmatprep.subr.bf16.mxu0 %v4883_v35 }
 0x235   : > { %1008 = vmatpush2.bf16.msra.mxu0 %v4887_v36 }
 0x236   : > { %1009 = vmatprep.subr.bf16.mxu0 %v4889_v37 }
 0x239   : > { %1010 = vmatpush2.bf16.msra.mxu0 %v4893_v38 }
 0x23a   : > { %1011 = vmatprep.subr.bf16.mxu0 %v4895_v39 }
 0x23d   : > { %1012 = vmatpush2.bf16.msra.mxu0 %v4900_v40 }
 0x23e   : > { %1013 = vmatprep.subr.bf16.mxu0 %v4903_v41 }
 0x241   : > { %1014 = vmatpush2.bf16.msra.mxu0 %v4906_v42 }
 0x242   : > { %1015 = vmatprep.subr.bf16.mxu0 %v4910_v43 }
 0x245   : > { %1016 = vmatpush2.bf16.msra.mxu0 %v4912_v44 }
 0x246   : > { %1017 = vmatprep.subr.bf16.mxu0 %v4916_v45 }
 0x249   : > { %1018 = vmatpush2.bf16.msra.mxu0 %v5524_v59 }
 0x2cc   : > { %v772_v60 = vpop.f32.mrf.mxu0 }
 0x2ce   : > { %v774_v63 = vpop.f32.mrf.mxu0 }
 0x2d0   : > { %v776_v10 = vpop.f32.mrf.mxu0 }
 0x2d1   : > { %v791_v58 = vpack.c.bf16 %v776_v10, %v772_v60 }
 0x2d2   : > { %v778_v49 = vpop.f32.mrf.mxu0 }
 0x2d3   : > { %v792_v7 = vpack.c.bf16 %v778_v49, %v774_v63 }
 0x2d4   : > { %v782_v4 = vpop.f32.mrf.mxu0 }
 0x2d5   : > { %1019 = vmatprep.mubr.bf16.mxu0 %v792_v7 }
 0x2d6   : > { %v784_v1 = vpop.f32.mrf.mxu0  ;;  %1020 = vmatmul.mubr.bf16.vlgmr.msra.gmra.mxu0 %v791_v58 }
 0x2d8   : > { %v786_v3 = vpop.f32.mrf.mxu0 }
 0x2d9   : > { %v793_v19 = vpack.c.bf16 %v786_v3, %v782_v4 }
 0x2da   : > { %v788_v8 = vpop.f32.mrf.mxu0 }
 0x2db   : > { %v794_v48 = vpack.c.bf16 %v788_v8, %v784_v1  ;;  %v5529_v8 = vld [vmem:[#allocation21_spill] sm:$0xff] }
 0x2dd   : > { %1029 = vmatprep.mubr.bf16.mxu0 %v794_v48 }
 0x2de   : > { %1030 = vmatmul.mubr.bf16.gmra.mxu0 %v793_v19 }
 0x2df   : > { %1614 = vmatprep.mubr.bf16.mxu0 %v5523_v14 }
 0x396   : > { %v1021_v47 = vpop.f32.mrf.mxu0 }
 0x398   : > { %v1023_v51 = vpop.f32.mrf.mxu0 }
 0x399   : > { %v1068_v6 = vsub.f32 %v1021_v47, %v1023_v51 }
 0x39a   : > { %v1025_v52 = vpop.f32.mrf.mxu0 }
 0x39b   : > { %v1080_v53 = vand.u32 2147483647, %v1068_v6  ;;  %v1092_v50 = vmul.f32 0.5, %v1068_v6  ;;  %v1076_v56 = vsub.f32 %v5525_v11, %v1068_v6 }
 0x39c   : > { %v1027_v2 = vpop.f32.mrf.mxu0 }
 0x39d   : > { %v1096_v5 = vmul.f32 %v1092_v50, %v1068_v6  ;;  %v3862_v55 = vadd.f32 -0.5, %v1080_v53  ;;  %vm4988_vm5 = vcmp.lt.f32.partialorder %v1080_v53, 1.0  ;;  %v1069_v57 = vsub.f32 %v1025_v52, %v1027_v2 }
 0x39e   : > { %v1031_v62 = vpop.f32.mrf.mxu0  ;;  %v1084_v0 = vand.u32 2147483647, %v1076_v56 }
 0x39f   : > { %v1077_v46 = vsub.f32 %v5528_v12, %v1069_v57  ;;  %v1081_v60 = vand.u32 2147483647, %v1069_v57  ;;  %v1093_v63 = vmul.f32 0.5, %v1069_v57  ;;  %v1104_v49 = vsel %vm4988_vm5, %v1096_v5, %v3862_v55 }
 0x3a0   : > { %v1033_v10 = vpop.f32.mrf.mxu0  ;;  %v1108_v53 = vadd.f32 %v1104_v49, %v1084_v0 }
 0x3a1   : > { %v1070_v7 = vsub.f32 %v1031_v62, %v1033_v10  ;;  %v1085_v58 = vand.u32 2147483647, %v1077_v46  ;;  %vm1089_vm6 = vcmp.lt.f32.partialorder %v1081_v60, 1.0  ;;  %v1097_v4 = vmul.f32 %v1093_v63, %v1069_v57 }
 0x3a2   : > { %v3863_v1 = vadd.f32 -0.5, %v1081_v60  ;;  %v1035_v3 = vpop.f32.mrf.mxu0  ;;  %v4205_v46 = vpack.c.bf16 %v1027_v2, %v1023_v51  ;;  %v5537_v51 = vld [vmem:[#allocation20_spill] sm:$0xff] }
 0x3a3   : > { %v1078_v48 = vsub.f32 %v5529_v8, %v1070_v7  ;;  %v1082_v19 = vand.u32 2147483647, %v1070_v7  ;;  %v1094_v6 = vmul.f32 0.5, %v1070_v7  ;;  %v4206_v44 = vpack.c.bf16 %v1035_v3, %v1031_v62 }
 0x3a4   : > { %v1105_v50 = vsel %vm1089_vm6, %v1097_v4, %v3863_v1  ;;  %v1037_v56 = vpop.f32.mrf.mxu0 }
 0x3a5   : > { %v1109_v12 = vadd.f32 %v1105_v50, %v1085_v58  ;;  %v1086_v11 = vand.u32 2147483647, %v1078_v48  ;;  %vm1090_vm7 = vcmp.lt.f32.partialorder %v1082_v19, 1.0  ;;  %v1098_v59 = vmul.f32 %v1094_v6, %v1070_v7  ;;  %v5538_v50 = vld [vmem:[#allocation21_spill] sm:$0xff] }
 0x3a6   : > { %v3864_v45 = vadd.f32 -0.5, %v1082_v19  ;;  %v1071_v54 = vsub.f32 %v1035_v3, %v1037_v56  ;;  %v4207_v5 = vpack.c.bf16 %v1037_v56, %v1033_v10  ;;  %v4204_v7 = vpack.c.bf16 %v1025_v52, %v1021_v47  ;;  %v4354_v10 = vld [vmem:[#allocation4] sm:$0xff]  }
 0x3a7   : > { %v1112_v55 = vadd.f32 %v1109_v12, %v1108_v53 }
 0x3a8   : > { %v1106_v57 = vsel %vm1090_vm7, %v1098_v59, %v3864_v45  ;;  %v1079_v60 = vsub.f32 %v4946_v9, %v1071_v54  ;;  %v1083_v63 = vand.u32 2147483647, %v1071_v54  ;;  %v1095_v8 = vmul.f32 0.5, %v1071_v54  ;;  %1172 = vmatprep.subr.bf16.mxu1 %v4207_v5 }
 0x3a9   : > { %v1110_v43 = vadd.f32 %v1106_v57, %v1086_v11  ;;  %1173 = vmatpush1.bf16.msra.mxu1 %v4206_v44  ;;  %v4355_v44 = vld [vmem:[#allocation4 + $0x8] sm:$0xff]  }
 0x3aa   : > { %v1087_v0 = vand.u32 2147483647, %v1079_v60  ;;  %vm1091_vm8 = vcmp.lt.f32.partialorder %v1083_v63, 1.0  ;;  %v1099_v49 = vmul.f32 %v1095_v8, %v1071_v54  ;;  %v3865_v58 = vadd.f32 -0.5, %v1083_v63  ;;  %1174 = vmatprep.subr.bf16.mxu1 %v4205_v46 }
 0x3ab   : > { %v1113_v4 = vadd.f32 %v1112_v55, %v1110_v43 }
 0x3ac   : > { %v1107_v1 = vsel %vm1091_vm8, %v1099_v49, %v3865_v58 }
 0x3ad   : > { %v1111_v12 = vadd.f32 %v1107_v1, %v1087_v0  ;;  %1175 = vmatpush1.bf16.msra.mxu1 %v4204_v7 }
 0x3ae   : > { %1409 = vmatprep.subr.bf16.mxu1 %v4823_v13  ;;  %v5530_v13 = vld [vmem:[#allocation15_spill] sm:$0xff] }
 0x3af   : > { %v1114_v45 = vadd.f32 %v1113_v4, %v1111_v12 }
 0x3b0   : > { %3872 = vmatmul.mubr.msk.bf16.vlgmr.msra.gmra.mxu1 %vm309_vm0, %v4354_v10 }
 0x3b1   : > { %v5000_v59 = vadd.f32 %v1114_v45, %v4950_v61  ;;  %1202 = vmatprep.mubr.bf16.mxu1 %v5523_v14  ;;  %1410 = vmatpush1.bf16.msra.mxu1 %v4825_v15  ;;  %v5531_v15 = vld [vmem:[#allocation16_spill] sm:$0xff] }
 0x3b2   : > { %1411 = vmatprep.subr.bf16.mxu1 %v4828_v16  ;;  %v5532_v16 = vld [vmem:[#allocation17_spill] sm:$0xff] }
 0x3b5   : > { %1412 = vmatpush1.bf16.msra.mxu1 %v4833_v17  ;;  %v5533_v17 = vld [vmem:[#allocation18_spill] sm:$0xff] }
 0x3b6   : > { %1413 = vmatprep.subr.bf16.mxu1 %v4836_v18 }
 0x3b8   : > { %3873 = vmatmul.mubr.msk.bf16.gmra.mxu1 %vm309_vm0, %v4355_v44 }
 0x3b9   : > { %1414 = vmatpush1.bf16.msra.mxu1 %v4839_v20 }
 0x3ba   : > { %1415 = vmatprep.subr.bf16.mxu1 %v4842_v21 }
 0x3bd   : > { %1416 = vmatpush1.bf16.msra.mxu1 %v4846_v22 }
 0x3be   : > { %1417 = vmatprep.subr.bf16.mxu1 %v4849_v23 }
 0x3c1   : > { %1418 = vmatpush1.bf16.msra.mxu1 %v4851_v24 }
 0x3c2   : > { %1419 = vmatprep.subr.bf16.mxu1 %v4853_v25 }
 0x3c5   : > { %1420 = vmatpush1.bf16.msra.mxu1 %v4857_v26 }
 0x3c6   : > { %1421 = vmatprep.subr.bf16.mxu1 %v4859_v27 }
 0x3c9   : > { %1422 = vmatpush1.bf16.msra.mxu1 %v4863_v28 }
 0x3ca   : > { %1423 = vmatprep.subr.bf16.mxu1 %v4865_v29 }
 0x3cd   : > { %1424 = vmatpush1.bf16.msra.mxu1 %v4869_v30 }
 0x3ce   : > { %1425 = vmatprep.subr.bf16.mxu1 %v4871_v31 }
 0x3d1   : > { %1426 = vmatpush2.bf16.msra.mxu1 %v4875_v32 }
 0x3d2   : > { %1427 = vmatprep.subr.bf16.mxu1 %v4877_v33 }
 0x3d5   : > { %1428 = vmatpush2.bf16.msra.mxu1 %v4881_v34 }
 0x3d6   : > { %1429 = vmatprep.subr.bf16.mxu1 %v4883_v35 }
 0x3d9   : > { %1430 = vmatpush2.bf16.msra.mxu1 %v4887_v36 }
 0x3da   : > { %1431 = vmatprep.subr.bf16.mxu1 %v4889_v37  ;;  %v5534_v37 = vld [vmem:[#allocation19_spill] sm:$0xff] }
 0x3dd   : > { %1432 = vmatpush2.bf16.msra.mxu1 %v4893_v38 }
 0x3de   : > { %1433 = vmatprep.subr.bf16.mxu1 %v4895_v39 }
 0x3e1   : > { %1434 = vmatpush2.bf16.msra.mxu1 %v4900_v40 }
 0x3e2   : > { %1435 = vmatprep.subr.bf16.mxu1 %v4903_v41 }
 0x3e5   : > { %1436 = vmatpush2.bf16.msra.mxu1 %v4906_v42  ;;  %v5093_v42 = vld [vmem:[#allocation7 + $0x4] ss:$8 sps:$4 sm:$0xff]  }
 0x3e6   : > { %1437 = vmatprep.subr.bf16.mxu1 %v5530_v13 }
 0x3e9   : > { %1438 = vmatpush2.bf16.msra.mxu1 %v5531_v15 }
 0x3ea   : > { %1439 = vmatprep.subr.bf16.mxu1 %v5532_v16 }
 0x3ed   : > { %1440 = vmatpush2.bf16.msra.mxu1 %v5533_v17 }
 0x470   : > { %v1194_v18 = vpop.f32.mrf.mxu1 }
 0x472   : > { %v1196_v20 = vpop.f32.mrf.mxu1 }
 0x474   : > { %v1198_v21 = vpop.f32.mrf.mxu1 }
 0x475   : > { %v1213_v24 = vpack.c.bf16 %v1198_v21, %v1194_v18 }
 0x476   : > { %v1200_v22 = vpop.f32.mrf.mxu1 }
 0x477   : > { %v1214_v23 = vpack.c.bf16 %v1200_v22, %v1196_v20  ;;  %v5046_v20 = vld [vmem:[#allocation7 + $0x74] ss:$8 sps:$4 sm:$0xff]  }
 0x478   : > { %v1204_v25 = vpop.f32.mrf.mxu1 }
 0x479   : > { %1441 = vmatprep.mubr.bf16.mxu1 %v1214_v23 }
 0x47a   : > { %v1206_v26 = vpop.f32.mrf.mxu1  ;;  %1442 = vmatmul.mubr.bf16.vlgmr.msra.gmra.mxu1 %v1213_v24  ;;  %v4356_v24 = vld [vmem:[#allocation4] sm:$0xff]  }
 0x47c   : > { %v1208_v27 = vpop.f32.mrf.mxu1 }
 0x47d   : > { %v1215_v30 = vpack.c.bf16 %v1208_v27, %v1204_v25  ;;  %v5051_v27 = vld [vmem:[#allocation7 + $0x64] ss:$8 sps:$4 sm:$0xff]  }
 0x47e   : > { %v1210_v28 = vpop.f32.mrf.mxu1 }
 0x47f   : > { %v1216_v29 = vpack.c.bf16 %v1210_v28, %v1206_v26  ;;  %v5048_v26 = vld [vmem:[#allocation7 + $0x70] ss:$8 sps:$4 sm:$0xff]  }
 0x481   : > { %1451 = vmatprep.mubr.bf16.mxu1 %v1216_v29 }
 0x482   : > { %1452 = vmatmul.mubr.bf16.gmra.mxu1 %v1215_v30  ;;  %v5059_v30 = vld [vmem:[#allocation7 + $0x60] ss:$8 sps:$4 sm:$0xff]  }
 0x483   : > { %2036 = vmatprep.mubr.bf16.mxu1 %v5523_v14 }
 0x53a   : > { %v1443_v31 = vpop.f32.mrf.mxu1 }
 0x53c   : > { %v1445_v32 = vpop.f32.mrf.mxu1 }
 0x53d   : > { %v1490_v33 = vsub.f32 %v1443_v31, %v1445_v32 }
 0x53e   : > { %v1447_v34 = vpop.f32.mrf.mxu1 }
 0x53f   : > { %v1502_v35 = vand.u32 2147483647, %v1490_v33  ;;  %v1514_v36 = vmul.f32 0.5, %v1490_v33  ;;  %v1498_v38 = vsub.f32 %v5534_v37, %v1490_v33  ;;  %v4208_v21 = vpack.c.bf16 %v1447_v34, %v1443_v31  ;;  %v5062_v31 = vld [vmem:[#allocation7 + $0x54] ss:$8 sps:$4 sm:$0xff]  }
 0x540   : > { %v1449_v39 = vpop.f32.mrf.mxu1 }
 0x541   : > { %v1518_v40 = vmul.f32 %v1514_v36, %v1490_v33  ;;  %v3910_v41 = vadd.f32 -0.5, %v1502_v35  ;;  %vm5037_vm9 = vcmp.lt.f32.partialorder %v1502_v35, 1.0  ;;  %v1491_v43 = vsub.f32 %v1447_v34, %v1449_v39  ;;  %v5065_v33 = vld [vmem:[#allocation7 + $0x50] ss:$8 sps:$4 sm:$0xff]   ;;  %v5068_v34 = vld [vmem:[#allocation7 + $0x44] ss:$8 sps:$4 sm:$0xff]  }
 0x542   : > { %v1453_v61 = vpop.f32.mrf.mxu1  ;;  %v1506_v47 = vand.u32 2147483647, %v1498_v38  ;;  %v4209_v1 = vpack.c.bf16 %v1449_v39, %v1445_v32  ;;  %v4357_v32 = vld [vmem:[#allocation4 + $0x8] sm:$0xff]   ;;  %v5081_v38 = vld [vmem:[#allocation7 + $0x24] ss:$8 sps:$4 sm:$0xff]  }
 0x543   : > { %v1499_v52 = vsub.f32 %v5537_v51, %v1491_v43  ;;  %v1503_v11 = vand.u32 2147483647, %v1491_v43  ;;  %v1515_v2 = vmul.f32 0.5, %v1491_v43  ;;  %v1526_v3 = vsel %vm5037_vm9, %v1518_v40, %v3910_v41  ;;  %v5075_v35 = vld [vmem:[#allocation7 + $0x34] ss:$8 sps:$4 sm:$0xff]  }
 0x544   : > { %v1455_v62 = vpop.f32.mrf.mxu1  ;;  %v1530_v55 = vadd.f32 %v1526_v3, %v1506_v47  ;;  %v5078_v36 = vld [vmem:[#allocation7 + $0x30] ss:$8 sps:$4 sm:$0xff]   ;;  %v5084_v39 = vld [vmem:[#allocation7 + $0x20] ss:$8 sps:$4 sm:$0xff]   ;;  %v5087_v40 = vld [vmem:[#allocation7 + $0x14] ss:$8 sps:$4 sm:$0xff]  }
 0x545   : > { %v1492_v8 = vsub.f32 %v1453_v61, %v1455_v62  ;;  %v1507_v48 = vand.u32 2147483647, %v1499_v52  ;;  %vm1511_vm10 = vcmp.lt.f32.partialorder %v1503_v11, 1.0  ;;  %v1519_v19 = vmul.f32 %v1515_v2, %v1491_v43  ;;  %v5090_v41 = vld [vmem:[#allocation7 + $0x10] ss:$8 sps:$4 sm:$0xff]  }
 0x546   : > { %v3911_v6 = vadd.f32 -0.5, %v1503_v11  ;;  %v1457_v53 = vpop.f32.mrf.mxu1  ;;  %v5096_v43 = vld [vmem:[#allocation7] ss:$8 sps:$4 sm:$0xff]   ;;  %v5102_v47 = vld [vmem:[#allocation7 + $0xf0] ss:$8 sps:$4 sm:$0xff]  }
 0x547   : > { %v1500_v56 = vsub.f32 %v5538_v50, %v1492_v8  ;;  %v1504_v54 = vand.u32 2147483647, %v1492_v8  ;;  %v1516_v5 = vmul.f32 0.5, %v1492_v8  ;;  %v4210_v10 = vpack.c.bf16 %v1457_v53, %v1453_v61  ;;  %v5099_v61 = vld [vmem:[#allocation7 + $0xf4] ss:$8 sps:$4 sm:$0xff]  }
 0x548   : > { %v1527_v46 = vsel %vm1511_vm10, %v1519_v19, %v3911_v6  ;;  %v1459_v57 = vpop.f32.mrf.mxu1  ;;  %v5105_v52 = vld [vmem:[#allocation7 + $0xe4] ss:$8 sps:$4 sm:$0xff]   ;;  %v5108_v11 = vld [vmem:[#allocation7 + $0xe0] ss:$8 sps:$4 sm:$0xff]   ;;  %v5111_v2 = vld [vmem:[#allocation7 + $0xd4] ss:$8 sps:$4 sm:$0xff]  }
 0x549   : > { %v1531_v60 = vadd.f32 %v1527_v46, %v1507_v48  ;;  %v1508_v63 = vand.u32 2147483647, %v1500_v56  ;;  %vm1512_vm11 = vcmp.lt.f32.partialorder %v1504_v54, 1.0  ;;  %v1520_v0 = vmul.f32 %v1516_v5, %v1492_v8  ;;  %v5117_v3 = vld [vmem:[#allocation7 + $0xc4] ss:$8 sps:$4 sm:$0xff]  }
 0x54a   : > { %v3912_v49 = vadd.f32 -0.5, %v1504_v54  ;;  %v1493_v58 = vsub.f32 %v1457_v53, %v1459_v57  ;;  %v4211_v7 = vpack.c.bf16 %v1459_v57, %v1455_v62  ;;  %v5114_v62 = vld [vmem:[#allocation7 + $0xd0] ss:$8 sps:$4 sm:$0xff]   ;;  %v5120_v8 = vld [vmem:[#allocation7 + $0xc0] ss:$8 sps:$4 sm:$0xff]  }
 0x54b   : > { %v1534_v4 = vadd.f32 %v1531_v60, %v1530_v55  ;;  %v5123_v48 = vld [vmem:[#allocation7 + $0xb4] ss:$8 sps:$4 sm:$0xff]   ;;  %v5126_v19 = vld [vmem:[#allocation7 + $0xb0] ss:$8 sps:$4 sm:$0xff]   ;;  %v5129_v6 = vld [vmem:[#allocation7 + $0xa4] ss:$8 sps:$4 sm:$0xff]  }
 0x54c   : > { %v1528_v12 = vsel %vm1512_vm11, %v1520_v0, %v3912_v49  ;;  %v1501_v45 = vsub.f32 %v4946_v9, %v1493_v58  ;;  %v1505_v44 = vand.u32 2147483647, %v1493_v58  ;;  %v1517_v13 = vmul.f32 0.5, %v1493_v58  ;;  %1594 = vmatprep.subr.bf16.mxu0 %v4211_v7  ;;  %v5132_v53 = vld [vmem:[#allocation7 + $0xa0] ss:$8 sps:$4 sm:$0xff]  }
 0x54d   : > { %v1532_v15 = vadd.f32 %v1528_v12, %v1508_v63  ;;  %1595 = vmatpush1.bf16.msra.mxu0 %v4210_v10  ;;  %v5136_v56 = vld [vmem:[#allocation7 + $0x94] ss:$8 sps:$4 sm:$0xff]   ;;  %v5138_v54 = vld [vmem:[#allocation7 + $0x90] ss:$8 sps:$4 sm:$0xff]   ;;  %v5142_v5 = vld [vmem:[#allocation7 + $0x84] ss:$8 sps:$4 sm:$0xff]  }
 0x54e   : > { %v1509_v16 = vand.u32 2147483647, %v1501_v45  ;;  %vm1513_vm12 = vcmp.lt.f32.partialorder %v1505_v44, 1.0  ;;  %v1521_v17 = vmul.f32 %v1517_v13, %v1493_v58  ;;  %v3913_v18 = vadd.f32 -0.5, %v1505_v44  ;;  %1596 = vmatprep.subr.bf16.mxu0 %v4209_v1  ;;  %5539 = vst [vmem:[#allocation15_spill] sm:$0xff] %v5136_v56  ;;  %5540 = vst [vmem:[#allocation16_spill] sm:$0xff] %v5138_v54 }
 0x54f   : > { %v1535_v22 = vadd.f32 %v1534_v4, %v1532_v15  ;;  %5541 = vst [vmem:[#allocation17_spill] sm:$0xff] %v5142_v5  ;;  %v5144_v55 = vld [vmem:[#allocation7 + $0x80] ss:$8 sps:$4 sm:$0xff]  }
 0x550   : > { %v1529_v23 = vsel %vm1513_vm12, %v1521_v17, %v3913_v18  ;;  %5542 = vst [vmem:[#allocation18_spill] sm:$0xff] %v5144_v55 }
 0x551   : > { %v1533_v25 = vadd.f32 %v1529_v23, %v1509_v16  ;;  %1597 = vmatpush1.bf16.msra.mxu0 %v4208_v21 }
 0x552   : > { %1831 = vmatprep.subr.bf16.mxu0 %v5046_v20 }
 0x553   : > { %v1536_v28 = vadd.f32 %v1535_v22, %v1533_v25 }
 0x554   : > { %3920 = vmatmul.mubr.msk.bf16.vlgmr.msra.gmra.mxu0 %vm309_vm0, %v4356_v24 }
 0x555   : > { %v5055_v29 = vadd.f32 %v1536_v28, %v5000_v59  ;;  %1624 = vmatprep.mubr.bf16.mxu0 %v5523_v14  ;;  %1832 = vmatpush1.bf16.msra.mxu0 %v5048_v26  ;;  %v5072_v59 = vld [vmem:[#allocation7 + $0x40] ss:$8 sps:$4 sm:$0xff]  }
 0x556   : > { %1833 = vmatprep.subr.bf16.mxu0 %v5051_v27 }
 0x559   : > { %1834 = vmatpush1.bf16.msra.mxu0 %v5059_v30 }
 0x55a   : > { %1835 = vmatprep.subr.bf16.mxu0 %v5062_v31 }
 0x55c   : > { %3921 = vmatmul.mubr.msk.bf16.gmra.mxu0 %vm309_vm0, %v4357_v32 }
 0x55d   : > { %1836 = vmatpush1.bf16.msra.mxu0 %v5065_v33 }
 0x55e   : > { %1837 = vmatprep.subr.bf16.mxu0 %v5068_v34 }
 0x561   : > { %1838 = vmatpush1.bf16.msra.mxu0 %v5072_v59 }
 0x562   : > { %1839 = vmatprep.subr.bf16.mxu0 %v5075_v35 }
 0x565   : > { %1840 = vmatpush1.bf16.msra.mxu0 %v5078_v36 }
 0x566   : > { %1841 = vmatprep.subr.bf16.mxu0 %v5081_v38 }
 0x569   : > { %1842 = vmatpush1.bf16.msra.mxu0 %v5084_v39 }
 0x56a   : > { %1843 = vmatprep.subr.bf16.mxu0 %v5087_v40 }
 0x56d   : > { %1844 = vmatpush1.bf16.msra.mxu0 %v5090_v41 }
 0x56e   : > { %1845 = vmatprep.subr.bf16.mxu0 %v5093_v42 }
 0x571   : > { %1846 = vmatpush1.bf16.msra.mxu0 %v5096_v43 }
 0x572   : > { %1847 = vmatprep.subr.bf16.mxu0 %v5099_v61 }
 0x575   : > { %1848 = vmatpush2.bf16.msra.mxu0 %v5102_v47 }
 0x576   : > { %1849 = vmatprep.subr.bf16.mxu0 %v5105_v52 }
 0x579   : > { %1850 = vmatpush2.bf16.msra.mxu0 %v5108_v11 }
 0x57a   : > { %1851 = vmatprep.subr.bf16.mxu0 %v5111_v2 }
 0x57d   : > { %1852 = vmatpush2.bf16.msra.mxu0 %v5114_v62 }
 0x57e   : > { %1853 = vmatprep.subr.bf16.mxu0 %v5117_v3 }
 0x581   : > { %1854 = vmatpush2.bf16.msra.mxu0 %v5120_v8 }
 0x582   : > { %1855 = vmatprep.subr.bf16.mxu0 %v5123_v48 }
 0x585   : > { %1856 = vmatpush2.bf16.msra.mxu0 %v5126_v19 }
 0x586   : > { %1857 = vmatprep.subr.bf16.mxu0 %v5129_v6 }
 0x589   : > { %1858 = vmatpush2.bf16.msra.mxu0 %v5132_v53 }
 0x58a   : > { %1859 = vmatprep.subr.bf16.mxu0 %v5136_v56 }
 0x58d   : > { %1860 = vmatpush2.bf16.msra.mxu0 %v5138_v54 }
 0x58e   : > { %1861 = vmatprep.subr.bf16.mxu0 %v5142_v5 }
 0x591   : > { %1862 = vmatpush2.bf16.msra.mxu0 %v5144_v55 }
 0x614   : > { %v1616_v46 = vpop.f32.mrf.mxu0 }
 0x616   : > { %v1618_v57 = vpop.f32.mrf.mxu0 }
 0x618   : > { %v1620_v60 = vpop.f32.mrf.mxu0 }
 0x619   : > { %v1635_v49 = vpack.c.bf16 %v1620_v60, %v1616_v46 }
 0x61a   : > { %v1622_v63 = vpop.f32.mrf.mxu0 }
 0x61b   : > { %v1636_v0 = vpack.c.bf16 %v1622_v63, %v1618_v57 }
 0x61c   : > { %v1626_v58 = vpop.f32.mrf.mxu0 }
 0x61d   : > { %1863 = vmatprep.mubr.bf16.mxu0 %v1636_v0 }
 0x61e   : > { %v1628_v7 = vpop.f32.mrf.mxu0  ;;  %1864 = vmatmul.mubr.bf16.vlgmr.msra.gmra.mxu0 %v1635_v49 }
 0x620   : > { %v1630_v4 = vpop.f32.mrf.mxu0 }
 0x621   : > { %v1637_v12 = vpack.c.bf16 %v1630_v4, %v1626_v58 }
 0x622   : > { %v1632_v1 = vpop.f32.mrf.mxu0 }
 0x623   : > { %v1638_v10 = vpack.c.bf16 %v1632_v1, %v1628_v7 }
 0x625   : > { %1873 = vmatprep.mubr.bf16.mxu0 %v1638_v10 }
 0x626   : > { %1874 = vmatmul.mubr.bf16.gmra.mxu0 %v1637_v12 }
 0x627   : > { %2458 = vmatprep.mubr.bf16.mxu0 %v5523_v14 }
 0x6de   : > { %v1865_v45 = vpop.f32.mrf.mxu0 }
 0x6e0   : > { %v1867_v44 = vpop.f32.mrf.mxu0 }
 0x6e1   : > { %v1912_v13 = vsub.f32 %v1865_v45, %v1867_v44 }
 0x6e2   : > { %v1869_v15 = vpop.f32.mrf.mxu0 }
 0x6e3   : > { %v1924_v16 = vand.u32 2147483647, %v1912_v13  ;;  %v1936_v17 = vmul.f32 0.5, %v1912_v13  ;;  %v1920_v18 = vsub.f32 %v5534_v37, %v1912_v13 }
 0x6e4   : > { %v1871_v21 = vpop.f32.mrf.mxu0 }
 0x6e5   : > { %v1940_v22 = vmul.f32 %v1936_v17, %v1912_v13  ;;  %v3958_v23 = vadd.f32 -0.5, %v1924_v16  ;;  %vm5150_vm13 = vcmp.lt.f32.partialorder %v1924_v16, 1.0  ;;  %v1913_v25 = vsub.f32 %v1869_v15, %v1871_v21 }
 0x6e6   : > { %v1875_v28 = vpop.f32.mrf.mxu0  ;;  %v1928_v32 = vand.u32 2147483647, %v1920_v18 }
 0x6e7   : > { %v1921_v46 = vsub.f32 %v5537_v51, %v1913_v25  ;;  %v1925_v57 = vand.u32 2147483647, %v1913_v25  ;;  %v1937_v60 = vmul.f32 0.5, %v1913_v25  ;;  %v1948_v0 = vsel %vm5150_vm13, %v1940_v22, %v3958_v23 }
 0x6e8   : > { %v1877_v63 = vpop.f32.mrf.mxu0  ;;  %v1952_v16 = vadd.f32 %v1948_v0, %v1928_v32 }
 0x6e9   : > { %v1914_v49 = vsub.f32 %v1875_v28, %v1877_v63  ;;  %v1929_v58 = vand.u32 2147483647, %v1921_v46  ;;  %vm1933_vm14 = vcmp.lt.f32.partialorder %v1925_v57, 1.0  ;;  %v1941_v7 = vmul.f32 %v1937_v60, %v1913_v25 }
 0x6ea   : > { %v3959_v4 = vadd.f32 -0.5, %v1925_v57  ;;  %v1879_v1 = vpop.f32.mrf.mxu0  ;;  %v4213_v46 = vpack.c.bf16 %v1871_v21, %v1867_v44 }
 0x6eb   : > { %v1922_v10 = vsub.f32 %v5538_v50, %v1914_v49  ;;  %v1926_v12 = vand.u32 2147483647, %v1914_v49  ;;  %v1938_v13 = vmul.f32 0.5, %v1914_v49  ;;  %v4214_v54 = vpack.c.bf16 %v1879_v1, %v1875_v28 }
 0x6ec   : > { %v1949_v17 = vsel %vm1933_vm14, %v1941_v7, %v3959_v4  ;;  %v1881_v18 = vpop.f32.mrf.mxu0 }
 0x6ed   : > { %v1953_v51 = vadd.f32 %v1949_v17, %v1929_v58  ;;  %v1930_v37 = vand.u32 2147483647, %v1922_v10  ;;  %vm1934_vm15 = vcmp.lt.f32.partialorder %v1926_v12, 1.0  ;;  %v1942_v55 = vmul.f32 %v1938_v13, %v1914_v49 }
 0x6ee   : > { %v3960_v5 = vadd.f32 -0.5, %v1926_v12  ;;  %v1915_v24 = vsub.f32 %v1879_v1, %v1881_v18  ;;  %v4215_v22 = vpack.c.bf16 %v1881_v18, %v1877_v63  ;;  %v4212_v49 = vpack.c.bf16 %v1869_v15, %v1865_v45  ;;  %v4406_v63 = vld [vmem:[#allocation4] sm:$0xff]  }
 0x6ef   : > { %v1956_v23 = vadd.f32 %v1953_v51, %v1952_v16 }
 0x6f0   : > { %v1950_v25 = vsel %vm1934_vm15, %v1942_v55, %v3960_v5  ;;  %v1923_v57 = vsub.f32 %v4946_v9, %v1915_v24  ;;  %v1927_v60 = vand.u32 2147483647, %v1915_v24  ;;  %v1939_v50 = vmul.f32 0.5, %v1915_v24  ;;  %2016 = vmatprep.subr.bf16.mxu1 %v4215_v22 }
 0x6f1   : > { %v1954_v56 = vadd.f32 %v1950_v25, %v1930_v37  ;;  %2017 = vmatpush1.bf16.msra.mxu1 %v4214_v54  ;;  %v4407_v37 = vld [vmem:[#allocation4 + $0x8] sm:$0xff]   ;;  %v5548_v54 = vld [vmem:[#allocation18_spill] sm:$0xff] }
 0x6f2   : > { %v1931_v32 = vand.u32 2147483647, %v1923_v57  ;;  %vm1935_vm1 = vcmp.lt.f32.partialorder %v1927_v60, 1.0  ;;  %v1943_v0 = vmul.f32 %v1939_v50, %v1915_v24  ;;  %v3961_v58 = vadd.f32 -0.5, %v1927_v60  ;;  %2018 = vmatprep.subr.bf16.mxu1 %v4213_v46  ;;  %v5545_v50 = vld [vmem:[#allocation15_spill] sm:$0xff] }
 0x6f3   : > { %v1957_v7 = vadd.f32 %v1956_v23, %v1954_v56  ;;  %v5547_v56 = vld [vmem:[#allocation17_spill] sm:$0xff]  ;;  %v5549_v60 = vld [vmem:[#allocation19_spill] sm:$0xff] }
 0x6f4   : > { %v1951_v4 = vsel %vm1935_vm1, %v1943_v0, %v3961_v58 }
 0x6f5   : > { %v1955_v51 = vadd.f32 %v1951_v4, %v1931_v32  ;;  %2019 = vmatpush1.bf16.msra.mxu1 %v4212_v49 }
 0x6f6   : > { %2253 = vmatprep.subr.bf16.mxu1 %v5046_v20 }
 0x6f7   : > { %v1958_v5 = vadd.f32 %v1957_v7, %v1955_v51 }
 0x6f8   : > { %3968 = vmatmul.mubr.msk.bf16.vlgmr.msra.gmra.mxu1 %vm309_vm0, %v4406_v63 }
 0x6f9   : > { %v5162_v55 = vadd.f32 %v1958_v5, %v5055_v29  ;;  %2046 = vmatprep.mubr.bf16.mxu1 %v5523_v14  ;;  %2254 = vmatpush1.bf16.msra.mxu1 %v5048_v26  ;;  %v5546_v29 = vld [vmem:[#allocation16_spill] sm:$0xff] }
 0x6fa   : > { %2255 = vmatprep.subr.bf16.mxu1 %v5051_v27  ;;  %v5552_v5 = vld [vmem:[#allocation20_spill] sm:$0xff] }
 0x6fd   : > { %2256 = vmatpush1.bf16.msra.mxu1 %v5059_v30 }
 0x6fe   : > { %2257 = vmatprep.subr.bf16.mxu1 %v5062_v31 }
 0x700   : > { %3969 = vmatmul.mubr.msk.bf16.gmra.mxu1 %vm309_vm0, %v4407_v37 }
 0x701   : > { %2258 = vmatpush1.bf16.msra.mxu1 %v5065_v33 }
 0x702   : > { %2259 = vmatprep.subr.bf16.mxu1 %v5068_v34 }
 0x705   : > { %2260 = vmatpush1.bf16.msra.mxu1 %v5072_v59 }
 0x706   : > { %2261 = vmatprep.subr.bf16.mxu1 %v5075_v35 }
 0x709   : > { %2262 = vmatpush1.bf16.msra.mxu1 %v5078_v36 }
 0x70a   : > { %2263 = vmatprep.subr.bf16.mxu1 %v5081_v38 }
 0x70d   : > { %2264 = vmatpush1.bf16.msra.mxu1 %v5084_v39 }
 0x70e   : > { %2265 = vmatprep.subr.bf16.mxu1 %v5087_v40 }
 0x711   : > { %2266 = vmatpush1.bf16.msra.mxu1 %v5090_v41 }
 0x712   : > { %2267 = vmatprep.subr.bf16.mxu1 %v5093_v42 }
 0x715   : > { %2268 = vmatpush1.bf16.msra.mxu1 %v5096_v43 }
 0x716   : > { %2269 = vmatprep.subr.bf16.mxu1 %v5099_v61 }
 0x719   : > { %2270 = vmatpush2.bf16.msra.mxu1 %v5102_v47 }
 0x71a   : > { %2271 = vmatprep.subr.bf16.mxu1 %v5105_v52 }
 0x71d   : > { %2272 = vmatpush2.bf16.msra.mxu1 %v5108_v11 }
 0x71e   : > { %2273 = vmatprep.subr.bf16.mxu1 %v5111_v2 }
 0x721   : > { %2274 = vmatpush2.bf16.msra.mxu1 %v5114_v62 }
 0x722   : > { %2275 = vmatprep.subr.bf16.mxu1 %v5117_v3 }
 0x725   : > { %2276 = vmatpush2.bf16.msra.mxu1 %v5120_v8 }
 0x726   : > { %2277 = vmatprep.subr.bf16.mxu1 %v5123_v48 }
 0x729   : > { %2278 = vmatpush2.bf16.msra.mxu1 %v5126_v19 }
 0x72a   : > { %2279 = vmatprep.subr.bf16.mxu1 %v5129_v6 }
 0x72d   : > { %2280 = vmatpush2.bf16.msra.mxu1 %v5132_v53 }
 0x72e   : > { %2281 = vmatprep.subr.bf16.mxu1 %v5545_v50 }
 0x731   : > { %2282 = vmatpush2.bf16.msra.mxu1 %v5546_v29 }
 0x732   : > { %2283 = vmatprep.subr.bf16.mxu1 %v5547_v56 }
 0x735   : > { %2284 = vmatpush2.bf16.msra.mxu1 %v5548_v54 }
 0x7b8   : > { %v2038_v45 = vpop.f32.mrf.mxu1 }
 0x7ba   : > { %v2040_v44 = vpop.f32.mrf.mxu1 }
 0x7bc   : > { %v2042_v15 = vpop.f32.mrf.mxu1 }
 0x7bd   : > { %v2057_v1 = vpack.c.bf16 %v2042_v15, %v2038_v45 }
 0x7be   : > { %v2044_v21 = vpop.f32.mrf.mxu1 }
 0x7bf   : > { %v2058_v28 = vpack.c.bf16 %v2044_v21, %v2040_v44 }
 0x7c0   : > { %v2048_v10 = vpop.f32.mrf.mxu1 }
 0x7c1   : > { %2285 = vmatprep.mubr.bf16.mxu1 %v2058_v28 }
 0x7c2   : > { %v2050_v12 = vpop.f32.mrf.mxu1  ;;  %2286 = vmatmul.mubr.bf16.vlgmr.msra.gmra.mxu1 %v2057_v1 }
 0x7c4   : > { %v2052_v13 = vpop.f32.mrf.mxu1 }
 0x7c5   : > { %v2059_v18 = vpack.c.bf16 %v2052_v13, %v2048_v10 }
 0x7c6   : > { %v2054_v16 = vpop.f32.mrf.mxu1 }
 0x7c7   : > { %v2060_v17 = vpack.c.bf16 %v2054_v16, %v2050_v12  ;;  %v5553_v16 = vld [vmem:[#allocation21_spill] sm:$0xff] }
 0x7c9   : > { %2295 = vmatprep.mubr.bf16.mxu1 %v2060_v17 }
 0x7ca   : > { %2296 = vmatmul.mubr.bf16.gmra.mxu1 %v2059_v18 }
 0x7cb   : > { %2880 = vmatprep.mubr.bf16.mxu1 %v5523_v14 }
 0x882   : > { %v2287_v24 = vpop.f32.mrf.mxu1 }
 0x884   : > { %v2289_v22 = vpop.f32.mrf.mxu1 }
 0x885   : > { %v2334_v23 = vsub.f32 %v2287_v24, %v2289_v22 }
 0x886   : > { %v2291_v46 = vpop.f32.mrf.mxu1 }
 0x887   : > { %v2346_v25 = vand.u32 2147483647, %v2334_v23  ;;  %v2358_v57 = vmul.f32 0.5, %v2334_v23  ;;  %v2342_v32 = vsub.f32 %v5549_v60, %v2334_v23 }
 0x888   : > { %v2293_v0 = vpop.f32.mrf.mxu1 }
 0x889   : > { %v2362_v58 = vmul.f32 %v2358_v57, %v2334_v23  ;;  %v4006_v49 = vadd.f32 -0.5, %v2346_v25  ;;  %vm5199_vm2 = vcmp.lt.f32.partialorder %v2346_v25, 1.0  ;;  %v2335_v4 = vsub.f32 %v2291_v46, %v2293_v0 }
 0x88a   : > { %v2297_v63 = vpop.f32.mrf.mxu1  ;;  %v2350_v51 = vand.u32 2147483647, %v2342_v32 }
 0x88b   : > { %v2343_v37 = vsub.f32 %v5552_v5, %v2335_v4  ;;  %v2347_v45 = vand.u32 2147483647, %v2335_v4  ;;  %v2359_v44 = vmul.f32 0.5, %v2335_v4  ;;  %v2370_v21 = vsel %vm5199_vm2, %v2362_v58, %v4006_v49 }
 0x88c   : > { %v2299_v15 = vpop.f32.mrf.mxu1  ;;  %v2374_v25 = vadd.f32 %v2370_v21, %v2350_v51 }
 0x88d   : > { %v2336_v28 = vsub.f32 %v2297_v63, %v2299_v15  ;;  %v2351_v1 = vand.u32 2147483647, %v2343_v37  ;;  %vm2355_vm3 = vcmp.lt.f32.partialorder %v2347_v45, 1.0  ;;  %v2363_v10 = vmul.f32 %v2359_v44, %v2335_v4 }
 0x88e   : > { %v4007_v12 = vadd.f32 -0.5, %v2347_v45  ;;  %v2301_v13 = vpop.f32.mrf.mxu1  ;;  %v4217_v37 = vpack.c.bf16 %v2293_v0, %v2289_v22  ;;  %v5561_v22 = vld [vmem:[#allocation20_spill] sm:$0xff] }
 0x88f   : > { %v2344_v17 = vsub.f32 %v5553_v16, %v2336_v28  ;;  %v2348_v18 = vand.u32 2147483647, %v2336_v28  ;;  %v2360_v23 = vmul.f32 0.5, %v2336_v28  ;;  %v4218_v29 = vpack.c.bf16 %v2301_v13, %v2297_v63 }
 0x890   : > { %v2371_v57 = vsel %vm2355_vm3, %v2363_v10, %v4007_v12  ;;  %v2303_v32 = vpop.f32.mrf.mxu1 }
 0x891   : > { %v2375_v5 = vadd.f32 %v2371_v57, %v2351_v1  ;;  %v2352_v60 = vand.u32 2147483647, %v2344_v17  ;;  %vm2356_vm4 = vcmp.lt.f32.partialorder %v2348_v18, 1.0  ;;  %v2364_v54 = vmul.f32 %v2360_v23, %v2336_v28  ;;  %v5562_v57 = vld [vmem:[#allocation21_spill] sm:$0xff] }
 0x892   : > { %v4008_v56 = vadd.f32 -0.5, %v2348_v18  ;;  %v2337_v7 = vsub.f32 %v2301_v13, %v2303_v32  ;;  %v4219_v58 = vpack.c.bf16 %v2303_v32, %v2299_v15  ;;  %v4216_v28 = vpack.c.bf16 %v2291_v46, %v2287_v24  ;;  %v4408_v15 = vld [vmem:[#allocation4] sm:$0xff]  }
 0x893   : > { %v2378_v49 = vadd.f32 %v2375_v5, %v2374_v25 }
 0x894   : > { %v2372_v4 = vsel %vm2356_vm4, %v2364_v54, %v4008_v56  ;;  %v2345_v45 = vsub.f32 %v4946_v9, %v2337_v7  ;;  %v2349_v44 = vand.u32 2147483647, %v2337_v7  ;;  %v2361_v16 = vmul.f32 0.5, %v2337_v7  ;;  %2438 = vmatprep.subr.bf16.mxu0 %v4219_v58  ;;  %v4409_v54 = vld [vmem:[#allocation4 + $0x8] sm:$0xff]  }
 0x895   : > { %v2376_v50 = vadd.f32 %v2372_v4, %v2352_v60  ;;  %2439 = vmatpush1.bf16.msra.mxu0 %v4218_v29 }
 0x896   : > { %v2353_v51 = vand.u32 2147483647, %v2345_v45  ;;  %vm2357_vm5 = vcmp.lt.f32.partialorder %v2349_v44, 1.0  ;;  %v2365_v21 = vmul.f32 %v2361_v16, %v2337_v7  ;;  %v4009_v1 = vadd.f32 -0.5, %v2349_v44  ;;  %2440 = vmatprep.subr.bf16.mxu0 %v4217_v37 }
 0x897   : > { %v2379_v10 = vadd.f32 %v2378_v49, %v2376_v50 }
 0x898   : > { %v2373_v12 = vsel %vm2357_vm5, %v2365_v21, %v4009_v1 }
 0x899   : > { %v2377_v5 = vadd.f32 %v2373_v12, %v2353_v51  ;;  %2441 = vmatpush1.bf16.msra.mxu0 %v4216_v28 }
 0x89a   : > { %2675 = vmatprep.subr.bf16.mxu0 %v5046_v20  ;;  %v5554_v20 = vld [vmem:[#allocation15_spill] sm:$0xff] }
 0x89b   : > { %v2380_v56 = vadd.f32 %v2379_v10, %v2377_v5 }
 0x89c   : > { %4016 = vmatmul.mubr.msk.bf16.vlgmr.msra.gmra.mxu0 %vm309_vm0, %v4408_v15 }
 0x89d   : > { %2468 = vmatprep.mubr.bf16.mxu0 %v5523_v14  ;;  %2676 = vmatpush1.bf16.msra.mxu0 %v5048_v26  ;;  %v5213_v29 = vadd.f32 %v2380_v56, %v5162_v55  ;;  %v5555_v26 = vld [vmem:[#allocation16_spill] sm:$0xff] }
 0x89e   : > { %2677 = vmatprep.subr.bf16.mxu0 %v5051_v27  ;;  %v5556_v27 = vld [vmem:[#allocation17_spill] sm:$0xff] }
 0x8a1   : > { %2678 = vmatpush1.bf16.msra.mxu0 %v5059_v30  ;;  %v5557_v30 = vld [vmem:[#allocation18_spill] sm:$0xff] }
 0x8a2   : > { %2679 = vmatprep.subr.bf16.mxu0 %v5062_v31 }
 0x8a4   : > { %4017 = vmatmul.mubr.msk.bf16.gmra.mxu0 %vm309_vm0, %v4409_v54 }
 0x8a5   : > { %2680 = vmatpush1.bf16.msra.mxu0 %v5065_v33 }
 0x8a6   : > { %2681 = vmatprep.subr.bf16.mxu0 %v5068_v34 }
 0x8a9   : > { %2682 = vmatpush1.bf16.msra.mxu0 %v5072_v59 }
 0x8aa   : > { %2683 = vmatprep.subr.bf16.mxu0 %v5075_v35 }
 0x8ad   : > { %2684 = vmatpush1.bf16.msra.mxu0 %v5078_v36 }
 0x8ae   : > { %2685 = vmatprep.subr.bf16.mxu0 %v5081_v38 }
 0x8b1   : > { %2686 = vmatpush1.bf16.msra.mxu0 %v5084_v39 }
 0x8b2   : > { %2687 = vmatprep.subr.bf16.mxu0 %v5087_v40 }
 0x8b5   : > { %2688 = vmatpush1.bf16.msra.mxu0 %v5090_v41 }
 0x8b6   : > { %2689 = vmatprep.subr.bf16.mxu0 %v5093_v42 }
 0x8b9   : > { %2690 = vmatpush1.bf16.msra.mxu0 %v5096_v43 }
 0x8ba   : > { %2691 = vmatprep.subr.bf16.mxu0 %v5099_v61 }
 0x8bd   : > { %2692 = vmatpush2.bf16.msra.mxu0 %v5102_v47 }
 0x8be   : > { %2693 = vmatprep.subr.bf16.mxu0 %v5105_v52 }
 0x8c1   : > { %2694 = vmatpush2.bf16.msra.mxu0 %v5108_v11 }
 0x8c2   : > { %2695 = vmatprep.subr.bf16.mxu0 %v5111_v2 }
 0x8c5   : > { %2696 = vmatpush2.bf16.msra.mxu0 %v5114_v62 }
 0x8c6   : > { %2697 = vmatprep.subr.bf16.mxu0 %v5117_v3  ;;  %v5558_v3 = vld [vmem:[#allocation19_spill] sm:$0xff] }
 0x8c9   : > { %2698 = vmatpush2.bf16.msra.mxu0 %v5120_v8 }
 0x8ca   : > { %2699 = vmatprep.subr.bf16.mxu0 %v5123_v48 }
 0x8cd   : > { %2700 = vmatpush2.bf16.msra.mxu0 %v5126_v19 }
 0x8ce   : > { %2701 = vmatprep.subr.bf16.mxu0 %v5129_v6 }
 0x8d1   : > { %2702 = vmatpush2.bf16.msra.mxu0 %v5132_v53  ;;  %v5304_v53 = vld [vmem:[#allocation7 + $0x4] ss:$8 sps:$4 sm:$0xff]  }
 0x8d2   : > { %2703 = vmatprep.subr.bf16.mxu0 %v5554_v20 }
 0x8d5   : > { %2704 = vmatpush2.bf16.msra.mxu0 %v5555_v26 }
 0x8d6   : > { %2705 = vmatprep.subr.bf16.mxu0 %v5556_v27 }
 0x8d9   : > { %2706 = vmatpush2.bf16.msra.mxu0 %v5557_v30 }
 0x95c   : > { %v2460_v31 = vpop.f32.mrf.mxu0 }
 0x95e   : > { %v2462_v33 = vpop.f32.mrf.mxu0 }
 0x960   : > { %v2464_v34 = vpop.f32.mrf.mxu0 }
 0x961   : > { %v2479_v36 = vpack.c.bf16 %v2464_v34, %v2460_v31 }
 0x962   : > { %v2466_v59 = vpop.f32.mrf.mxu0 }
 0x963   : > { %v2480_v35 = vpack.c.bf16 %v2466_v59, %v2462_v33  ;;  %v5257_v33 = vld [vmem:[#allocation7 + $0x74] ss:$8 sps:$4 sm:$0xff]  }
 0x964   : > { %v2470_v38 = vpop.f32.mrf.mxu0 }
 0x965   : > { %2707 = vmatprep.mubr.bf16.mxu0 %v2480_v35 }
 0x966   : > { %v2472_v39 = vpop.f32.mrf.mxu0  ;;  %2708 = vmatmul.mubr.bf16.vlgmr.msra.gmra.mxu0 %v2479_v36  ;;  %v4410_v36 = vld [vmem:[#allocation4] sm:$0xff]  }
 0x968   : > { %v2474_v40 = vpop.f32.mrf.mxu0 }
 0x969   : > { %v2481_v43 = vpack.c.bf16 %v2474_v40, %v2470_v38  ;;  %v5262_v40 = vld [vmem:[#allocation7 + $0x64] ss:$8 sps:$4 sm:$0xff]  }
 0x96a   : > { %v2476_v41 = vpop.f32.mrf.mxu0 }
 0x96b   : > { %v2482_v42 = vpack.c.bf16 %v2476_v41, %v2472_v39  ;;  %v5259_v39 = vld [vmem:[#allocation7 + $0x70] ss:$8 sps:$4 sm:$0xff]  }
 0x96d   : > { %2717 = vmatprep.mubr.bf16.mxu0 %v2482_v42  ;;  %v5267_v42 = vld [vmem:[#allocation7 + $0x60] ss:$8 sps:$4 sm:$0xff]  }
 0x96e   : > { %2718 = vmatmul.mubr.bf16.gmra.mxu0 %v2481_v43 }
 0x96f   : > { %3302 = vmatprep.mubr.bf16.mxu0 %v5523_v14 }
 0xa26   : > { %v2709_v61 = vpop.f32.mrf.mxu0 }
 0xa28   : > { %v2711_v47 = vpop.f32.mrf.mxu0 }
 0xa29   : > { %v2756_v52 = vsub.f32 %v2709_v61, %v2711_v47 }
 0xa2a   : > { %v2713_v11 = vpop.f32.mrf.mxu0 }
 0xa2b   : > { %v2768_v2 = vand.u32 2147483647, %v2756_v52  ;;  %v2780_v62 = vmul.f32 0.5, %v2756_v52  ;;  %v2764_v8 = vsub.f32 %v5558_v3, %v2756_v52  ;;  %v4220_v34 = vpack.c.bf16 %v2713_v11, %v2709_v61  ;;  %v5273_v61 = vld [vmem:[#allocation7 + $0x54] ss:$8 sps:$4 sm:$0xff]  }
 0xa2c   : > { %v2715_v48 = vpop.f32.mrf.mxu0 }
 0xa2d   : > { %v2784_v19 = vmul.f32 %v2780_v62, %v2756_v52  ;;  %v4054_v6 = vadd.f32 -0.5, %v2768_v2  ;;  %vm5248_vm6 = vcmp.lt.f32.partialorder %v2768_v2, 1.0  ;;  %v2757_v55 = vsub.f32 %v2713_v11, %v2715_v48  ;;  %v5276_v52 = vld [vmem:[#allocation7 + $0x50] ss:$8 sps:$4 sm:$0xff]   ;;  %v5279_v11 = vld [vmem:[#allocation7 + $0x44] ss:$8 sps:$4 sm:$0xff]  }
 0xa2e   : > { %v2719_v50 = vpop.f32.mrf.mxu0  ;;  %v2772_v24 = vand.u32 2147483647, %v2764_v8  ;;  %v4221_v12 = vpack.c.bf16 %v2715_v48, %v2711_v47  ;;  %v4411_v47 = vld [vmem:[#allocation4 + $0x8] sm:$0xff]   ;;  %v5283_v2 = vld [vmem:[#allocation7 + $0x40] ss:$8 sps:$4 sm:$0xff]  }
 0xa2f   : > { %v2765_v46 = vsub.f32 %v5561_v22, %v2757_v55  ;;  %v2769_v60 = vand.u32 2147483647, %v2757_v55  ;;  %v2781_v0 = vmul.f32 0.5, %v2757_v55  ;;  %v2792_v13 = vsel %vm5248_vm6, %v2784_v19, %v4054_v6  ;;  %v5289_v62 = vld [vmem:[#allocation7 + $0x30] ss:$8 sps:$4 sm:$0xff]  }
 0xa30   : > { %v2721_v63 = vpop.f32.mrf.mxu0  ;;  %v2796_v49 = vadd.f32 %v2792_v13, %v2772_v24  ;;  %v5292_v8 = vld [vmem:[#allocation7 + $0x24] ss:$8 sps:$4 sm:$0xff]   ;;  %v5295_v48 = vld [vmem:[#allocation7 + $0x20] ss:$8 sps:$4 sm:$0xff]   ;;  %v5298_v19 = vld [vmem:[#allocation7 + $0x14] ss:$8 sps:$4 sm:$0xff]  }
 0xa31   : > { %v2758_v16 = vsub.f32 %v2719_v50, %v2721_v63  ;;  %v2773_v17 = vand.u32 2147483647, %v2765_v46  ;;  %vm2777_vm7 = vcmp.lt.f32.partialorder %v2769_v60, 1.0  ;;  %v2785_v18 = vmul.f32 %v2781_v0, %v2757_v55  ;;  %v5301_v6 = vld [vmem:[#allocation7 + $0x10] ss:$8 sps:$4 sm:$0xff]  }
 0xa32   : > { %v4055_v23 = vadd.f32 -0.5, %v2769_v60  ;;  %v2723_v25 = vpop.f32.mrf.mxu0  ;;  %v5307_v55 = vld [vmem:[#allocation7] ss:$8 sps:$4 sm:$0xff]   ;;  %v5313_v24 = vld [vmem:[#allocation7 + $0xf0] ss:$8 sps:$4 sm:$0xff]  }
 0xa33   : > { %v2766_v32 = vsub.f32 %v5562_v57, %v2758_v16  ;;  %v2770_v7 = vand.u32 2147483647, %v2758_v16  ;;  %v2782_v58 = vmul.f32 0.5, %v2758_v16  ;;  %v4222_v15 = vpack.c.bf16 %v2723_v25, %v2719_v50  ;;  %v5310_v50 = vld [vmem:[#allocation7 + $0xf4] ss:$8 sps:$4 sm:$0xff]  }
 0xa34   : > { %v2793_v37 = vsel %vm2777_vm7, %v2785_v18, %v4055_v23  ;;  %v2725_v4 = vpop.f32.mrf.mxu0  ;;  %v5316_v46 = vld [vmem:[#allocation7 + $0xe4] ss:$8 sps:$4 sm:$0xff]   ;;  %v5319_v60 = vld [vmem:[#allocation7 + $0xe0] ss:$8 sps:$4 sm:$0xff]   ;;  %v5322_v0 = vld [vmem:[#allocation7 + $0xd4] ss:$8 sps:$4 sm:$0xff]  }
 0xa35   : > { %v2797_v45 = vadd.f32 %v2793_v37, %v2773_v17  ;;  %v2774_v44 = vand.u32 2147483647, %v2766_v32  ;;  %vm2778_vm8 = vcmp.lt.f32.partialorder %v2770_v7, 1.0  ;;  %v2786_v51 = vmul.f32 %v2782_v58, %v2758_v16  ;;  %v5328_v13 = vld [vmem:[#allocation7 + $0xc4] ss:$8 sps:$4 sm:$0xff]  }
 0xa36   : > { %v4056_v21 = vadd.f32 -0.5, %v2770_v7  ;;  %v2759_v1 = vsub.f32 %v2723_v25, %v2725_v4  ;;  %v4223_v28 = vpack.c.bf16 %v2725_v4, %v2721_v63  ;;  %v5325_v63 = vld [vmem:[#allocation7 + $0xd0] ss:$8 sps:$4 sm:$0xff]   ;;  %v5331_v16 = vld [vmem:[#allocation7 + $0xc0] ss:$8 sps:$4 sm:$0xff]  }
 0xa37   : > { %v2800_v10 = vadd.f32 %v2797_v45, %v2796_v49  ;;  %v5334_v17 = vld [vmem:[#allocation7 + $0xb4] ss:$8 sps:$4 sm:$0xff]   ;;  %v5337_v18 = vld [vmem:[#allocation7 + $0xb0] ss:$8 sps:$4 sm:$0xff]   ;;  %v5340_v23 = vld [vmem:[#allocation7 + $0xa4] ss:$8 sps:$4 sm:$0xff]  }
 0xa38   : > { %v2794_v5 = vsel %vm2778_vm8, %v2786_v51, %v4056_v21  ;;  %v2767_v56 = vsub.f32 %v4946_v9, %v2759_v1  ;;  %v2771_v54 = vand.u32 2147483647, %v2759_v1  ;;  %v2783_v20 = vmul.f32 0.5, %v2759_v1  ;;  %2860 = vmatprep.subr.bf16.mxu1 %v4223_v28  ;;  %v5343_v25 = vld [vmem:[#allocation7 + $0xa0] ss:$8 sps:$4 sm:$0xff]  }
 0xa39   : > { %v2798_v26 = vadd.f32 %v2794_v5, %v2774_v44  ;;  %2861 = vmatpush1.bf16.msra.mxu1 %v4222_v15  ;;  %v5347_v32 = vld [vmem:[#allocation7 + $0x94] ss:$8 sps:$4 sm:$0xff]   ;;  %v5349_v7 = vld [vmem:[#allocation7 + $0x90] ss:$8 sps:$4 sm:$0xff]   ;;  %v5353_v58 = vld [vmem:[#allocation7 + $0x84] ss:$8 sps:$4 sm:$0xff]  }
 0xa3a   : > { %v2775_v27 = vand.u32 2147483647, %v2767_v56  ;;  %vm2779_vm9 = vcmp.lt.f32.partialorder %v2771_v54, 1.0  ;;  %v2787_v30 = vmul.f32 %v2783_v20, %v2759_v1  ;;  %v4057_v31 = vadd.f32 -0.5, %v2771_v54  ;;  %2862 = vmatprep.subr.bf16.mxu1 %v4221_v12  ;;  %5563 = vst [vmem:[#allocation15_spill] sm:$0xff] %v5347_v32  ;;  %5564 = vst [vmem:[#allocation16_spill] sm:$0xff] %v5349_v7 }
 0xa3b   : > { %v2801_v59 = vadd.f32 %v2800_v10, %v2798_v26  ;;  %5565 = vst [vmem:[#allocation17_spill] sm:$0xff] %v5353_v58  ;;  %v5355_v49 = vld [vmem:[#allocation7 + $0x80] ss:$8 sps:$4 sm:$0xff]  }
 0xa3c   : > { %v2795_v35 = vsel %vm2779_vm9, %v2787_v30, %v4057_v31  ;;  %5566 = vst [vmem:[#allocation18_spill] sm:$0xff] %v5355_v49 }
 0xa3d   : > { %v2799_v38 = vadd.f32 %v2795_v35, %v2775_v27  ;;  %2863 = vmatpush1.bf16.msra.mxu1 %v4220_v34 }
 0xa3e   : > { %3097 = vmatprep.subr.bf16.mxu1 %v5257_v33 }
 0xa3f   : > { %v2802_v41 = vadd.f32 %v2801_v59, %v2799_v38 }
 0xa40   : > { %4064 = vmatmul.mubr.msk.bf16.vlgmr.msra.gmra.mxu1 %vm309_vm0, %v4410_v36 }
 0xa41   : > { %2890 = vmatprep.mubr.bf16.mxu1 %v5523_v14  ;;  %3098 = vmatpush1.bf16.msra.mxu1 %v5259_v39  ;;  %v5270_v43 = vadd.f32 %v2802_v41, %v5213_v29  ;;  %v5286_v29 = vld [vmem:[#allocation7 + $0x34] ss:$8 sps:$4 sm:$0xff]  }
 0xa42   : > { %3099 = vmatprep.subr.bf16.mxu1 %v5262_v40 }
 0xa45   : > { %3100 = vmatpush1.bf16.msra.mxu1 %v5267_v42 }
 0xa46   : > { %3101 = vmatprep.subr.bf16.mxu1 %v5273_v61 }
 0xa48   : > { %4065 = vmatmul.mubr.msk.bf16.gmra.mxu1 %vm309_vm0, %v4411_v47 }
 0xa49   : > { %3102 = vmatpush1.bf16.msra.mxu1 %v5276_v52 }
 0xa4a   : > { %3103 = vmatprep.subr.bf16.mxu1 %v5279_v11 }
 0xa4d   : > { %3104 = vmatpush1.bf16.msra.mxu1 %v5283_v2 }
 0xa4e   : > { %3105 = vmatprep.subr.bf16.mxu1 %v5286_v29 }
 0xa51   : > { %3106 = vmatpush1.bf16.msra.mxu1 %v5289_v62 }
 0xa52   : > { %3107 = vmatprep.subr.bf16.mxu1 %v5292_v8 }
 0xa55   : > { %3108 = vmatpush1.bf16.msra.mxu1 %v5295_v48 }
 0xa56   : > { %3109 = vmatprep.subr.bf16.mxu1 %v5298_v19 }
 0xa59   : > { %3110 = vmatpush1.bf16.msra.mxu1 %v5301_v6 }
 0xa5a   : > { %3111 = vmatprep.subr.bf16.mxu1 %v5304_v53 }
 0xa5d   : > { %3112 = vmatpush1.bf16.msra.mxu1 %v5307_v55 }
 0xa5e   : > { %3113 = vmatprep.subr.bf16.mxu1 %v5310_v50 }
 0xa61   : > { %3114 = vmatpush2.bf16.msra.mxu1 %v5313_v24 }
 0xa62   : > { %3115 = vmatprep.subr.bf16.mxu1 %v5316_v46 }
 0xa65   : > { %3116 = vmatpush2.bf16.msra.mxu1 %v5319_v60 }
 0xa66   : > { %3117 = vmatprep.subr.bf16.mxu1 %v5322_v0 }
 0xa69   : > { %3118 = vmatpush2.bf16.msra.mxu1 %v5325_v63 }
 0xa6a   : > { %3119 = vmatprep.subr.bf16.mxu1 %v5328_v13 }
 0xa6d   : > { %3120 = vmatpush2.bf16.msra.mxu1 %v5331_v16 }
 0xa6e   : > { %3121 = vmatprep.subr.bf16.mxu1 %v5334_v17 }
 0xa71   : > { %3122 = vmatpush2.bf16.msra.mxu1 %v5337_v18 }
 0xa72   : > { %3123 = vmatprep.subr.bf16.mxu1 %v5340_v23 }
 0xa75   : > { %3124 = vmatpush2.bf16.msra.mxu1 %v5343_v25 }
 0xa76   : > { %3125 = vmatprep.subr.bf16.mxu1 %v5347_v32 }
 0xa79   : > { %3126 = vmatpush2.bf16.msra.mxu1 %v5349_v7 }
 0xa7a   : > { %3127 = vmatprep.subr.bf16.mxu1 %v5353_v58 }
 0xa7d   : > { %3128 = vmatpush2.bf16.msra.mxu1 %v5355_v49 }
 0xb00   : > { %v2882_v37 = vpop.f32.mrf.mxu1 }
 0xb02   : > { %v2884_v4 = vpop.f32.mrf.mxu1 }
 0xb04   : > { %v2886_v45 = vpop.f32.mrf.mxu1 }
 0xb05   : > { %v2901_v21 = vpack.c.bf16 %v2886_v45, %v2882_v37 }
 0xb06   : > { %v2888_v44 = vpop.f32.mrf.mxu1 }
 0xb07   : > { %v2902_v51 = vpack.c.bf16 %v2888_v44, %v2884_v4 }
 0xb08   : > { %v2892_v1 = vpop.f32.mrf.mxu1 }
 0xb09   : > { %3129 = vmatprep.mubr.bf16.mxu1 %v2902_v51 }
 0xb0a   : > { %v2894_v28 = vpop.f32.mrf.mxu1  ;;  %3130 = vmatmul.mubr.bf16.vlgmr.msra.gmra.mxu1 %v2901_v21 }
 0xb0c   : > { %v2896_v10 = vpop.f32.mrf.mxu1 }
 0xb0d   : > { %v2903_v5 = vpack.c.bf16 %v2896_v10, %v2892_v1 }
 0xb0e   : > { %v2898_v12 = vpop.f32.mrf.mxu1 }
 0xb0f   : > { %v2904_v15 = vpack.c.bf16 %v2898_v12, %v2894_v28 }
 0xb11   : > { %3139 = vmatprep.mubr.bf16.mxu1 %v2904_v15 }
 0xb12   : > { %3140 = vmatmul.mubr.bf16.gmra.mxu1 %v2903_v5 }
 0xbca   : > { %v3131_v56 = vpop.f32.mrf.mxu1 }
 0xbcc   : > { %v3133_v54 = vpop.f32.mrf.mxu1 }
 0xbcd   : > { %v3178_v20 = vsub.f32 %v3131_v56, %v3133_v54 }
 0xbce   : > { %v3135_v26 = vpop.f32.mrf.mxu1 }
 0xbcf   : > { %v3190_v27 = vand.u32 2147483647, %v3178_v20  ;;  %v3202_v30 = vmul.f32 0.5, %v3178_v20  ;;  %v3186_v31 = vsub.f32 %v5558_v3, %v3178_v20 }
 0xbd0   : > { %v3137_v34 = vpop.f32.mrf.mxu1 }
 0xbd1   : > { %v3206_v59 = vmul.f32 %v3202_v30, %v3178_v20  ;;  %v4102_v35 = vadd.f32 -0.5, %v3190_v27  ;;  %vm5360_vm10 = vcmp.lt.f32.partialorder %v3190_v27, 1.0  ;;  %v3179_v38 = vsub.f32 %v3135_v26, %v3137_v34 }
 0xbd2   : > { %v3141_v41 = vpop.f32.mrf.mxu1  ;;  %v3194_v47 = vand.u32 2147483647, %v3186_v31 }
 0xbd3   : > { %v3187_v37 = vsub.f32 %v5561_v22, %v3179_v38  ;;  %v3191_v4 = vand.u32 2147483647, %v3179_v38  ;;  %v3203_v45 = vmul.f32 0.5, %v3179_v38  ;;  %v3214_v51 = vsel %vm5360_vm10, %v3206_v59, %v4102_v35 }
 0xbd4   : > { %v3143_v44 = vpop.f32.mrf.mxu1  ;;  %v3218_v27 = vadd.f32 %v3214_v51, %v3194_v47 }
 0xbd5   : > { %v3180_v21 = vsub.f32 %v3141_v41, %v3143_v44  ;;  %v3195_v1 = vand.u32 2147483647, %v3187_v37  ;;  %vm3199_vm11 = vcmp.lt.f32.partialorder %v3191_v4, 1.0  ;;  %v3207_v28 = vmul.f32 %v3203_v45, %v3179_v38 }
 0xbd6   : > { %v4103_v10 = vadd.f32 -0.5, %v3191_v4  ;;  %v3145_v12 = vpop.f32.mrf.mxu1  ;;  %v4225_v37 = vpack.c.bf16 %v3137_v34, %v3133_v54 }
 0xbd7   : > { %v3188_v15 = vsub.f32 %v5562_v57, %v3180_v21  ;;  %v3192_v5 = vand.u32 2147483647, %v3180_v21  ;;  %v3204_v20 = vmul.f32 0.5, %v3180_v21  ;;  %v4226_v7 = vpack.c.bf16 %v3145_v12, %v3141_v41 }
 0xbd8   : > { %v3215_v30 = vsel %vm3199_vm11, %v3207_v28, %v4103_v10  ;;  %v3147_v31 = vpop.f32.mrf.mxu1 }
 0xbd9   : > { %v3219_v3 = vadd.f32 %v3215_v30, %v3195_v1  ;;  %v3196_v22 = vand.u32 2147483647, %v3188_v15  ;;  %vm3200_vm12 = vcmp.lt.f32.partialorder %v3192_v5, 1.0  ;;  %v3208_v49 = vmul.f32 %v3204_v20, %v3180_v21  ;;  %v5579_v20 = vld [vmem:[#allocation21_spill] sm:$0xff] }
 0xbda   : > { %v4104_v58 = vadd.f32 -0.5, %v3192_v5  ;;  %v3181_v36 = vsub.f32 %v3145_v12, %v3147_v31  ;;  %v4227_v59 = vpack.c.bf16 %v3147_v31, %v3143_v44  ;;  %v4224_v21 = vpack.c.bf16 %v3135_v26, %v3131_v56  ;;  %v4460_v44 = vld [vmem:[#allocation4] sm:$0xff]  }
 0xbdb   : > { %v3222_v35 = vadd.f32 %v3219_v3, %v3218_v27 }
 0xbdc   : > { %v3216_v38 = vsel %vm3200_vm12, %v3208_v49, %v4104_v58  ;;  %v3189_v4 = vsub.f32 %v4946_v9, %v3181_v36  ;;  %v3193_v45 = vand.u32 2147483647, %v3181_v36  ;;  %v3205_v57 = vmul.f32 0.5, %v3181_v36  ;;  %3282 = vmatprep.subr.bf16.mxu0 %v4227_v59 }
 0xbdd   : > { %v3220_v32 = vadd.f32 %v3216_v38, %v3196_v22  ;;  %3283 = vmatpush1.bf16.msra.mxu0 %v4226_v7 }
 0xbde   : > { %v3197_v47 = vand.u32 2147483647, %v3189_v4  ;;  %vm3201_vm13 = vcmp.lt.f32.partialorder %v3193_v45, 1.0  ;;  %v3209_v51 = vmul.f32 %v3205_v57, %v3181_v36  ;;  %v4105_v1 = vadd.f32 -0.5, %v3193_v45  ;;  %3284 = vmatprep.subr.bf16.mxu0 %v4225_v37  ;;  %v4461_v57 = vld [vmem:[#allocation4 + $0x8] sm:$0xff]  }
 0xbdf   : > { %v3223_v28 = vadd.f32 %v3222_v35, %v3220_v32  ;;  %v5574_v32 = vld [vmem:[#allocation19_spill] sm:$0xff] }
 0xbe0   : > { %v3217_v10 = vsel %vm3201_vm13, %v3209_v51, %v4105_v1 }
 0xbe1   : > { %v3221_v3 = vadd.f32 %v3217_v10, %v3197_v47  ;;  %3285 = vmatpush1.bf16.msra.mxu0 %v4224_v21 }
 0xbe2   : > { %3519 = vmatprep.subr.bf16.mxu0 %v5257_v33  ;;  %v5570_v33 = vld [vmem:[#allocation16_spill] sm:$0xff] }
 0xbe3   : > { %v3224_v58 = vadd.f32 %v3223_v28, %v3221_v3 }
 0xbe4   : > { %4112 = vmatmul.mubr.msk.bf16.vlgmr.msra.gmra.mxu0 %vm309_vm0, %v4460_v44 }
 0xbe5   : > { %3312 = vmatprep.mubr.bf16.mxu0 %v5523_v14  ;;  %3520 = vmatpush1.bf16.msra.mxu0 %v5259_v39  ;;  %v5374_v22 = vadd.f32 %v3224_v58, %v5270_v43  ;;  %v5569_v14 = vld [vmem:[#allocation15_spill] sm:$0xff]  ;;  %v5571_v39 = vld [vmem:[#allocation17_spill] sm:$0xff] }
 0xbe6   : > { %3521 = vmatprep.subr.bf16.mxu0 %v5262_v40  ;;  %v5572_v40 = vld [vmem:[#allocation18_spill] sm:$0xff] }
 0xbe9   : > { %3522 = vmatpush1.bf16.msra.mxu0 %v5267_v42 }
 0xbea   : > { %3523 = vmatprep.subr.bf16.mxu0 %v5273_v61 }
 0xbec   : > { %4113 = vmatmul.mubr.msk.bf16.gmra.mxu0 %vm309_vm0, %v4461_v57 }
 0xbed   : > { %3524 = vmatpush1.bf16.msra.mxu0 %v5276_v52 }
 0xbee   : > { %3525 = vmatprep.subr.bf16.mxu0 %v5279_v11 }
 0xbf1   : > { %3526 = vmatpush1.bf16.msra.mxu0 %v5283_v2 }
 0xbf2   : > { %3527 = vmatprep.subr.bf16.mxu0 %v5286_v29 }
 0xbf5   : > { %3528 = vmatpush1.bf16.msra.mxu0 %v5289_v62 }
 0xbf6   : > { %3529 = vmatprep.subr.bf16.mxu0 %v5292_v8 }
 0xbf9   : > { %3530 = vmatpush1.bf16.msra.mxu0 %v5295_v48 }
 0xbfa   : > { %3531 = vmatprep.subr.bf16.mxu0 %v5298_v19 }
 0xbfd   : > { %3532 = vmatpush1.bf16.msra.mxu0 %v5301_v6 }
 0xbfe   : > { %3533 = vmatprep.subr.bf16.mxu0 %v5304_v53 }
 0xc01   : > { %3534 = vmatpush1.bf16.msra.mxu0 %v5307_v55 }
 0xc02   : > { %3535 = vmatprep.subr.bf16.mxu0 %v5310_v50 }
 0xc05   : > { %3536 = vmatpush2.bf16.msra.mxu0 %v5313_v24 }
 0xc06   : > { %3537 = vmatprep.subr.bf16.mxu0 %v5316_v46 }
 0xc09   : > { %3538 = vmatpush2.bf16.msra.mxu0 %v5319_v60 }
 0xc0a   : > { %3539 = vmatprep.subr.bf16.mxu0 %v5322_v0 }
 0xc0d   : > { %3540 = vmatpush2.bf16.msra.mxu0 %v5325_v63 }
 0xc0e   : > { %3541 = vmatprep.subr.bf16.mxu0 %v5328_v13 }
 0xc11   : > { %3542 = vmatpush2.bf16.msra.mxu0 %v5331_v16  ;;  %v5573_v16 = vld [vmem:[#allocation20_spill] sm:$0xff] }
 0xc12   : > { %3543 = vmatprep.subr.bf16.mxu0 %v5334_v17 }
 0xc15   : > { %3544 = vmatpush2.bf16.msra.mxu0 %v5337_v18 }
 0xc16   : > { %3545 = vmatprep.subr.bf16.mxu0 %v5340_v23 }
 0xc19   : > { %3546 = vmatpush2.bf16.msra.mxu0 %v5343_v25 }
 0xc1a   : > { %3547 = vmatprep.subr.bf16.mxu0 %v5569_v14 }
 0xc1d   : > { %3548 = vmatpush2.bf16.msra.mxu0 %v5570_v33 }
 0xc1e   : > { %3549 = vmatprep.subr.bf16.mxu0 %v5571_v39 }
 0xc21   : > { %3550 = vmatpush2.bf16.msra.mxu0 %v5572_v40 }
 0xca4   : > { %v3304_v42 = vpop.f32.mrf.mxu0 }
 0xca6   : > { %v3306_v43 = vpop.f32.mrf.mxu0 }
 0xca8   : > { %v3308_v61 = vpop.f32.mrf.mxu0 }
 0xca9   : > { %v3323_v2 = vpack.c.bf16 %v3308_v61, %v3304_v42 }
 0xcaa   : > { %v3310_v52 = vpop.f32.mrf.mxu0 }
 0xcab   : > { %v3324_v11 = vpack.c.bf16 %v3310_v52, %v3306_v43 }
 0xcac   : > { %v3314_v29 = vpop.f32.mrf.mxu0 }
 0xcad   : > { %3551 = vmatprep.mubr.bf16.mxu0 %v3324_v11 }
 0xcae   : > { %v3316_v62 = vpop.f32.mrf.mxu0  ;;  %3552 = vmatmul.mubr.bf16.vlgmr.msra.gmra.mxu0 %v3323_v2 }
 0xcb0   : > { %v3318_v8 = vpop.f32.mrf.mxu0 }
 0xcb1   : > { %v3325_v6 = vpack.c.bf16 %v3318_v8, %v3314_v29 }
 0xcb2   : > { %v3320_v48 = vpop.f32.mrf.mxu0 }
 0xcb3   : > { %v3326_v19 = vpack.c.bf16 %v3320_v48, %v3316_v62 }
 0xcb5   : > { %3561 = vmatprep.mubr.bf16.mxu0 %v3326_v19 }
 0xcb6   : > { %3562 = vmatmul.mubr.bf16.gmra.mxu0 %v3325_v6 }
 0xd6e   : > { %v3553_v53 = vpop.f32.mrf.mxu0 }
 0xd70   : > { %v3555_v55 = vpop.f32.mrf.mxu0 }
 0xd71   : > { %v3600_v50 = vsub.f32 %v3553_v53, %v3555_v55 }
 0xd72   : > { %v3557_v24 = vpop.f32.mrf.mxu0 }
 0xd73   : > { %v3612_v60 = vand.u32 2147483647, %v3600_v50  ;;  %v3624_v0 = vmul.f32 0.5, %v3600_v50  ;;  %v3608_v7 = vsub.f32 %v5574_v32, %v3600_v50 }
 0xd74   : > { %v3559_v46 = vpop.f32.mrf.mxu0 }
 0xd75   : > { %v3601_v63 = vsub.f32 %v3557_v24, %v3559_v46  ;;  %vm5409_vm0 = vcmp.lt.f32.partialorder %v3612_v60, 1.0  ;;  %v3628_v56 = vmul.f32 %v3624_v0, %v3600_v50  ;;  %v4150_v26 = vadd.f32 -0.5, %v3612_v60 }
 0xd76   : > { %v3563_v13 = vpop.f32.mrf.mxu0  ;;  %v3616_v35 = vand.u32 2147483647, %v3608_v7 }
 0xd77   : > { %v3609_v17 = vsub.f32 %v5573_v16, %v3601_v63  ;;  %v3613_v18 = vand.u32 2147483647, %v3601_v63  ;;  %v3625_v23 = vmul.f32 0.5, %v3601_v63  ;;  %v3636_v4 = vsel %vm5409_vm0, %v3628_v56, %v4150_v26 }
 0xd78   : > { %v3565_v25 = vpop.f32.mrf.mxu0  ;;  %v3640_v44 = vadd.f32 %v3636_v4, %v3616_v35 }
 0xd79   : > { %v3602_v54 = vsub.f32 %v3563_v13, %v3565_v25  ;;  %vm5413_vm14 = vcmp.lt.f32.partialorder %v3613_v18, 1.0  ;;  %v3629_v41 = vmul.f32 %v3625_v23, %v3601_v63  ;;  %v4151_v12 = vadd.f32 -0.5, %v3613_v18 }
 0xd7a   : > { %v3567_v15 = vpop.f32.mrf.mxu0  ;;  %v3617_v5 = vand.u32 2147483647, %v3609_v17 }
 0xd7b   : > { %v3610_v27 = vsub.f32 %v5579_v20, %v3602_v54  ;;  %v3614_v30 = vand.u32 2147483647, %v3602_v54  ;;  %v3626_v31 = vmul.f32 0.5, %v3602_v54  ;;  %v3637_v36 = vsel %vm5413_vm14, %v3629_v41, %v4151_v12 }
 0xd7c   : > { %v3569_v59 = vpop.f32.mrf.mxu0  ;;  %v3641_v51 = vadd.f32 %v3637_v36, %v3617_v5 }
 0xd7d   : > { %v3618_v37 = vand.u32 2147483647, %v3610_v27  ;;  %vm3622_vm15 = vcmp.lt.f32.partialorder %v3614_v30, 1.0  ;;  %v3630_v38 = vmul.f32 %v3626_v31, %v3602_v54  ;;  %v4152_v45 = vadd.f32 -0.5, %v3614_v30 }
 0xd7e   : > { %v3603_v47 = vsub.f32 %v3567_v15, %v3569_v59  ;;  %v3644_v33 = vadd.f32 %v3641_v51, %v3640_v44 }
 0xd7f   : > { %v3638_v1 = vsel %vm3622_vm15, %v3630_v38, %v4152_v45 }
 0xd80   : > { %v3611_v21 = vsub.f32 %v4946_v9, %v3603_v47  ;;  %v3615_v28 = vand.u32 2147483647, %v3603_v47  ;;  %v3627_v10 = vmul.f32 0.5, %v3603_v47  ;;  %v3642_v3 = vadd.f32 %v3638_v1, %v3618_v37 }
 0xd82   : > { %v3619_v58 = vand.u32 2147483647, %v3611_v21  ;;  %vm3623_vm1 = vcmp.lt.f32.partialorder %v3615_v28, 1.0  ;;  %v3631_v57 = vmul.f32 %v3627_v10, %v3603_v47  ;;  %v4153_v14 = vadd.f32 -0.5, %v3615_v28 }
 0xd83   : > { %v3645_v40 = vadd.f32 %v3644_v33, %v3642_v3 }
 0xd84   : > { %v3639_v39 = vsel %vm3623_vm1, %v3631_v57, %v4153_v14 }
 0xd85   : > { %v3643_v42 = vadd.f32 %v3639_v39, %v3619_v58 }
 0xd87   : > { %v3646_v43 = vadd.f32 %v3645_v40, %v3643_v42 }
 0xd89   : > { %v3647_v9 = vadd.f32 %v3646_v43, %v5374_v22 }
 0xd8b   : > { %3648 = vst [vmem:[%s216_s29] sm:$0xff] %v3647_v9 }
 0xd8c   : > { %4555 = shalt.err (!%p4552_p0)
}
 0xd8d   : > { %s4556_s5 = scalar_lea.hbm %s3661_s22, 128  ;;  %s4560_s10 = scalar_lea.hbm %s5463_s3, 256 }
 0xd8e   : > { %p4557_p2 = scmp.ne.s32.totalorder %s3661_s22, %s4556_s5  ;;  %p4561_p6 = scmp.lt.s32.totalorder %s3661_s22, %s5463_s3 }
 0xd8f   : > { %p4562_p13 = scmp.lt.s32.totalorder %s4560_s10, %s4556_s5 }
 0xd90   : > { %p4558_p3 = pnand %p4557_p2, %p5580_p11 }
 0xd91   : > { %p4563_p8 = por %p4562_p13, %p4561_p6 }
 0xd92   : > { %p4559_p7 = pneg %p4558_p3 }
 0xd94   : > { %p4564_p4 = pnand %p4563_p8, %p4559_p7 }
 0xd96   : > { %4567 = shalt.err (!%p4564_p4)
}
 0xd97   : > { %4238 = dma.vmem_to_hbm [thread:$0]  (%p5580_p11), %s3664_s4, 128, %s3661_s22, %s3650_s27  }
 0xd98 PF: > { %s3675_s8 = sand.u32 1, %s4602_s12   ;;  %p5581_p12 = scmp.ne.s32.totalorder %s5503_s25, 0 }
 0xd99   : > { %p5582_p9 = scmp.ge.s32.totalorder %s4614_s15, 2  ;;  %s3676_s9 = scalar_lea.sflag [#allocation6], %s3675_s8 }
 0xd9b   : > { %p4252_p10 = pnand %p5582_p9, %p5581_p12 }
 0xd9d   : > { %p4253_p1 = pneg %p4252_p10 }
 0xd9f   : > { %4597 = dma.done.wait (%p4253_p1), %s3676_s9, 128  }
 0xda0   : > { %4599 = vsyncadd (%p4253_p1), %s3676_s9, 4294967168  ;;  %p15_p5 = scmp.ge.s32.totalorder %s4672_s18, 4   ;;  %s5583_s12 = smov %s4606_s13 }
 0xda1   : > { %s5584_s13 = smov %s4610_s14  ;;  %s5585_s14 = smov %s4684_s21 }
 0xda2   : > { %s5586_s15 = smov %s4672_s18  ;;  %17 = sbr.rel (!%p15_p5) target bundleno = 7 (0x7), region = 84 }
 0xda7   :  { %3681 = vsyncpa [#allocation5], 1 }
 0xda8   :  { %3683 = vsyncpa [#allocation5 + $0x1], 1 }
 0xda9   :  { %3684 = vsyncpa [#allocation8], 1 }
 0xdaa   :  { %3685 = vsyncpa [#allocation6], 1 }
 0xdab   :  { %3687 = vsyncpa [#allocation6 + $0x1], 1 }

// kernel: tpu_custom_call.1
= control target key start
LH: loop header
LB: loop body
LE: loop exit
PB: predicated region body
PF: predicated region fallthrough
CT: control target
= control target key end

     0   :  { %s5460_s0 = inlined_call_operand.hbm [shape: bf16[32,32], index: 0, kind: input, shape index: {}]   ;;  %s5461_s1 = inlined_call_operand.hbm [shape: bf16[256,256], index: 1, kind: input, shape index: {}]   ;;  %s5462_s2 = inlined_call_operand.hbm [shape: f32[64,256], index: 2, kind: input, shape index: {}]   ;;  %s5463_s3 = inlined_call_operand.hbm [shape: f32[2,8,128], index: 3, kind: output, shape index: {}]  }
   0x1   :  { %5499 = sst [smem:[#allocation22_spill]] %s5460_s0 }
   0x2   :  { %8 = vsyncpa [#allocation5], 0 }
   0x3   :  { %9 = vsyncpa [#allocation8], 0 }
   0x4   :  { %10 = vsyncpa [#allocation6], 0 }
   0x5   :  { %12 = vsyncpa [#allocation6 + $0x1], 0  ;;  %s4647_s12 = smov 0   ;;  %s4649_s13 = smov 0  }
   0x6   :  { %s4651_s14 = smov 0   ;;  %s4653_s15 = smov 0  }
   0x7 LB: > { %s4668_s16 = sadd.s32 4294967295, %s4614_s15   ;;  %s3752_s17 = sadd.s32 4294967294, %s4614_s15   ;;  %s4614_s15 = sphi %s4653_s15, %s5586_s15   ;;  %s4610_s14 = sphi %s4651_s14, %s5585_s14   ;;  %s4606_s13 = sphi %s4649_s13, %s5584_s13   ;;  %s4602_s12 = sphi %s4647_s12, %s5583_s12  }
   0x8   : > { %s4672_s18 = sadd.s32 1, %s4614_s15   ;;  %s67_s19 = sadd.s32 1, %s4610_s14 }
   0x9   : > { %s64_s20 = ssub.s32 %s4614_s15, %s4672_s18  ;;  %p74_p0 = scmp.ne.s32.totalorder %s4610_s14, %s4606_s13 }
   0xa   : > { %p65_p1 = scmp.eq.s32.totalorder %s64_s20, 0  ;;  %p75_p2 = scmp.eq.s32.totalorder %s4614_s15, 0 }
   0xb   : > { %p80_p3 = scmp.ne.s32.totalorder %s4606_s13, %s4602_s12  ;;  %p5465_p4 = scmp.eq.s32.totalorder %s4668_s16, 0 }
   0xc   : > { %s4684_s21 = scalar_select %p65_p1, %s4610_s14, %s67_s19  }
   0xd   : > { %p4686_p5 = por %p75_p2, %p74_p0  ;;  %p4692_p6 = por %p5465_p4, %p80_p3 }
   0xe   : > { %p104_p7 = scmp.eq.s32.totalorder %s4668_s16, 1  ;;  %p110_p8 = scmp.eq.s32.totalorder %s3752_s17, 1 }
   0xf   : > { %s5501_s23 = scalar_select %p4692_p6, 1, 0 }
  0x10   : > { %p3753_p9 = scmp.ge.s32.totalorder %s4614_s15, 1  ;;  %p117_p10 = scmp.lt.s32.totalorder %s4614_s15, 3 }
  0x11   : > { %p4699_p11 = por %p104_p7, %p74_p0  ;;  %p4703_p12 = por %p110_p8, %p80_p3 }
  0x12   : > { %p4707_p13 = pnand %p3753_p9, %p117_p10  ;;  %s4616_s27 = smov [#allocation4]  }
  0x13   : > { %s5502_s24 = scalar_select %p4699_p11, 1, 0 }
  0x14   : > { %s5503_s25 = scalar_select %p4703_p12, 1, 0 }
  0x15   : > { %s5504_s26 = scalar_select %p4707_p13, 1, 0 }
  0x16   : > { %p4240_p1 = pneg %p4707_p13  ;;  %s129_s28 = sshll.u32 %s4616_s27, 4  ;;  %s130_s28 = int_to_ptr.vmem [resolvable:$true] %s129_s28 }
  0x17   : > { %p4257_p3 = scmp.lt.s32.totalorder %s4614_s15, 2  ;;  %s4617_s30 = smov [#allocation7]  }
  0x18   : > { %p4715_p2 = pnand %p4240_p1, %p5465_p4  ;;  %s142_s4 = sshll.u32 %s4617_s30, 4  ;;  %s143_s4 = int_to_ptr.vmem [resolvable:$true] %s142_s4 }
  0x19   : > { %s4473_s5 = scalar_lea.vmem %s130_s28, 256  ;;  %p4481_p12 = scmp.lt.s32.totalorder %s130_s28, %s130_s28 }
  0x1a   : > { %p4464_p7 = pneg %p4715_p2  ;;  %p4474_p8 = scmp.ne.s32.totalorder %s130_s28, %s4473_s5 }
  0x1b   : > { %p4482_p11 = scmp.lt.s32.totalorder %s4473_s5, %s4473_s5 }
  0x1c   : > { %p4476_p9 = pnand %p4474_p8, %p4464_p7 }
  0x1d   : > { %p4483_p1 = por %p4482_p11, %p4481_p12 }
  0x1e   : > { %p4477_p10 = pneg %p4476_p9 }
  0x20   : > { %p4484_p4 = pnand %p4483_p1, %p4477_p10 }
  0x22   : > { %4487 = shalt.err (!%p4484_p4)
}
  0x23   : > { %s4618_s6 = smov 64   ;;  %s4619_s7 = smov 4  }
  0x24   : > { %s5506_s0 = sld [smem:[#allocation22_spill]]  ;;  %p4735_p8 = pnand %p4257_p3, %p4686_p5 }
  0x25   : > { %s156_s11 = sand.u32 1, %s4614_s15   ;;  %s4499_s17 = scalar_lea.vmem %s143_s4, 4096 }
  0x26   : > { %p4500_p4 = scmp.ne.s32.totalorder %s143_s4, %s4499_s17  ;;  %p4507_p9 = scmp.lt.s32.totalorder %s143_s4, %s143_s4 }
  0x27   : > { %p4508_p10 = scmp.lt.s32.totalorder %s4499_s17, %s4499_s17 }
  0x28   : > { %p4502_p11 = pnand %p4500_p4, %p4464_p7 }
  0x29   : > { %p4509_p1 = por %p4508_p10, %p4507_p9 }
  0x2a   : > { %4243 = dma.hbm_to_vmem [thread:$0]  (!%p4715_p2), %s5506_s0, 256, %s130_s28, [#allocation5], %s4618_s6, %s4618_s6, %s4619_s7  }
  0x2b   : > { %p4503_p12 = pneg %p4502_p11 }
  0x2d   : > { %p4510_p0 = pnand %p4509_p1, %p4503_p12 }
  0x2f   : > { %4513 = shalt.err (!%p4510_p0)
}
  0x30   : > { %s4620_s19 = smov 128   ;;  %s4621_s20 = smov 8  }
  0x31   : > { %4246 = dma.hbm_to_vmem [thread:$0]  (!%p4715_p2), %s5461_s1, 4096, %s143_s4, [#allocation8], %s4620_s19, %s4620_s19, %s4621_s20  }
  0x32   : > { %s158_s28 = sand.u32 1, %s4610_s14   ;;  %s4159_s5 = sshll.u32 %s4614_s15, 10 }
  0x33   : > { %s3757_s30 = sshll.u32 %s158_s28, 6  ;;  %s4753_s8 = scalar_lea.hbm %s5462_s2, %s4159_s5 }
  0x34   : > { %s160_s9 = scalar_lea.vmem [#allocation9], %s3757_s30  ;;  %s4757_s29 = scalar_lea.sflag [#allocation5], %s156_s11 }
  0x35   : > { %s168_s17 = sshll.u32 %s160_s9, 4  ;;  %s4514_s0 = scalar_lea.hbm %s4753_s8, 1024  ;;  %s4755_s17 = int_to_ptr.vmem [resolvable:$true] %s168_s17 }
  0x36   : > { %p4515_p5 = scmp.ne.s32.totalorder %s4753_s8, %s4514_s0  ;;  %p4516_p2 = pneg %p4735_p8 }
  0x37   : > { %s4519_s20 = scalar_lea.hbm %s5462_s2, 2048  ;;  %p4520_p7 = scmp.lt.s32.totalorder %s4753_s8, %s5462_s2 }
  0x38   : > { %p4517_p0 = pnand %p4516_p2, %p4515_p5  ;;  %p4521_p4 = scmp.lt.s32.totalorder %s4519_s20, %s4514_s0 }
  0x3a   : > { %p4518_p3 = pneg %p4517_p0  ;;  %p4522_p11 = por %p4521_p4, %p4520_p7 }
  0x3c   : > { %p4523_p12 = pnand %p4522_p11, %p4518_p3 }
  0x3e   : > { %4526 = shalt.err (!%p4523_p12)
}
  0x3f   : > { %s4527_s11 = scalar_lea.vmem %s4755_s17, 1024  ;;  %s4622_s28 = smov [#allocation9]  }
  0x40   : > { %p4528_p9 = scmp.ne.s32.totalorder %s4755_s17, %s4527_s11  ;;  %s4532_s30 = sshll.u32 %s4622_s28, 4  ;;  %s4533_s30 = int_to_ptr.vmem [resolvable:$false] %s4532_s30 }
  0x41   : > { %s4534_s5 = scalar_lea.vmem %s4533_s30, 2048  ;;  %p4535_p5 = scmp.lt.s32.totalorder %s4755_s17, %s4533_s30 }
  0x42   : > { %p4530_p10 = pnand %p4528_p9, %p4516_p2  ;;  %p4536_p0 = scmp.lt.s32.totalorder %s4534_s5, %s4527_s11 }
  0x44   : > { %p4531_p1 = pneg %p4530_p10  ;;  %p4537_p6 = por %p4536_p0, %p4535_p5 }
  0x46   : > { %p4538_p13 = pnand %p4537_p6, %p4531_p1 }
  0x48   : > { %4541 = shalt.err (!%p4538_p13)
}
  0x49   : > { %s4623_s0 = smov 256   ;;  %s4624_s6 = smov 16  }
  0x4a   : > { %4250 = dma.hbm_to_vmem [thread:$0]  (!%p4735_p8), %s4753_s8, 1024, %s4755_s17, %s4757_s29, %s4623_s0, %s4623_s0, %s4624_s6  }
  0x4b   : > { %p5508_p2 = scmp.ne.s32.totalorder %s5504_s26, 0 }
  0x4d   : > { %180 = sbr.rel (%p5508_p2) target bundleno = 3480 (0xd98), region = 32 }
  0x52   : > { %p5509_p3 = scmp.eq.s32.totalorder %s4668_s16, 0 }
  0x54   : > { %4585 = dma.done.wait (%p5509_p3), [#allocation5], 256   ;;  %p5510_p7 = pmov %p5509_p3 }
  0x55   : > { %p5511_p6 = pmov %p5509_p3 }
  0x56   : > { %4587 = vsyncadd (%p5510_p7), [#allocation5], 4294967040 }
  0x57   : > { %4589 = dma.done.wait (%p5511_p6), [#allocation8], 4096   ;;  %p5512_p13 = pmov %p5509_p3 }
  0x58   : > { %s190_s10 = sand.u32 1, %s4668_s16   ;;  %s4790_s7 = sand.u32 1, %s4606_s13  }
  0x59   : > { %4591 = vsyncadd (%p5512_p13), [#allocation8], 4294963200  ;;  %s3764_s26 = sshll.u32 %s4790_s7, 6  ;;  %s191_s8 = scalar_lea.sflag [#allocation5], %s190_s10 }
  0x5a   : > { %s194_s9 = scalar_lea.vmem [#allocation9], %s3764_s26  ;;  %p5513_p8 = scmp.ne.s32.totalorder %s5501_s23, 0 }
  0x5c   : > { %4593 = dma.done.wait (%p5513_p8), %s191_s8, 1024  }
  0x5d   : > { %4595 = vsyncadd (%p5513_p8), %s191_s8, 4294966272  ;;  %v5468_v0 = vmov 0   ;;  %v4799_v1 = vld [vmem:[%s194_s9 + $0x28] sm:$0xff]  ;;  %v4801_v2 = vld [vmem:[%s194_s9 + $0x38] sm:$0xff]  ;;  %vm309_vm0 = vcmask 261120   ;;  %s3765_s23 = sshll.u32 %s4790_s7, 3 }
  0x5e   : > { %348 = vmatprep.mubr.bf16.mxu1 %v5468_v0  ;;  %770 = vmatprep.mubr.bf16.mxu0 %v5468_v0  ;;  %v4803_v3 = vld [vmem:[%s194_s9 + $0x20] sm:$0xff]  ;;  %v4199_v4 = vpack.c.bf16 %v4801_v2, %v4799_v1  ;;  %v4807_v5 = vld [vmem:[%s194_s9 + $0x30] sm:$0xff]  ;;  %v4809_v6 = vld [vmem:[%s194_s9 + $0x8] sm:$0xff]  ;;  %s4155_s17 = sshll.u32 %s4668_s16, 7  ;;  %s216_s29 = scalar_lea.vmem [#allocation10], %s3765_s23 }
  0x5f   : > { %v4811_v7 = vld [vmem:[%s194_s9 + $0x18] sm:$0xff]  ;;  %v4198_v8 = vpack.c.bf16 %v4807_v5, %v4803_v3  ;;  %v4817_v10 = vld [vmem:[%s194_s9] sm:$0xff]  ;;  %v4819_v11 = vld [vmem:[%s194_s9 + $0x10] sm:$0xff]  ;;  %s3663_s4 = sshll.u32 %s216_s29, 4  ;;  %s3661_s22 = scalar_lea.hbm %s5463_s3, %s4155_s17  ;;  %s3664_s4 = int_to_ptr.vmem [resolvable:$true] %s3663_s4 }
  0x60   : > { %v4197_v9 = vpack.c.bf16 %v4811_v7, %v4809_v6  ;;  %328 = vmatprep.subr.bf16.mxu1 %v4199_v4  ;;  %v4196_v12 = vpack.c.bf16 %v4819_v11, %v4817_v10  ;;  %v4823_v13 = vld [vmem:[#allocation7 + $0x74] ss:$8 sps:$4 sm:$0xff]   ;;  %v4825_v15 = vld [vmem:[#allocation7 + $0x70] ss:$8 sps:$4 sm:$0xff]   ;;  %v4828_v16 = vld [vmem:[#allocation7 + $0x64] ss:$8 sps:$4 sm:$0xff]   ;;  %v4925_v60 = vsub.f32 %v4817_v10, %v4809_v6 }
  0x61   : > { %329 = vmatpush1.bf16.msra.mxu1 %v4198_v8  ;;  %v4302_v14 = vld [vmem:[#allocation4] sm:$0xff]   ;;  %v4833_v17 = vld [vmem:[#allocation7 + $0x60] ss:$8 sps:$4 sm:$0xff]   ;;  %v4303_v19 = vld [vmem:[#allocation4 + $0x8] sm:$0xff]   ;;  %s3650_s27 = scalar_lea.sflag [#allocation6], %s4790_s7  ;;  %s4542_s11 = scalar_lea.vmem %s3664_s4, 128 }
  0x62   : > { %330 = vmatprep.subr.bf16.mxu1 %v4197_v9  ;;  %v4836_v18 = vld [vmem:[#allocation7 + $0x54] ss:$8 sps:$4 sm:$0xff]   ;;  %v4839_v20 = vld [vmem:[#allocation7 + $0x50] ss:$8 sps:$4 sm:$0xff]   ;;  %v4842_v21 = vld [vmem:[#allocation7 + $0x44] ss:$8 sps:$4 sm:$0xff]   ;;  %p4543_p4 = scmp.ne.s32.totalorder %s3664_s4, %s4542_s11 }
  0x63   : > { %v4846_v22 = vld [vmem:[#allocation7 + $0x40] ss:$8 sps:$4 sm:$0xff]   ;;  %v4849_v23 = vld [vmem:[#allocation7 + $0x34] ss:$8 sps:$4 sm:$0xff]   ;;  %v4851_v24 = vld [vmem:[#allocation7 + $0x30] ss:$8 sps:$4 sm:$0xff]  }
  0x64   : > { %v4853_v25 = vld [vmem:[#allocation7 + $0x24] ss:$8 sps:$4 sm:$0xff]   ;;  %v4857_v26 = vld [vmem:[#allocation7 + $0x20] ss:$8 sps:$4 sm:$0xff]   ;;  %v4859_v27 = vld [vmem:[#allocation7 + $0x14] ss:$8 sps:$4 sm:$0xff]  }
  0x65   : > { %331 = vmatpush1.bf16.msra.mxu1 %v4196_v12  ;;  %v4863_v28 = vld [vmem:[#allocation7 + $0x10] ss:$8 sps:$4 sm:$0xff]   ;;  %v4865_v29 = vld [vmem:[#allocation7 + $0x4] ss:$8 sps:$4 sm:$0xff]   ;;  %v4869_v30 = vld [vmem:[#allocation7] ss:$8 sps:$4 sm:$0xff]   ;;  %v4930_v12 = vsub.f32 %v4819_v11, %v4811_v7 }
  0x66   : > { %565 = vmatprep.subr.bf16.mxu1 %v4823_v13  ;;  %v4871_v31 = vld [vmem:[#allocation7 + $0xf4] ss:$8 sps:$4 sm:$0xff]   ;;  %v4875_v32 = vld [vmem:[#allocation7 + $0xf0] ss:$8 sps:$4 sm:$0xff]   ;;  %v4877_v33 = vld [vmem:[#allocation7 + $0xe4] ss:$8 sps:$4 sm:$0xff]  }
  0x67   : > { %v4881_v34 = vld [vmem:[#allocation7 + $0xe0] ss:$8 sps:$4 sm:$0xff]   ;;  %v4883_v35 = vld [vmem:[#allocation7 + $0xd4] ss:$8 sps:$4 sm:$0xff]   ;;  %v4887_v36 = vld [vmem:[#allocation7 + $0xd0] ss:$8 sps:$4 sm:$0xff]  }
  0x68   : > { %3776 = vmatmul.mubr.msk.bf16.vlgmr.msra.gmra.mxu1 %vm309_vm0, %v4302_v14  ;;  %v4889_v37 = vld [vmem:[#allocation7 + $0xc4] ss:$8 sps:$4 sm:$0xff]   ;;  %v4893_v38 = vld [vmem:[#allocation7 + $0xc0] ss:$8 sps:$4 sm:$0xff]   ;;  %v4895_v39 = vld [vmem:[#allocation7 + $0xb4] ss:$8 sps:$4 sm:$0xff]  }
  0x69   : > { %358 = vmatprep.mubr.bf16.mxu1 %v5468_v0  ;;  %566 = vmatpush1.bf16.msra.mxu1 %v4825_v15  ;;  %v4900_v40 = vld [vmem:[#allocation7 + $0xb0] ss:$8 sps:$4 sm:$0xff]   ;;  %v4903_v41 = vld [vmem:[#allocation7 + $0xa4] ss:$8 sps:$4 sm:$0xff]   ;;  %v4906_v42 = vld [vmem:[#allocation7 + $0xa0] ss:$8 sps:$4 sm:$0xff]  }
  0x6a   : > { %567 = vmatprep.subr.bf16.mxu1 %v4828_v16  ;;  %v4910_v43 = vld [vmem:[#allocation7 + $0x94] ss:$8 sps:$4 sm:$0xff]   ;;  %v4912_v44 = vld [vmem:[#allocation7 + $0x90] ss:$8 sps:$4 sm:$0xff]   ;;  %v4916_v45 = vld [vmem:[#allocation7 + $0x84] ss:$8 sps:$4 sm:$0xff]  }
  0x6b   : > { %5514 = vst [vmem:[#allocation15_spill] sm:$0xff] %v4910_v43  ;;  %5515 = vst [vmem:[#allocation16_spill] sm:$0xff] %v4912_v44  ;;  %v4918_v46 = vld [vmem:[#allocation7 + $0x80] ss:$8 sps:$4 sm:$0xff]   ;;  %p5580_p11 = scmp.ne.s32.totalorder %s5502_s24, 0  ;;  %s4626_s28 = smov [#allocation10]  }
  0x6c   : > { %5516 = vst [vmem:[#allocation17_spill] sm:$0xff] %v4916_v45  ;;  %5517 = vst [vmem:[#allocation18_spill] sm:$0xff] %v4918_v46  ;;  %s4546_s30 = sshll.u32 %s4626_s28, 4  ;;  %s4547_s30 = int_to_ptr.vmem [resolvable:$false] %s4546_s30 }
  0x6d   : > { %568 = vmatpush1.bf16.msra.mxu1 %v4833_v17  ;;  %5518 = vst [vmem:[#allocation19_spill] sm:$0xff] %v4925_v60  ;;  %5519 = vst [vmem:[#allocation20_spill] sm:$0xff] %v4930_v12  ;;  %p4544_p12 = pnand %p4543_p4, %p5580_p11  ;;  %s4548_s16 = scalar_lea.vmem %s4547_s30, 256 }
  0x6e   : > { %569 = vmatprep.subr.bf16.mxu1 %v4836_v18  ;;  %p4549_p10 = scmp.lt.s32.totalorder %s3664_s4, %s4547_s30  ;;  %p4550_p1 = scmp.lt.s32.totalorder %s4548_s16, %s4542_s11 }
  0x6f   : > { %p4545_p9 = pneg %p4544_p12 }
  0x70   : > { %3777 = vmatmul.mubr.msk.bf16.gmra.mxu1 %vm309_vm0, %v4303_v19  ;;  %p4551_p5 = por %p4550_p1, %p4549_p10 }
  0x71   : > { %570 = vmatpush1.bf16.msra.mxu1 %v4839_v20 }
  0x72   : > { %571 = vmatprep.subr.bf16.mxu1 %v4842_v21  ;;  %p4552_p0 = pnand %p4551_p5, %p4545_p9 }
  0x75   : > { %572 = vmatpush1.bf16.msra.mxu1 %v4846_v22 }
  0x76   : > { %573 = vmatprep.subr.bf16.mxu1 %v4849_v23 }
  0x79   : > { %574 = vmatpush1.bf16.msra.mxu1 %v4851_v24 }
  0x7a   : > { %575 = vmatprep.subr.bf16.mxu1 %v4853_v25 }
  0x7d   : > { %576 = vmatpush1.bf16.msra.mxu1 %v4857_v26 }
  0x7e   : > { %577 = vmatprep.subr.bf16.mxu1 %v4859_v27 }
  0x81   : > { %578 = vmatpush1.bf16.msra.mxu1 %v4863_v28 }
  0x82   : > { %579 = vmatprep.subr.bf16.mxu1 %v4865_v29 }
  0x85   : > { %580 = vmatpush1.bf16.msra.mxu1 %v4869_v30 }
  0x86   : > { %581 = vmatprep.subr.bf16.mxu1 %v4871_v31 }
  0x89   : > { %582 = vmatpush2.bf16.msra.mxu1 %v4875_v32 }
  0x8a   : > { %583 = vmatprep.subr.bf16.mxu1 %v4877_v33 }
  0x8d   : > { %584 = vmatpush2.bf16.msra.mxu1 %v4881_v34 }
  0x8e   : > { %585 = vmatprep.subr.bf16.mxu1 %v4883_v35 }
  0x91   : > { %586 = vmatpush2.bf16.msra.mxu1 %v4887_v36 }
  0x92   : > { %587 = vmatprep.subr.bf16.mxu1 %v4889_v37 }
  0x95   : > { %588 = vmatpush2.bf16.msra.mxu1 %v4893_v38 }
  0x96   : > { %589 = vmatprep.subr.bf16.mxu1 %v4895_v39 }
  0x99   : > { %590 = vmatpush2.bf16.msra.mxu1 %v4900_v40 }
  0x9a   : > { %591 = vmatprep.subr.bf16.mxu1 %v4903_v41 }
  0x9d   : > { %592 = vmatpush2.bf16.msra.mxu1 %v4906_v42 }
  0x9e   : > { %593 = vmatprep.subr.bf16.mxu1 %v4910_v43 }
  0xa1   : > { %594 = vmatpush2.bf16.msra.mxu1 %v4912_v44 }
  0xa2   : > { %595 = vmatprep.subr.bf16.mxu1 %v4916_v45 }
  0xa5   : > { %596 = vmatpush2.bf16.msra.mxu1 %v4918_v46 }
 0x128   : > { %v350_v47 = vpop.f32.mrf.mxu1 }
 0x12a   : > { %v352_v48 = vpop.f32.mrf.mxu1 }
 0x12c   : > { %v354_v49 = vpop.f32.mrf.mxu1 }
 0x12d   : > { %v369_v52 = vpack.c.bf16 %v354_v49, %v350_v47  ;;  %v4938_v49 = vsub.f32 %v4803_v3, %v4799_v1 }
 0x12e   : > { %v356_v50 = vpop.f32.mrf.mxu1 }
 0x12f   : > { %v370_v51 = vpack.c.bf16 %v356_v50, %v352_v48  ;;  %5522 = vst [vmem:[#allocation21_spill] sm:$0xff] %v4938_v49 }
 0x130   : > { %v360_v53 = vpop.f32.mrf.mxu1 }
 0x131   : > { %597 = vmatprep.mubr.bf16.mxu1 %v370_v51 }
 0x132   : > { %v362_v54 = vpop.f32.mrf.mxu1  ;;  %598 = vmatmul.mubr.bf16.vlgmr.msra.gmra.mxu1 %v369_v52 }
 0x134   : > { %v364_v55 = vpop.f32.mrf.mxu1 }
 0x135   : > { %v371_v58 = vpack.c.bf16 %v364_v55, %v360_v53 }
 0x136   : > { %v366_v56 = vpop.f32.mrf.mxu1 }
 0x137   : > { %v372_v57 = vpack.c.bf16 %v366_v56, %v362_v54 }
 0x139   : > { %607 = vmatprep.mubr.bf16.mxu1 %v372_v57 }
 0x13a   : > { %608 = vmatmul.mubr.bf16.gmra.mxu1 %v371_v58 }
 0x13b   : > { %1192 = vmatprep.mubr.bf16.mxu1 %v5468_v0 }
 0x1f2   : > { %v599_v59 = vpop.f32.mrf.mxu1 }
 0x1f4   : > { %v601_v61 = vpop.f32.mrf.mxu1 }
 0x1f5   : > { %v646_v62 = vsub.f32 %v599_v59, %v601_v61 }
 0x1f6   : > { %v603_v63 = vpop.f32.mrf.mxu1 }
 0x1f7   : > { %v658_v4 = vand.u32 2147483647, %v646_v62  ;;  %v670_v8 = vmul.f32 0.5, %v646_v62  ;;  %v654_v9 = vsub.f32 %v4925_v60, %v646_v62 }
 0x1f8   : > { %v605_v14 = vpop.f32.mrf.mxu1 }
 0x1f9   : > { %v674_v19 = vmul.f32 %v670_v8, %v646_v62  ;;  %v3814_v47 = vadd.f32 -0.5, %v658_v4  ;;  %vm4932_vm1 = vcmp.lt.f32.partialorder %v658_v4, 1.0  ;;  %v647_v6 = vsub.f32 %v603_v63, %v605_v14 }
 0x1fa   : > { %v609_v10 = vpop.f32.mrf.mxu1  ;;  %v662_v50 = vand.u32 2147483647, %v654_v9  ;;  %v4946_v9 = vsub.f32 %v4807_v5, %v4801_v2 }
 0x1fb   : > { %v655_v51 = vsub.f32 %v4930_v12, %v647_v6  ;;  %v659_v52 = vand.u32 2147483647, %v647_v6  ;;  %v671_v53 = vmul.f32 0.5, %v647_v6  ;;  %v682_v11 = vsel %vm4932_vm1, %v674_v19, %v3814_v47 }
 0x1fc   : > { %v611_v7 = vpop.f32.mrf.mxu1  ;;  %v686_v3 = vadd.f32 %v682_v11, %v662_v50 }
 0x1fd   : > { %v648_v54 = vsub.f32 %v609_v10, %v611_v7  ;;  %v663_v55 = vand.u32 2147483647, %v655_v51  ;;  %vm667_vm2 = vcmp.lt.f32.partialorder %v659_v52, 1.0  ;;  %v675_v56 = vmul.f32 %v671_v53, %v647_v6 }
 0x1fe   : > { %v3815_v57 = vadd.f32 -0.5, %v659_v52  ;;  %v613_v58 = vpop.f32.mrf.mxu1  ;;  %v4201_v53 = vpack.c.bf16 %v605_v14, %v601_v61  ;;  %v5523_v14 = vmov 0  }
 0x1ff   : > { %v656_v62 = vsub.f32 %v4938_v49, %v648_v54  ;;  %v660_v4 = vand.u32 2147483647, %v648_v54  ;;  %v672_v1 = vmul.f32 0.5, %v648_v54  ;;  %v4202_v60 = vpack.c.bf16 %v613_v58, %v609_v10 }
 0x200   : > { %v683_v8 = vsel %vm667_vm2, %v675_v56, %v3815_v57  ;;  %v615_v0 = vpop.f32.mrf.mxu1 }
 0x201   : > { %v687_v12 = vadd.f32 %v683_v8, %v663_v55  ;;  %v664_v48 = vand.u32 2147483647, %v656_v62  ;;  %vm668_vm3 = vcmp.lt.f32.partialorder %v660_v4, 1.0  ;;  %v676_v19 = vmul.f32 %v672_v1, %v648_v54 }
 0x202   : > { %v3816_v47 = vadd.f32 -0.5, %v660_v4  ;;  %v649_v51 = vsub.f32 %v613_v58, %v615_v0  ;;  %v4203_v6 = vpack.c.bf16 %v615_v0, %v611_v7  ;;  %v4200_v54 = vpack.c.bf16 %v603_v63, %v599_v59  ;;  %v4352_v0 = vld [vmem:[#allocation4] sm:$0xff]   ;;  %v5524_v59 = vld [vmem:[#allocation18_spill] sm:$0xff] }
 0x203   : > { %v690_v52 = vadd.f32 %v687_v12, %v686_v3 }
 0x204   : > { %v684_v49 = vsel %vm668_vm3, %v676_v19, %v3816_v47  ;;  %v657_v46 = vsub.f32 %v4946_v9, %v649_v51  ;;  %v661_v50 = vand.u32 2147483647, %v649_v51  ;;  %v673_v11 = vmul.f32 0.5, %v649_v51  ;;  %750 = vmatprep.subr.bf16.mxu0 %v4203_v6 }
 0x205   : > { %v688_v56 = vadd.f32 %v684_v49, %v664_v48  ;;  %751 = vmatpush1.bf16.msra.mxu0 %v4202_v60 }
 0x206   : > { %v665_v2 = vand.u32 2147483647, %v657_v46  ;;  %vm669_vm4 = vcmp.lt.f32.partialorder %v661_v50, 1.0  ;;  %v677_v5 = vmul.f32 %v673_v11, %v649_v51  ;;  %v3817_v55 = vadd.f32 -0.5, %v661_v50  ;;  %752 = vmatprep.subr.bf16.mxu0 %v4201_v53  ;;  %v4353_v46 = vld [vmem:[#allocation4 + $0x8] sm:$0xff]   ;;  %v5525_v11 = vld [vmem:[#allocation19_spill] sm:$0xff] }
 0x207   : > { %v691_v57 = vadd.f32 %v690_v52, %v688_v56 }
 0x208   : > { %v685_v62 = vsel %vm669_vm4, %v677_v5, %v3817_v55 }
 0x209   : > { %v689_v12 = vadd.f32 %v685_v62, %v665_v2  ;;  %753 = vmatpush1.bf16.msra.mxu0 %v4200_v54 }
 0x20a   : > { %987 = vmatprep.subr.bf16.mxu0 %v4823_v13 }
 0x20b   : > { %v4950_v61 = vadd.f32 %v691_v57, %v689_v12  ;;  %v5528_v12 = vld [vmem:[#allocation20_spill] sm:$0xff] }
 0x20c   : > { %3824 = vmatmul.mubr.msk.bf16.vlgmr.msra.gmra.mxu0 %vm309_vm0, %v4352_v0 }
 0x20d   : > { %780 = vmatprep.mubr.bf16.mxu0 %v5523_v14  ;;  %988 = vmatpush1.bf16.msra.mxu0 %v4825_v15 }
 0x20e   : > { %989 = vmatprep.subr.bf16.mxu0 %v4828_v16 }
 0x211   : > { %990 = vmatpush1.bf16.msra.mxu0 %v4833_v17 }
 0x212   : > { %991 = vmatprep.subr.bf16.mxu0 %v4836_v18 }
 0x214   : > { %3825 = vmatmul.mubr.msk.bf16.gmra.mxu0 %vm309_vm0, %v4353_v46 }
 0x215   : > { %992 = vmatpush1.bf16.msra.mxu0 %v4839_v20 }
 0x216   : > { %993 = vmatprep.subr.bf16.mxu0 %v4842_v21 }
 0x219   : > { %994 = vmatpush1.bf16.msra.mxu0 %v4846_v22 }
 0x21a   : > { %995 = vmatprep.subr.bf16.mxu0 %v4849_v23 }
 0x21d   : > { %996 = vmatpush1.bf16.msra.mxu0 %v4851_v24 }
 0x21e   : > { %997 = vmatprep.subr.bf16.mxu0 %v4853_v25 }
 0x221   : > { %998 = vmatpush1.bf16.msra.mxu0 %v4857_v26 }
 0x222   : > { %999 = vmatprep.subr.bf16.mxu0 %v4859_v27 }
 0x225   : > { %1000 = vmatpush1.bf16.msra.mxu0 %v4863_v28 }
 0x226   : > { %1001 = vmatprep.subr.bf16.mxu0 %v4865_v29 }
 0x229   : > { %1002 = vmatpush1.bf16.msra.mxu0 %v4869_v30 }
 0x22a   : > { %1003 = vmatprep.subr.bf16.mxu0 %v4871_v31 }
 0x22d   : > { %1004 = vmatpush2.bf16.msra.mxu0 %v4875_v32 }
 0x22e   : > { %1005 = vmatprep.subr.bf16.mxu0 %v4877_v33 }
 0x231   : > { %1006 = vmatpush2.bf16.msra.mxu0 %v4881_v34 }
 0x232   : > { %1007 = vmatprep.subr.bf16.mxu0 %v4883_v35 }
 0x235   : > { %1008 = vmatpush2.bf16.msra.mxu0 %v4887_v36 }
 0x236   : > { %1009 = vmatprep.subr.bf16.mxu0 %v4889_v37 }
 0x239   : > { %1010 = vmatpush2.bf16.msra.mxu0 %v4893_v38 }
 0x23a   : > { %1011 = vmatprep.subr.bf16.mxu0 %v4895_v39 }
 0x23d   : > { %1012 = vmatpush2.bf16.msra.mxu0 %v4900_v40 }
 0x23e   : > { %1013 = vmatprep.subr.bf16.mxu0 %v4903_v41 }
 0x241   : > { %1014 = vmatpush2.bf16.msra.mxu0 %v4906_v42 }
 0x242   : > { %1015 = vmatprep.subr.bf16.mxu0 %v4910_v43 }
 0x245   : > { %1016 = vmatpush2.bf16.msra.mxu0 %v4912_v44 }
 0x246   : > { %1017 = vmatprep.subr.bf16.mxu0 %v4916_v45 }
 0x249   : > { %1018 = vmatpush2.bf16.msra.mxu0 %v5524_v59 }
 0x2cc   : > { %v772_v60 = vpop.f32.mrf.mxu0 }
 0x2ce   : > { %v774_v63 = vpop.f32.mrf.mxu0 }
 0x2d0   : > { %v776_v10 = vpop.f32.mrf.mxu0 }
 0x2d1   : > { %v791_v58 = vpack.c.bf16 %v776_v10, %v772_v60 }
 0x2d2   : > { %v778_v49 = vpop.f32.mrf.mxu0 }
 0x2d3   : > { %v792_v7 = vpack.c.bf16 %v778_v49, %v774_v63 }
 0x2d4   : > { %v782_v4 = vpop.f32.mrf.mxu0 }
 0x2d5   : > { %1019 = vmatprep.mubr.bf16.mxu0 %v792_v7 }
 0x2d6   : > { %v784_v1 = vpop.f32.mrf.mxu0  ;;  %1020 = vmatmul.mubr.bf16.vlgmr.msra.gmra.mxu0 %v791_v58 }
 0x2d8   : > { %v786_v3 = vpop.f32.mrf.mxu0 }
 0x2d9   : > { %v793_v19 = vpack.c.bf16 %v786_v3, %v782_v4 }
 0x2da   : > { %v788_v8 = vpop.f32.mrf.mxu0 }
 0x2db   : > { %v794_v48 = vpack.c.bf16 %v788_v8, %v784_v1  ;;  %v5529_v8 = vld [vmem:[#allocation21_spill] sm:$0xff] }
 0x2dd   : > { %1029 = vmatprep.mubr.bf16.mxu0 %v794_v48 }
 0x2de   : > { %1030 = vmatmul.mubr.bf16.gmra.mxu0 %v793_v19 }
 0x2df   : > { %1614 = vmatprep.mubr.bf16.mxu0 %v5523_v14 }
 0x396   : > { %v1021_v47 = vpop.f32.mrf.mxu0 }
 0x398   : > { %v1023_v51 = vpop.f32.mrf.mxu0 }
 0x399   : > { %v1068_v6 = vsub.f32 %v1021_v47, %v1023_v51 }
 0x39a   : > { %v1025_v52 = vpop.f32.mrf.mxu0 }
 0x39b   : > { %v1080_v53 = vand.u32 2147483647, %v1068_v6  ;;  %v1092_v50 = vmul.f32 0.5, %v1068_v6  ;;  %v1076_v56 = vsub.f32 %v5525_v11, %v1068_v6 }
 0x39c   : > { %v1027_v2 = vpop.f32.mrf.mxu0 }
 0x39d   : > { %v1096_v5 = vmul.f32 %v1092_v50, %v1068_v6  ;;  %v3862_v55 = vadd.f32 -0.5, %v1080_v53  ;;  %vm4988_vm5 = vcmp.lt.f32.partialorder %v1080_v53, 1.0  ;;  %v1069_v57 = vsub.f32 %v1025_v52, %v1027_v2 }
 0x39e   : > { %v1031_v62 = vpop.f32.mrf.mxu0  ;;  %v1084_v0 = vand.u32 2147483647, %v1076_v56 }
 0x39f   : > { %v1077_v46 = vsub.f32 %v5528_v12, %v1069_v57  ;;  %v1081_v60 = vand.u32 2147483647, %v1069_v57  ;;  %v1093_v63 = vmul.f32 0.5, %v1069_v57  ;;  %v1104_v49 = vsel %vm4988_vm5, %v1096_v5, %v3862_v55 }
 0x3a0   : > { %v1033_v10 = vpop.f32.mrf.mxu0  ;;  %v1108_v53 = vadd.f32 %v1104_v49, %v1084_v0 }
 0x3a1   : > { %v1070_v7 = vsub.f32 %v1031_v62, %v1033_v10  ;;  %v1085_v58 = vand.u32 2147483647, %v1077_v46  ;;  %vm1089_vm6 = vcmp.lt.f32.partialorder %v1081_v60, 1.0  ;;  %v1097_v4 = vmul.f32 %v1093_v63, %v1069_v57 }
 0x3a2   : > { %v3863_v1 = vadd.f32 -0.5, %v1081_v60  ;;  %v1035_v3 = vpop.f32.mrf.mxu0  ;;  %v4205_v46 = vpack.c.bf16 %v1027_v2, %v1023_v51  ;;  %v5537_v51 = vld [vmem:[#allocation20_spill] sm:$0xff] }
 0x3a3   : > { %v1078_v48 = vsub.f32 %v5529_v8, %v1070_v7  ;;  %v1082_v19 = vand.u32 2147483647, %v1070_v7  ;;  %v1094_v6 = vmul.f32 0.5, %v1070_v7  ;;  %v4206_v44 = vpack.c.bf16 %v1035_v3, %v1031_v62 }
 0x3a4   : > { %v1105_v50 = vsel %vm1089_vm6, %v1097_v4, %v3863_v1  ;;  %v1037_v56 = vpop.f32.mrf.mxu0 }
 0x3a5   : > { %v1109_v12 = vadd.f32 %v1105_v50, %v1085_v58  ;;  %v1086_v11 = vand.u32 2147483647, %v1078_v48  ;;  %vm1090_vm7 = vcmp.lt.f32.partialorder %v1082_v19, 1.0  ;;  %v1098_v59 = vmul.f32 %v1094_v6, %v1070_v7  ;;  %v5538_v50 = vld [vmem:[#allocation21_spill] sm:$0xff] }
 0x3a6   : > { %v3864_v45 = vadd.f32 -0.5, %v1082_v19  ;;  %v1071_v54 = vsub.f32 %v1035_v3, %v1037_v56  ;;  %v4207_v5 = vpack.c.bf16 %v1037_v56, %v1033_v10  ;;  %v4204_v7 = vpack.c.bf16 %v1025_v52, %v1021_v47  ;;  %v4354_v10 = vld [vmem:[#allocation4] sm:$0xff]  }
 0x3a7   : > { %v1112_v55 = vadd.f32 %v1109_v12, %v1108_v53 }
 0x3a8   : > { %v1106_v57 = vsel %vm1090_vm7, %v1098_v59, %v3864_v45  ;;  %v1079_v60 = vsub.f32 %v4946_v9, %v1071_v54  ;;  %v1083_v63 = vand.u32 2147483647, %v1071_v54  ;;  %v1095_v8 = vmul.f32 0.5, %v1071_v54  ;;  %1172 = vmatprep.subr.bf16.mxu1 %v4207_v5 }
 0x3a9   : > { %v1110_v43 = vadd.f32 %v1106_v57, %v1086_v11  ;;  %1173 = vmatpush1.bf16.msra.mxu1 %v4206_v44  ;;  %v4355_v44 = vld [vmem:[#allocation4 + $0x8] sm:$0xff]  }
 0x3aa   : > { %v1087_v0 = vand.u32 2147483647, %v1079_v60  ;;  %vm1091_vm8 = vcmp.lt.f32.partialorder %v1083_v63, 1.0  ;;  %v1099_v49 = vmul.f32 %v1095_v8, %v1071_v54  ;;  %v3865_v58 = vadd.f32 -0.5, %v1083_v63  ;;  %1174 = vmatprep.subr.bf16.mxu1 %v4205_v46 }
 0x3ab   : > { %v1113_v4 = vadd.f32 %v1112_v55, %v1110_v43 }
 0x3ac   : > { %v1107_v1 = vsel %vm1091_vm8, %v1099_v49, %v3865_v58 }
 0x3ad   : > { %v1111_v12 = vadd.f32 %v1107_v1, %v1087_v0  ;;  %1175 = vmatpush1.bf16.msra.mxu1 %v4204_v7 }
 0x3ae   : > { %1409 = vmatprep.subr.bf16.mxu1 %v4823_v13  ;;  %v5530_v13 = vld [vmem:[#allocation15_spill] sm:$0xff] }
 0x3af   : > { %v1114_v45 = vadd.f32 %v1113_v4, %v1111_v12 }
 0x3b0   : > { %3872 = vmatmul.mubr.msk.bf16.vlgmr.msra.gmra.mxu1 %vm309_vm0, %v4354_v10 }
 0x3b1   : > { %v5000_v59 = vadd.f32 %v1114_v45, %v4950_v61  ;;  %1202 = vmatprep.mubr.bf16.mxu1 %v5523_v14  ;;  %1410 = vmatpush1.bf16.msra.mxu1 %v4825_v15  ;;  %v5531_v15 = vld [vmem:[#allocation16_spill] sm:$0xff] }
 0x3b2   : > { %1411 = vmatprep.subr.bf16.mxu1 %v4828_v16  ;;  %v5532_v16 = vld [vmem:[#allocation17_spill] sm:$0xff] }
 0x3b5   : > { %1412 = vmatpush1.bf16.msra.mxu1 %v4833_v17  ;;  %v5533_v17 = vld [vmem:[#allocation18_spill] sm:$0xff] }
 0x3b6   : > { %1413 = vmatprep.subr.bf16.mxu1 %v4836_v18 }
 0x3b8   : > { %3873 = vmatmul.mubr.msk.bf16.gmra.mxu1 %vm309_vm0, %v4355_v44 }
 0x3b9   : > { %1414 = vmatpush1.bf16.msra.mxu1 %v4839_v20 }
 0x3ba   : > { %1415 = vmatprep.subr.bf16.mxu1 %v4842_v21 }
 0x3bd   : > { %1416 = vmatpush1.bf16.msra.mxu1 %v4846_v22 }
 0x3be   : > { %1417 = vmatprep.subr.bf16.mxu1 %v4849_v23 }
 0x3c1   : > { %1418 = vmatpush1.bf16.msra.mxu1 %v4851_v24 }
 0x3c2   : > { %1419 = vmatprep.subr.bf16.mxu1 %v4853_v25 }
 0x3c5   : > { %1420 = vmatpush1.bf16.msra.mxu1 %v4857_v26 }
 0x3c6   : > { %1421 = vmatprep.subr.bf16.mxu1 %v4859_v27 }
 0x3c9   : > { %1422 = vmatpush1.bf16.msra.mxu1 %v4863_v28 }
 0x3ca   : > { %1423 = vmatprep.subr.bf16.mxu1 %v4865_v29 }
 0x3cd   : > { %1424 = vmatpush1.bf16.msra.mxu1 %v4869_v30 }
 0x3ce   : > { %1425 = vmatprep.subr.bf16.mxu1 %v4871_v31 }
 0x3d1   : > { %1426 = vmatpush2.bf16.msra.mxu1 %v4875_v32 }
 0x3d2   : > { %1427 = vmatprep.subr.bf16.mxu1 %v4877_v33 }
 0x3d5   : > { %1428 = vmatpush2.bf16.msra.mxu1 %v4881_v34 }
 0x3d6   : > { %1429 = vmatprep.subr.bf16.mxu1 %v4883_v35 }
 0x3d9   : > { %1430 = vmatpush2.bf16.msra.mxu1 %v4887_v36 }
 0x3da   : > { %1431 = vmatprep.subr.bf16.mxu1 %v4889_v37  ;;  %v5534_v37 = vld [vmem:[#allocation19_spill] sm:$0xff] }
 0x3dd   : > { %1432 = vmatpush2.bf16.msra.mxu1 %v4893_v38 }
 0x3de   : > { %1433 = vmatprep.subr.bf16.mxu1 %v4895_v39 }
 0x3e1   : > { %1434 = vmatpush2.bf16.msra.mxu1 %v4900_v40 }
 0x3e2   : > { %1435 = vmatprep.subr.bf16.mxu1 %v4903_v41 }
 0x3e5   : > { %1436 = vmatpush2.bf16.msra.mxu1 %v4906_v42  ;;  %v5093_v42 = vld [vmem:[#allocation7 + $0x4] ss:$8 sps:$4 sm:$0xff]  }
 0x3e6   : > { %1437 = vmatprep.subr.bf16.mxu1 %v5530_v13 }
 0x3e9   : > { %1438 = vmatpush2.bf16.msra.mxu1 %v5531_v15 }
 0x3ea   : > { %1439 = vmatprep.subr.bf16.mxu1 %v5532_v16 }
 0x3ed   : > { %1440 = vmatpush2.bf16.msra.mxu1 %v5533_v17 }
 0x470   : > { %v1194_v18 = vpop.f32.mrf.mxu1 }
 0x472   : > { %v1196_v20 = vpop.f32.mrf.mxu1 }
 0x474   : > { %v1198_v21 = vpop.f32.mrf.mxu1 }
 0x475   : > { %v1213_v24 = vpack.c.bf16 %v1198_v21, %v1194_v18 }
 0x476   : > { %v1200_v22 = vpop.f32.mrf.mxu1 }
 0x477   : > { %v1214_v23 = vpack.c.bf16 %v1200_v22, %v1196_v20  ;;  %v5046_v20 = vld [vmem:[#allocation7 + $0x74] ss:$8 sps:$4 sm:$0xff]  }
 0x478   : > { %v1204_v25 = vpop.f32.mrf.mxu1 }
 0x479   : > { %1441 = vmatprep.mubr.bf16.mxu1 %v1214_v23 }
 0x47a   : > { %v1206_v26 = vpop.f32.mrf.mxu1  ;;  %1442 = vmatmul.mubr.bf16.vlgmr.msra.gmra.mxu1 %v1213_v24  ;;  %v4356_v24 = vld [vmem:[#allocation4] sm:$0xff]  }
 0x47c   : > { %v1208_v27 = vpop.f32.mrf.mxu1 }
 0x47d   : > { %v1215_v30 = vpack.c.bf16 %v1208_v27, %v1204_v25  ;;  %v5051_v27 = vld [vmem:[#allocation7 + $0x64] ss:$8 sps:$4 sm:$0xff]  }
 0x47e   : > { %v1210_v28 = vpop.f32.mrf.mxu1 }
 0x47f   : > { %v1216_v29 = vpack.c.bf16 %v1210_v28, %v1206_v26  ;;  %v5048_v26 = vld [vmem:[#allocation7 + $0x70] ss:$8 sps:$4 sm:$0xff]  }
 0x481   : > { %1451 = vmatprep.mubr.bf16.mxu1 %v1216_v29 }
 0x482   : > { %1452 = vmatmul.mubr.bf16.gmra.mxu1 %v1215_v30  ;;  %v5059_v30 = vld [vmem:[#allocation7 + $0x60] ss:$8 sps:$4 sm:$0xff]  }
 0x483   : > { %2036 = vmatprep.mubr.bf16.mxu1 %v5523_v14 }
 0x53a   : > { %v1443_v31 = vpop.f32.mrf.mxu1 }
 0x53c   : > { %v1445_v32 = vpop.f32.mrf.mxu1 }
 0x53d   : > { %v1490_v33 = vsub.f32 %v1443_v31, %v1445_v32 }
 0x53e   : > { %v1447_v34 = vpop.f32.mrf.mxu1 }
 0x53f   : > { %v1502_v35 = vand.u32 2147483647, %v1490_v33  ;;  %v1514_v36 = vmul.f32 0.5, %v1490_v33  ;;  %v1498_v38 = vsub.f32 %v5534_v37, %v1490_v33  ;;  %v4208_v21 = vpack.c.bf16 %v1447_v34, %v1443_v31  ;;  %v5062_v31 = vld [vmem:[#allocation7 + $0x54] ss:$8 sps:$4 sm:$0xff]  }
 0x540   : > { %v1449_v39 = vpop.f32.mrf.mxu1 }
 0x541   : > { %v1518_v40 = vmul.f32 %v1514_v36, %v1490_v33  ;;  %v3910_v41 = vadd.f32 -0.5, %v1502_v35  ;;  %vm5037_vm9 = vcmp.lt.f32.partialorder %v1502_v35, 1.0  ;;  %v1491_v43 = vsub.f32 %v1447_v34, %v1449_v39  ;;  %v5065_v33 = vld [vmem:[#allocation7 + $0x50] ss:$8 sps:$4 sm:$0xff]   ;;  %v5068_v34 = vld [vmem:[#allocation7 + $0x44] ss:$8 sps:$4 sm:$0xff]  }
 0x542   : > { %v1453_v61 = vpop.f32.mrf.mxu1  ;;  %v1506_v47 = vand.u32 2147483647, %v1498_v38  ;;  %v4209_v1 = vpack.c.bf16 %v1449_v39, %v1445_v32  ;;  %v4357_v32 = vld [vmem:[#allocation4 + $0x8] sm:$0xff]   ;;  %v5081_v38 = vld [vmem:[#allocation7 + $0x24] ss:$8 sps:$4 sm:$0xff]  }
 0x543   : > { %v1499_v52 = vsub.f32 %v5537_v51, %v1491_v43  ;;  %v1503_v11 = vand.u32 2147483647, %v1491_v43  ;;  %v1515_v2 = vmul.f32 0.5, %v1491_v43  ;;  %v1526_v3 = vsel %vm5037_vm9, %v1518_v40, %v3910_v41  ;;  %v5075_v35 = vld [vmem:[#allocation7 + $0x34] ss:$8 sps:$4 sm:$0xff]  }
 0x544   : > { %v1455_v62 = vpop.f32.mrf.mxu1  ;;  %v1530_v55 = vadd.f32 %v1526_v3, %v1506_v47  ;;  %v5078_v36 = vld [vmem:[#allocation7 + $0x30] ss:$8 sps:$4 sm:$0xff]   ;;  %v5084_v39 = vld [vmem:[#allocation7 + $0x20] ss:$8 sps:$4 sm:$0xff]   ;;  %v5087_v40 = vld [vmem:[#allocation7 + $0x14] ss:$8 sps:$4 sm:$0xff]  }
 0x545   : > { %v1492_v8 = vsub.f32 %v1453_v61, %v1455_v62  ;;  %v1507_v48 = vand.u32 2147483647, %v1499_v52  ;;  %vm1511_vm10 = vcmp.lt.f32.partialorder %v1503_v11, 1.0  ;;  %v1519_v19 = vmul.f32 %v1515_v2, %v1491_v43  ;;  %v5090_v41 = vld [vmem:[#allocation7 + $0x10] ss:$8 sps:$4 sm:$0xff]  }
 0x546   : > { %v3911_v6 = vadd.f32 -0.5, %v1503_v11  ;;  %v1457_v53 = vpop.f32.mrf.mxu1  ;;  %v5096_v43 = vld [vmem:[#allocation7] ss:$8 sps:$4 sm:$0xff]   ;;  %v5102_v47 = vld [vmem:[#allocation7 + $0xf0] ss:$8 sps:$4 sm:$0xff]  }
 0x547   : > { %v1500_v56 = vsub.f32 %v5538_v50, %v1492_v8  ;;  %v1504_v54 = vand.u32 2147483647, %v1492_v8  ;;  %v1516_v5 = vmul.f32 0.5, %v1492_v8  ;;  %v4210_v10 = vpack.c.bf16 %v1457_v53, %v1453_v61  ;;  %v5099_v61 = vld [vmem:[#allocation7 + $0xf4] ss:$8 sps:$4 sm:$0xff]  }
 0x548   : > { %v1527_v46 = vsel %vm1511_vm10, %v1519_v19, %v3911_v6  ;;  %v1459_v57 = vpop.f32.mrf.mxu1  ;;  %v5105_v52 = vld [vmem:[#allocation7 + $0xe4] ss:$8 sps:$4 sm:$0xff]   ;;  %v5108_v11 = vld [vmem:[#allocation7 + $0xe0] ss:$8 sps:$4 sm:$0xff]   ;;  %v5111_v2 = vld [vmem:[#allocation7 + $0xd4] ss:$8 sps:$4 sm:$0xff]  }
 0x549   : > { %v1531_v60 = vadd.f32 %v1527_v46, %v1507_v48  ;;  %v1508_v63 = vand.u32 2147483647, %v1500_v56  ;;  %vm1512_vm11 = vcmp.lt.f32.partialorder %v1504_v54, 1.0  ;;  %v1520_v0 = vmul.f32 %v1516_v5, %v1492_v8  ;;  %v5117_v3 = vld [vmem:[#allocation7 + $0xc4] ss:$8 sps:$4 sm:$0xff]  }
 0x54a   : > { %v3912_v49 = vadd.f32 -0.5, %v1504_v54  ;;  %v1493_v58 = vsub.f32 %v1457_v53, %v1459_v57  ;;  %v4211_v7 = vpack.c.bf16 %v1459_v57, %v1455_v62  ;;  %v5114_v62 = vld [vmem:[#allocation7 + $0xd0] ss:$8 sps:$4 sm:$0xff]   ;;  %v5120_v8 = vld [vmem:[#allocation7 + $0xc0] ss:$8 sps:$4 sm:$0xff]  }
 0x54b   : > { %v1534_v4 = vadd.f32 %v1531_v60, %v1530_v55  ;;  %v5123_v48 = vld [vmem:[#allocation7 + $0xb4] ss:$8 sps:$4 sm:$0xff]   ;;  %v5126_v19 = vld [vmem:[#allocation7 + $0xb0] ss:$8 sps:$4 sm:$0xff]   ;;  %v5129_v6 = vld [vmem:[#allocation7 + $0xa4] ss:$8 sps:$4 sm:$0xff]  }
 0x54c   : > { %v1528_v12 = vsel %vm1512_vm11, %v1520_v0, %v3912_v49  ;;  %v1501_v45 = vsub.f32 %v4946_v9, %v1493_v58  ;;  %v1505_v44 = vand.u32 2147483647, %v1493_v58  ;;  %v1517_v13 = vmul.f32 0.5, %v1493_v58  ;;  %1594 = vmatprep.subr.bf16.mxu0 %v4211_v7  ;;  %v5132_v53 = vld [vmem:[#allocation7 + $0xa0] ss:$8 sps:$4 sm:$0xff]  }
 0x54d   : > { %v1532_v15 = vadd.f32 %v1528_v12, %v1508_v63  ;;  %1595 = vmatpush1.bf16.msra.mxu0 %v4210_v10  ;;  %v5136_v56 = vld [vmem:[#allocation7 + $0x94] ss:$8 sps:$4 sm:$0xff]   ;;  %v5138_v54 = vld [vmem:[#allocation7 + $0x90] ss:$8 sps:$4 sm:$0xff]   ;;  %v5142_v5 = vld [vmem:[#allocation7 + $0x84] ss:$8 sps:$4 sm:$0xff]  }
 0x54e   : > { %v1509_v16 = vand.u32 2147483647, %v1501_v45  ;;  %vm1513_vm12 = vcmp.lt.f32.partialorder %v1505_v44, 1.0  ;;  %v1521_v17 = vmul.f32 %v1517_v13, %v1493_v58  ;;  %v3913_v18 = vadd.f32 -0.5, %v1505_v44  ;;  %1596 = vmatprep.subr.bf16.mxu0 %v4209_v1  ;;  %5539 = vst [vmem:[#allocation15_spill] sm:$0xff] %v5136_v56  ;;  %5540 = vst [vmem:[#allocation16_spill] sm:$0xff] %v5138_v54 }
 0x54f   : > { %v1535_v22 = vadd.f32 %v1534_v4, %v1532_v15  ;;  %5541 = vst [vmem:[#allocation17_spill] sm:$0xff] %v5142_v5  ;;  %v5144_v55 = vld [vmem:[#allocation7 + $0x80] ss:$8 sps:$4 sm:$0xff]  }
 0x550   : > { %v1529_v23 = vsel %vm1513_vm12, %v1521_v17, %v3913_v18  ;;  %5542 = vst [vmem:[#allocation18_spill] sm:$0xff] %v5144_v55 }
 0x551   : > { %v1533_v25 = vadd.f32 %v1529_v23, %v1509_v16  ;;  %1597 = vmatpush1.bf16.msra.mxu0 %v4208_v21 }
 0x552   : > { %1831 = vmatprep.subr.bf16.mxu0 %v5046_v20 }
 0x553   : > { %v1536_v28 = vadd.f32 %v1535_v22, %v1533_v25 }
 0x554   : > { %3920 = vmatmul.mubr.msk.bf16.vlgmr.msra.gmra.mxu0 %vm309_vm0, %v4356_v24 }
 0x555   : > { %v5055_v29 = vadd.f32 %v1536_v28, %v5000_v59  ;;  %1624 = vmatprep.mubr.bf16.mxu0 %v5523_v14  ;;  %1832 = vmatpush1.bf16.msra.mxu0 %v5048_v26  ;;  %v5072_v59 = vld [vmem:[#allocation7 + $0x40] ss:$8 sps:$4 sm:$0xff]  }
 0x556   : > { %1833 = vmatprep.subr.bf16.mxu0 %v5051_v27 }
 0x559   : > { %1834 = vmatpush1.bf16.msra.mxu0 %v5059_v30 }
 0x55a   : > { %1835 = vmatprep.subr.bf16.mxu0 %v5062_v31 }
 0x55c   : > { %3921 = vmatmul.mubr.msk.bf16.gmra.mxu0 %vm309_vm0, %v4357_v32 }
 0x55d   : > { %1836 = vmatpush1.bf16.msra.mxu0 %v5065_v33 }
 0x55e   : > { %1837 = vmatprep.subr.bf16.mxu0 %v5068_v34 }
 0x561   : > { %1838 = vmatpush1.bf16.msra.mxu0 %v5072_v59 }
 0x562   : > { %1839 = vmatprep.subr.bf16.mxu0 %v5075_v35 }
 0x565   : > { %1840 = vmatpush1.bf16.msra.mxu0 %v5078_v36 }
 0x566   : > { %1841 = vmatprep.subr.bf16.mxu0 %v5081_v38 }
 0x569   : > { %1842 = vmatpush1.bf16.msra.mxu0 %v5084_v39 }
 0x56a   : > { %1843 = vmatprep.subr.bf16.mxu0 %v5087_v40 }
 0x56d   : > { %1844 = vmatpush1.bf16.msra.mxu0 %v5090_v41 }
 0x56e   : > { %1845 = vmatprep.subr.bf16.mxu0 %v5093_v42 }
 0x571   : > { %1846 = vmatpush1.bf16.msra.mxu0 %v5096_v43 }
 0x572   : > { %1847 = vmatprep.subr.bf16.mxu0 %v5099_v61 }
 0x575   : > { %1848 = vmatpush2.bf16.msra.mxu0 %v5102_v47 }
 0x576   : > { %1849 = vmatprep.subr.bf16.mxu0 %v5105_v52 }
 0x579   : > { %1850 = vmatpush2.bf16.msra.mxu0 %v5108_v11 }
 0x57a   : > { %1851 = vmatprep.subr.bf16.mxu0 %v5111_v2 }
 0x57d   : > { %1852 = vmatpush2.bf16.msra.mxu0 %v5114_v62 }
 0x57e   : > { %1853 = vmatprep.subr.bf16.mxu0 %v5117_v3 }
 0x581   : > { %1854 = vmatpush2.bf16.msra.mxu0 %v5120_v8 }
 0x582   : > { %1855 = vmatprep.subr.bf16.mxu0 %v5123_v48 }
 0x585   : > { %1856 = vmatpush2.bf16.msra.mxu0 %v5126_v19 }
 0x586   : > { %1857 = vmatprep.subr.bf16.mxu0 %v5129_v6 }
 0x589   : > { %1858 = vmatpush2.bf16.msra.mxu0 %v5132_v53 }
 0x58a   : > { %1859 = vmatprep.subr.bf16.mxu0 %v5136_v56 }
 0x58d   : > { %1860 = vmatpush2.bf16.msra.mxu0 %v5138_v54 }
 0x58e   : > { %1861 = vmatprep.subr.bf16.mxu0 %v5142_v5 }
 0x591   : > { %1862 = vmatpush2.bf16.msra.mxu0 %v5144_v55 }
 0x614   : > { %v1616_v46 = vpop.f32.mrf.mxu0 }
 0x616   : > { %v1618_v57 = vpop.f32.mrf.mxu0 }
 0x618   : > { %v1620_v60 = vpop.f32.mrf.mxu0 }
 0x619   : > { %v1635_v49 = vpack.c.bf16 %v1620_v60, %v1616_v46 }
 0x61a   : > { %v1622_v63 = vpop.f32.mrf.mxu0 }
 0x61b   : > { %v1636_v0 = vpack.c.bf16 %v1622_v63, %v1618_v57 }
 0x61c   : > { %v1626_v58 = vpop.f32.mrf.mxu0 }
 0x61d   : > { %1863 = vmatprep.mubr.bf16.mxu0 %v1636_v0 }
 0x61e   : > { %v1628_v7 = vpop.f32.mrf.mxu0  ;;  %1864 = vmatmul.mubr.bf16.vlgmr.msra.gmra.mxu0 %v1635_v49 }
 0x620   : > { %v1630_v4 = vpop.f32.mrf.mxu0 }
 0x621   : > { %v1637_v12 = vpack.c.bf16 %v1630_v4, %v1626_v58 }
 0x622   : > { %v1632_v1 = vpop.f32.mrf.mxu0 }
 0x623   : > { %v1638_v10 = vpack.c.bf16 %v1632_v1, %v1628_v7 }
 0x625   : > { %1873 = vmatprep.mubr.bf16.mxu0 %v1638_v10 }
 0x626   : > { %1874 = vmatmul.mubr.bf16.gmra.mxu0 %v1637_v12 }
 0x627   : > { %2458 = vmatprep.mubr.bf16.mxu0 %v5523_v14 }
 0x6de   : > { %v1865_v45 = vpop.f32.mrf.mxu0 }
 0x6e0   : > { %v1867_v44 = vpop.f32.mrf.mxu0 }
 0x6e1   : > { %v1912_v13 = vsub.f32 %v1865_v45, %v1867_v44 }
 0x6e2   : > { %v1869_v15 = vpop.f32.mrf.mxu0 }
 0x6e3   : > { %v1924_v16 = vand.u32 2147483647, %v1912_v13  ;;  %v1936_v17 = vmul.f32 0.5, %v1912_v13  ;;  %v1920_v18 = vsub.f32 %v5534_v37, %v1912_v13 }
 0x6e4   : > { %v1871_v21 = vpop.f32.mrf.mxu0 }
 0x6e5   : > { %v1940_v22 = vmul.f32 %v1936_v17, %v1912_v13  ;;  %v3958_v23 = vadd.f32 -0.5, %v1924_v16  ;;  %vm5150_vm13 = vcmp.lt.f32.partialorder %v1924_v16, 1.0  ;;  %v1913_v25 = vsub.f32 %v1869_v15, %v1871_v21 }
 0x6e6   : > { %v1875_v28 = vpop.f32.mrf.mxu0  ;;  %v1928_v32 = vand.u32 2147483647, %v1920_v18 }
 0x6e7   : > { %v1921_v46 = vsub.f32 %v5537_v51, %v1913_v25  ;;  %v1925_v57 = vand.u32 2147483647, %v1913_v25  ;;  %v1937_v60 = vmul.f32 0.5, %v1913_v25  ;;  %v1948_v0 = vsel %vm5150_vm13, %v1940_v22, %v3958_v23 }
 0x6e8   : > { %v1877_v63 = vpop.f32.mrf.mxu0  ;;  %v1952_v16 = vadd.f32 %v1948_v0, %v1928_v32 }
 0x6e9   : > { %v1914_v49 = vsub.f32 %v1875_v28, %v1877_v63  ;;  %v1929_v58 = vand.u32 2147483647, %v1921_v46  ;;  %vm1933_vm14 = vcmp.lt.f32.partialorder %v1925_v57, 1.0  ;;  %v1941_v7 = vmul.f32 %v1937_v60, %v1913_v25 }
 0x6ea   : > { %v3959_v4 = vadd.f32 -0.5, %v1925_v57  ;;  %v1879_v1 = vpop.f32.mrf.mxu0  ;;  %v4213_v46 = vpack.c.bf16 %v1871_v21, %v1867_v44 }
 0x6eb   : > { %v1922_v10 = vsub.f32 %v5538_v50, %v1914_v49  ;;  %v1926_v12 = vand.u32 2147483647, %v1914_v49  ;;  %v1938_v13 = vmul.f32 0.5, %v1914_v49  ;;  %v4214_v54 = vpack.c.bf16 %v1879_v1, %v1875_v28 }
 0x6ec   : > { %v1949_v17 = vsel %vm1933_vm14, %v1941_v7, %v3959_v4  ;;  %v1881_v18 = vpop.f32.mrf.mxu0 }
 0x6ed   : > { %v1953_v51 = vadd.f32 %v1949_v17, %v1929_v58  ;;  %v1930_v37 = vand.u32 2147483647, %v1922_v10  ;;  %vm1934_vm15 = vcmp.lt.f32.partialorder %v1926_v12, 1.0  ;;  %v1942_v55 = vmul.f32 %v1938_v13, %v1914_v49 }
 0x6ee   : > { %v3960_v5 = vadd.f32 -0.5, %v1926_v12  ;;  %v1915_v24 = vsub.f32 %v1879_v1, %v1881_v18  ;;  %v4215_v22 = vpack.c.bf16 %v1881_v18, %v1877_v63  ;;  %v4212_v49 = vpack.c.bf16 %v1869_v15, %v1865_v45  ;;  %v4406_v63 = vld [vmem:[#allocation4] sm:$0xff]  }
 0x6ef   : > { %v1956_v23 = vadd.f32 %v1953_v51, %v1952_v16 }
 0x6f0   : > { %v1950_v25 = vsel %vm1934_vm15, %v1942_v55, %v3960_v5  ;;  %v1923_v57 = vsub.f32 %v4946_v9, %v1915_v24  ;;  %v1927_v60 = vand.u32 2147483647, %v1915_v24  ;;  %v1939_v50 = vmul.f32 0.5, %v1915_v24  ;;  %2016 = vmatprep.subr.bf16.mxu1 %v4215_v22 }
 0x6f1   : > { %v1954_v56 = vadd.f32 %v1950_v25, %v1930_v37  ;;  %2017 = vmatpush1.bf16.msra.mxu1 %v4214_v54  ;;  %v4407_v37 = vld [vmem:[#allocation4 + $0x8] sm:$0xff]   ;;  %v5548_v54 = vld [vmem:[#allocation18_spill] sm:$0xff] }
 0x6f2   : > { %v1931_v32 = vand.u32 2147483647, %v1923_v57  ;;  %vm1935_vm1 = vcmp.lt.f32.partialorder %v1927_v60, 1.0  ;;  %v1943_v0 = vmul.f32 %v1939_v50, %v1915_v24  ;;  %v3961_v58 = vadd.f32 -0.5, %v1927_v60  ;;  %2018 = vmatprep.subr.bf16.mxu1 %v4213_v46  ;;  %v5545_v50 = vld [vmem:[#allocation15_spill] sm:$0xff] }
 0x6f3   : > { %v1957_v7 = vadd.f32 %v1956_v23, %v1954_v56  ;;  %v5547_v56 = vld [vmem:[#allocation17_spill] sm:$0xff]  ;;  %v5549_v60 = vld [vmem:[#allocation19_spill] sm:$0xff] }
 0x6f4   : > { %v1951_v4 = vsel %vm1935_vm1, %v1943_v0, %v3961_v58 }
 0x6f5   : > { %v1955_v51 = vadd.f32 %v1951_v4, %v1931_v32  ;;  %2019 = vmatpush1.bf16.msra.mxu1 %v4212_v49 }
 0x6f6   : > { %2253 = vmatprep.subr.bf16.mxu1 %v5046_v20 }
 0x6f7   : > { %v1958_v5 = vadd.f32 %v1957_v7, %v1955_v51 }
 0x6f8   : > { %3968 = vmatmul.mubr.msk.bf16.vlgmr.msra.gmra.mxu1 %vm309_vm0, %v4406_v63 }
 0x6f9   : > { %v5162_v55 = vadd.f32 %v1958_v5, %v5055_v29  ;;  %2046 = vmatprep.mubr.bf16.mxu1 %v5523_v14  ;;  %2254 = vmatpush1.bf16.msra.mxu1 %v5048_v26  ;;  %v5546_v29 = vld [vmem:[#allocation16_spill] sm:$0xff] }
 0x6fa   : > { %2255 = vmatprep.subr.bf16.mxu1 %v5051_v27  ;;  %v5552_v5 = vld [vmem:[#allocation20_spill] sm:$0xff] }
 0x6fd   : > { %2256 = vmatpush1.bf16.msra.mxu1 %v5059_v30 }
 0x6fe   : > { %2257 = vmatprep.subr.bf16.mxu1 %v5062_v31 }
 0x700   : > { %3969 = vmatmul.mubr.msk.bf16.gmra.mxu1 %vm309_vm0, %v4407_v37 }
 0x701   : > { %2258 = vmatpush1.bf16.msra.mxu1 %v5065_v33 }
 0x702   : > { %2259 = vmatprep.subr.bf16.mxu1 %v5068_v34 }
 0x705   : > { %2260 = vmatpush1.bf16.msra.mxu1 %v5072_v59 }
 0x706   : > { %2261 = vmatprep.subr.bf16.mxu1 %v5075_v35 }
 0x709   : > { %2262 = vmatpush1.bf16.msra.mxu1 %v5078_v36 }
 0x70a   : > { %2263 = vmatprep.subr.bf16.mxu1 %v5081_v38 }
 0x70d   : > { %2264 = vmatpush1.bf16.msra.mxu1 %v5084_v39 }
 0x70e   : > { %2265 = vmatprep.subr.bf16.mxu1 %v5087_v40 }
 0x711   : > { %2266 = vmatpush1.bf16.msra.mxu1 %v5090_v41 }
 0x712   : > { %2267 = vmatprep.subr.bf16.mxu1 %v5093_v42 }
 0x715   : > { %2268 = vmatpush1.bf16.msra.mxu1 %v5096_v43 }
 0x716   : > { %2269 = vmatprep.subr.bf16.mxu1 %v5099_v61 }
 0x719   : > { %2270 = vmatpush2.bf16.msra.mxu1 %v5102_v47 }
 0x71a   : > { %2271 = vmatprep.subr.bf16.mxu1 %v5105_v52 }
 0x71d   : > { %2272 = vmatpush2.bf16.msra.mxu1 %v5108_v11 }
 0x71e   : > { %2273 = vmatprep.subr.bf16.mxu1 %v5111_v2 }
 0x721   : > { %2274 = vmatpush2.bf16.msra.mxu1 %v5114_v62 }
 0x722   : > { %2275 = vmatprep.subr.bf16.mxu1 %v5117_v3 }
 0x725   : > { %2276 = vmatpush2.bf16.msra.mxu1 %v5120_v8 }
 0x726   : > { %2277 = vmatprep.subr.bf16.mxu1 %v5123_v48 }
 0x729   : > { %2278 = vmatpush2.bf16.msra.mxu1 %v5126_v19 }
 0x72a   : > { %2279 = vmatprep.subr.bf16.mxu1 %v5129_v6 }
 0x72d   : > { %2280 = vmatpush2.bf16.msra.mxu1 %v5132_v53 }
 0x72e   : > { %2281 = vmatprep.subr.bf16.mxu1 %v5545_v50 }
 0x731   : > { %2282 = vmatpush2.bf16.msra.mxu1 %v5546_v29 }
 0x732   : > { %2283 = vmatprep.subr.bf16.mxu1 %v5547_v56 }
 0x735   : > { %2284 = vmatpush2.bf16.msra.mxu1 %v5548_v54 }
 0x7b8   : > { %v2038_v45 = vpop.f32.mrf.mxu1 }
 0x7ba   : > { %v2040_v44 = vpop.f32.mrf.mxu1 }
 0x7bc   : > { %v2042_v15 = vpop.f32.mrf.mxu1 }
 0x7bd   : > { %v2057_v1 = vpack.c.bf16 %v2042_v15, %v2038_v45 }
 0x7be   : > { %v2044_v21 = vpop.f32.mrf.mxu1 }
 0x7bf   : > { %v2058_v28 = vpack.c.bf16 %v2044_v21, %v2040_v44 }
 0x7c0   : > { %v2048_v10 = vpop.f32.mrf.mxu1 }
 0x7c1   : > { %2285 = vmatprep.mubr.bf16.mxu1 %v2058_v28 }
 0x7c2   : > { %v2050_v12 = vpop.f32.mrf.mxu1  ;;  %2286 = vmatmul.mubr.bf16.vlgmr.msra.gmra.mxu1 %v2057_v1 }
 0x7c4   : > { %v2052_v13 = vpop.f32.mrf.mxu1 }
 0x7c5   : > { %v2059_v18 = vpack.c.bf16 %v2052_v13, %v2048_v10 }
 0x7c6   : > { %v2054_v16 = vpop.f32.mrf.mxu1 }
 0x7c7   : > { %v2060_v17 = vpack.c.bf16 %v2054_v16, %v2050_v12  ;;  %v5553_v16 = vld [vmem:[#allocation21_spill] sm:$0xff] }
 0x7c9   : > { %2295 = vmatprep.mubr.bf16.mxu1 %v2060_v17 }
 0x7ca   : > { %2296 = vmatmul.mubr.bf16.gmra.mxu1 %v2059_v18 }
 0x7cb   : > { %2880 = vmatprep.mubr.bf16.mxu1 %v5523_v14 }
 0x882   : > { %v2287_v24 = vpop.f32.mrf.mxu1 }
 0x884   : > { %v2289_v22 = vpop.f32.mrf.mxu1 }
 0x885   : > { %v2334_v23 = vsub.f32 %v2287_v24, %v2289_v22 }
 0x886   : > { %v2291_v46 = vpop.f32.mrf.mxu1 }
 0x887   : > { %v2346_v25 = vand.u32 2147483647, %v2334_v23  ;;  %v2358_v57 = vmul.f32 0.5, %v2334_v23  ;;  %v2342_v32 = vsub.f32 %v5549_v60, %v2334_v23 }
 0x888   : > { %v2293_v0 = vpop.f32.mrf.mxu1 }
 0x889   : > { %v2362_v58 = vmul.f32 %v2358_v57, %v2334_v23  ;;  %v4006_v49 = vadd.f32 -0.5, %v2346_v25  ;;  %vm5199_vm2 = vcmp.lt.f32.partialorder %v2346_v25, 1.0  ;;  %v2335_v4 = vsub.f32 %v2291_v46, %v2293_v0 }
 0x88a   : > { %v2297_v63 = vpop.f32.mrf.mxu1  ;;  %v2350_v51 = vand.u32 2147483647, %v2342_v32 }
 0x88b   : > { %v2343_v37 = vsub.f32 %v5552_v5, %v2335_v4  ;;  %v2347_v45 = vand.u32 2147483647, %v2335_v4  ;;  %v2359_v44 = vmul.f32 0.5, %v2335_v4  ;;  %v2370_v21 = vsel %vm5199_vm2, %v2362_v58, %v4006_v49 }
 0x88c   : > { %v2299_v15 = vpop.f32.mrf.mxu1  ;;  %v2374_v25 = vadd.f32 %v2370_v21, %v2350_v51 }
 0x88d   : > { %v2336_v28 = vsub.f32 %v2297_v63, %v2299_v15  ;;  %v2351_v1 = vand.u32 2147483647, %v2343_v37  ;;  %vm2355_vm3 = vcmp.lt.f32.partialorder %v2347_v45, 1.0  ;;  %v2363_v10 = vmul.f32 %v2359_v44, %v2335_v4 }
 0x88e   : > { %v4007_v12 = vadd.f32 -0.5, %v2347_v45  ;;  %v2301_v13 = vpop.f32.mrf.mxu1  ;;  %v4217_v37 = vpack.c.bf16 %v2293_v0, %v2289_v22  ;;  %v5561_v22 = vld [vmem:[#allocation20_spill] sm:$0xff] }
 0x88f   : > { %v2344_v17 = vsub.f32 %v5553_v16, %v2336_v28  ;;  %v2348_v18 = vand.u32 2147483647, %v2336_v28  ;;  %v2360_v23 = vmul.f32 0.5, %v2336_v28  ;;  %v4218_v29 = vpack.c.bf16 %v2301_v13, %v2297_v63 }
 0x890   : > { %v2371_v57 = vsel %vm2355_vm3, %v2363_v10, %v4007_v12  ;;  %v2303_v32 = vpop.f32.mrf.mxu1 }
 0x891   : > { %v2375_v5 = vadd.f32 %v2371_v57, %v2351_v1  ;;  %v2352_v60 = vand.u32 2147483647, %v2344_v17  ;;  %vm2356_vm4 = vcmp.lt.f32.partialorder %v2348_v18, 1.0  ;;  %v2364_v54 = vmul.f32 %v2360_v23, %v2336_v28  ;;  %v5562_v57 = vld [vmem:[#allocation21_spill] sm:$0xff] }
 0x892   : > { %v4008_v56 = vadd.f32 -0.5, %v2348_v18  ;;  %v2337_v7 = vsub.f32 %v2301_v13, %v2303_v32  ;;  %v4219_v58 = vpack.c.bf16 %v2303_v32, %v2299_v15  ;;  %v4216_v28 = vpack.c.bf16 %v2291_v46, %v2287_v24  ;;  %v4408_v15 = vld [vmem:[#allocation4] sm:$0xff]  }
 0x893   : > { %v2378_v49 = vadd.f32 %v2375_v5, %v2374_v25 }
 0x894   : > { %v2372_v4 = vsel %vm2356_vm4, %v2364_v54, %v4008_v56  ;;  %v2345_v45 = vsub.f32 %v4946_v9, %v2337_v7  ;;  %v2349_v44 = vand.u32 2147483647, %v2337_v7  ;;  %v2361_v16 = vmul.f32 0.5, %v2337_v7  ;;  %2438 = vmatprep.subr.bf16.mxu0 %v4219_v58  ;;  %v4409_v54 = vld [vmem:[#allocation4 + $0x8] sm:$0xff]  }
 0x895   : > { %v2376_v50 = vadd.f32 %v2372_v4, %v2352_v60  ;;  %2439 = vmatpush1.bf16.msra.mxu0 %v4218_v29 }
 0x896   : > { %v2353_v51 = vand.u32 2147483647, %v2345_v45  ;;  %vm2357_vm5 = vcmp.lt.f32.partialorder %v2349_v44, 1.0  ;;  %v2365_v21 = vmul.f32 %v2361_v16, %v2337_v7  ;;  %v4009_v1 = vadd.f32 -0.5, %v2349_v44  ;;  %2440 = vmatprep.subr.bf16.mxu0 %v4217_v37 }
 0x897   : > { %v2379_v10 = vadd.f32 %v2378_v49, %v2376_v50 }
 0x898   : > { %v2373_v12 = vsel %vm2357_vm5, %v2365_v21, %v4009_v1 }
 0x899   : > { %v2377_v5 = vadd.f32 %v2373_v12, %v2353_v51  ;;  %2441 = vmatpush1.bf16.msra.mxu0 %v4216_v28 }
 0x89a   : > { %2675 = vmatprep.subr.bf16.mxu0 %v5046_v20  ;;  %v5554_v20 = vld [vmem:[#allocation15_spill] sm:$0xff] }
 0x89b   : > { %v2380_v56 = vadd.f32 %v2379_v10, %v2377_v5 }
 0x89c   : > { %4016 = vmatmul.mubr.msk.bf16.vlgmr.msra.gmra.mxu0 %vm309_vm0, %v4408_v15 }
 0x89d   : > { %2468 = vmatprep.mubr.bf16.mxu0 %v5523_v14  ;;  %2676 = vmatpush1.bf16.msra.mxu0 %v5048_v26  ;;  %v5213_v29 = vadd.f32 %v2380_v56, %v5162_v55  ;;  %v5555_v26 = vld [vmem:[#allocation16_spill] sm:$0xff] }
 0x89e   : > { %2677 = vmatprep.subr.bf16.mxu0 %v5051_v27  ;;  %v5556_v27 = vld [vmem:[#allocation17_spill] sm:$0xff] }
 0x8a1   : > { %2678 = vmatpush1.bf16.msra.mxu0 %v5059_v30  ;;  %v5557_v30 = vld [vmem:[#allocation18_spill] sm:$0xff] }
 0x8a2   : > { %2679 = vmatprep.subr.bf16.mxu0 %v5062_v31 }
 0x8a4   : > { %4017 = vmatmul.mubr.msk.bf16.gmra.mxu0 %vm309_vm0, %v4409_v54 }
 0x8a5   : > { %2680 = vmatpush1.bf16.msra.mxu0 %v5065_v33 }
 0x8a6   : > { %2681 = vmatprep.subr.bf16.mxu0 %v5068_v34 }
 0x8a9   : > { %2682 = vmatpush1.bf16.msra.mxu0 %v5072_v59 }
 0x8aa   : > { %2683 = vmatprep.subr.bf16.mxu0 %v5075_v35 }
 0x8ad   : > { %2684 = vmatpush1.bf16.msra.mxu0 %v5078_v36 }
 0x8ae   : > { %2685 = vmatprep.subr.bf16.mxu0 %v5081_v38 }
 0x8b1   : > { %2686 = vmatpush1.bf16.msra.mxu0 %v5084_v39 }
 0x8b2   : > { %2687 = vmatprep.subr.bf16.mxu0 %v5087_v40 }
 0x8b5   : > { %2688 = vmatpush1.bf16.msra.mxu0 %v5090_v41 }
 0x8b6   : > { %2689 = vmatprep.subr.bf16.mxu0 %v5093_v42 }
 0x8b9   : > { %2690 = vmatpush1.bf16.msra.mxu0 %v5096_v43 }
 0x8ba   : > { %2691 = vmatprep.subr.bf16.mxu0 %v5099_v61 }
 0x8bd   : > { %2692 = vmatpush2.bf16.msra.mxu0 %v5102_v47 }
 0x8be   : > { %2693 = vmatprep.subr.bf16.mxu0 %v5105_v52 }
 0x8c1   : > { %2694 = vmatpush2.bf16.msra.mxu0 %v5108_v11 }
 0x8c2   : > { %2695 = vmatprep.subr.bf16.mxu0 %v5111_v2 }
 0x8c5   : > { %2696 = vmatpush2.bf16.msra.mxu0 %v5114_v62 }
 0x8c6   : > { %2697 = vmatprep.subr.bf16.mxu0 %v5117_v3  ;;  %v5558_v3 = vld [vmem:[#allocation19_spill] sm:$0xff] }
 0x8c9   : > { %2698 = vmatpush2.bf16.msra.mxu0 %v5120_v8 }
 0x8ca   : > { %2699 = vmatprep.subr.bf16.mxu0 %v5123_v48 }
 0x8cd   : > { %2700 = vmatpush2.bf16.msra.mxu0 %v5126_v19 }
 0x8ce   : > { %2701 = vmatprep.subr.bf16.mxu0 %v5129_v6 }
 0x8d1   : > { %2702 = vmatpush2.bf16.msra.mxu0 %v5132_v53  ;;  %v5304_v53 = vld [vmem:[#allocation7 + $0x4] ss:$8 sps:$4 sm:$0xff]  }
 0x8d2   : > { %2703 = vmatprep.subr.bf16.mxu0 %v5554_v20 }
 0x8d5   : > { %2704 = vmatpush2.bf16.msra.mxu0 %v5555_v26 }
 0x8d6   : > { %2705 = vmatprep.subr.bf16.mxu0 %v5556_v27 }
 0x8d9   : > { %2706 = vmatpush2.bf16.msra.mxu0 %v5557_v30 }
 0x95c   : > { %v2460_v31 = vpop.f32.mrf.mxu0 }
 0x95e   : > { %v2462_v33 = vpop.f32.mrf.mxu0 }
 0x960   : > { %v2464_v34 = vpop.f32.mrf.mxu0 }
 0x961   : > { %v2479_v36 = vpack.c.bf16 %v2464_v34, %v2460_v31 }
 0x962   : > { %v2466_v59 = vpop.f32.mrf.mxu0 }
 0x963   : > { %v2480_v35 = vpack.c.bf16 %v2466_v59, %v2462_v33  ;;  %v5257_v33 = vld [vmem:[#allocation7 + $0x74] ss:$8 sps:$4 sm:$0xff]  }
 0x964   : > { %v2470_v38 = vpop.f32.mrf.mxu0 }
 0x965   : > { %2707 = vmatprep.mubr.bf16.mxu0 %v2480_v35 }
 0x966   : > { %v2472_v39 = vpop.f32.mrf.mxu0  ;;  %2708 = vmatmul.mubr.bf16.vlgmr.msra.gmra.mxu0 %v2479_v36  ;;  %v4410_v36 = vld [vmem:[#allocation4] sm:$0xff]  }
 0x968   : > { %v2474_v40 = vpop.f32.mrf.mxu0 }
 0x969   : > { %v2481_v43 = vpack.c.bf16 %v2474_v40, %v2470_v38  ;;  %v5262_v40 = vld [vmem:[#allocation7 + $0x64] ss:$8 sps:$4 sm:$0xff]  }
 0x96a   : > { %v2476_v41 = vpop.f32.mrf.mxu0 }
 0x96b   : > { %v2482_v42 = vpack.c.bf16 %v2476_v41, %v2472_v39  ;;  %v5259_v39 = vld [vmem:[#allocation7 + $0x70] ss:$8 sps:$4 sm:$0xff]  }
 0x96d   : > { %2717 = vmatprep.mubr.bf16.mxu0 %v2482_v42  ;;  %v5267_v42 = vld [vmem:[#allocation7 + $0x60] ss:$8 sps:$4 sm:$0xff]  }
 0x96e   : > { %2718 = vmatmul.mubr.bf16.gmra.mxu0 %v2481_v43 }
 0x96f   : > { %3302 = vmatprep.mubr.bf16.mxu0 %v5523_v14 }
 0xa26   : > { %v2709_v61 = vpop.f32.mrf.mxu0 }
 0xa28   : > { %v2711_v47 = vpop.f32.mrf.mxu0 }
 0xa29   : > { %v2756_v52 = vsub.f32 %v2709_v61, %v2711_v47 }
 0xa2a   : > { %v2713_v11 = vpop.f32.mrf.mxu0 }
 0xa2b   : > { %v2768_v2 = vand.u32 2147483647, %v2756_v52  ;;  %v2780_v62 = vmul.f32 0.5, %v2756_v52  ;;  %v2764_v8 = vsub.f32 %v5558_v3, %v2756_v52  ;;  %v4220_v34 = vpack.c.bf16 %v2713_v11, %v2709_v61  ;;  %v5273_v61 = vld [vmem:[#allocation7 + $0x54] ss:$8 sps:$4 sm:$0xff]  }
 0xa2c   : > { %v2715_v48 = vpop.f32.mrf.mxu0 }
 0xa2d   : > { %v2784_v19 = vmul.f32 %v2780_v62, %v2756_v52  ;;  %v4054_v6 = vadd.f32 -0.5, %v2768_v2  ;;  %vm5248_vm6 = vcmp.lt.f32.partialorder %v2768_v2, 1.0  ;;  %v2757_v55 = vsub.f32 %v2713_v11, %v2715_v48  ;;  %v5276_v52 = vld [vmem:[#allocation7 + $0x50] ss:$8 sps:$4 sm:$0xff]   ;;  %v5279_v11 = vld [vmem:[#allocation7 + $0x44] ss:$8 sps:$4 sm:$0xff]  }
 0xa2e   : > { %v2719_v50 = vpop.f32.mrf.mxu0  ;;  %v2772_v24 = vand.u32 2147483647, %v2764_v8  ;;  %v4221_v12 = vpack.c.bf16 %v2715_v48, %v2711_v47  ;;  %v4411_v47 = vld [vmem:[#allocation4 + $0x8] sm:$0xff]   ;;  %v5283_v2 = vld [vmem:[#allocation7 + $0x40] ss:$8 sps:$4 sm:$0xff]  }
 0xa2f   : > { %v2765_v46 = vsub.f32 %v5561_v22, %v2757_v55  ;;  %v2769_v60 = vand.u32 2147483647, %v2757_v55  ;;  %v2781_v0 = vmul.f32 0.5, %v2757_v55  ;;  %v2792_v13 = vsel %vm5248_vm6, %v2784_v19, %v4054_v6  ;;  %v5289_v62 = vld [vmem:[#allocation7 + $0x30] ss:$8 sps:$4 sm:$0xff]  }
 0xa30   : > { %v2721_v63 = vpop.f32.mrf.mxu0  ;;  %v2796_v49 = vadd.f32 %v2792_v13, %v2772_v24  ;;  %v5292_v8 = vld [vmem:[#allocation7 + $0x24] ss:$8 sps:$4 sm:$0xff]   ;;  %v5295_v48 = vld [vmem:[#allocation7 + $0x20] ss:$8 sps:$4 sm:$0xff]   ;;  %v5298_v19 = vld [vmem:[#allocation7 + $0x14] ss:$8 sps:$4 sm:$0xff]  }
 0xa31   : > { %v2758_v16 = vsub.f32 %v2719_v50, %v2721_v63  ;;  %v2773_v17 = vand.u32 2147483647, %v2765_v46  ;;  %vm2777_vm7 = vcmp.lt.f32.partialorder %v2769_v60, 1.0  ;;  %v2785_v18 = vmul.f32 %v2781_v0, %v2757_v55  ;;  %v5301_v6 = vld [vmem:[#allocation7 + $0x10] ss:$8 sps:$4 sm:$0xff]  }
 0xa32   : > { %v4055_v23 = vadd.f32 -0.5, %v2769_v60  ;;  %v2723_v25 = vpop.f32.mrf.mxu0  ;;  %v5307_v55 = vld [vmem:[#allocation7] ss:$8 sps:$4 sm:$0xff]   ;;  %v5313_v24 = vld [vmem:[#allocation7 + $0xf0] ss:$8 sps:$4 sm:$0xff]  }
 0xa33   : > { %v2766_v32 = vsub.f32 %v5562_v57, %v2758_v16  ;;  %v2770_v7 = vand.u32 2147483647, %v2758_v16  ;;  %v2782_v58 = vmul.f32 0.5, %v2758_v16  ;;  %v4222_v15 = vpack.c.bf16 %v2723_v25, %v2719_v50  ;;  %v5310_v50 = vld [vmem:[#allocation7 + $0xf4] ss:$8 sps:$4 sm:$0xff]  }
 0xa34   : > { %v2793_v37 = vsel %vm2777_vm7, %v2785_v18, %v4055_v23  ;;  %v2725_v4 = vpop.f32.mrf.mxu0  ;;  %v5316_v46 = vld [vmem:[#allocation7 + $0xe4] ss:$8 sps:$4 sm:$0xff]   ;;  %v5319_v60 = vld [vmem:[#allocation7 + $0xe0] ss:$8 sps:$4 sm:$0xff]   ;;  %v5322_v0 = vld [vmem:[#allocation7 + $0xd4] ss:$8 sps:$4 sm:$0xff]  }
 0xa35   : > { %v2797_v45 = vadd.f32 %v2793_v37, %v2773_v17  ;;  %v2774_v44 = vand.u32 2147483647, %v2766_v32  ;;  %vm2778_vm8 = vcmp.lt.f32.partialorder %v2770_v7, 1.0  ;;  %v2786_v51 = vmul.f32 %v2782_v58, %v2758_v16  ;;  %v5328_v13 = vld [vmem:[#allocation7 + $0xc4] ss:$8 sps:$4 sm:$0xff]  }
 0xa36   : > { %v4056_v21 = vadd.f32 -0.5, %v2770_v7  ;;  %v2759_v1 = vsub.f32 %v2723_v25, %v2725_v4  ;;  %v4223_v28 = vpack.c.bf16 %v2725_v4, %v2721_v63  ;;  %v5325_v63 = vld [vmem:[#allocation7 + $0xd0] ss:$8 sps:$4 sm:$0xff]   ;;  %v5331_v16 = vld [vmem:[#allocation7 + $0xc0] ss:$8 sps:$4 sm:$0xff]  }
 0xa37   : > { %v2800_v10 = vadd.f32 %v2797_v45, %v2796_v49  ;;  %v5334_v17 = vld [vmem:[#allocation7 + $0xb4] ss:$8 sps:$4 sm:$0xff]   ;;  %v5337_v18 = vld [vmem:[#allocation7 + $0xb0] ss:$8 sps:$4 sm:$0xff]   ;;  %v5340_v23 = vld [vmem:[#allocation7 + $0xa4] ss:$8 sps:$4 sm:$0xff]  }
 0xa38   : > { %v2794_v5 = vsel %vm2778_vm8, %v2786_v51, %v4056_v21  ;;  %v2767_v56 = vsub.f32 %v4946_v9, %v2759_v1  ;;  %v2771_v54 = vand.u32 2147483647, %v2759_v1  ;;  %v2783_v20 = vmul.f32 0.5, %v2759_v1  ;;  %2860 = vmatprep.subr.bf16.mxu1 %v4223_v28  ;;  %v5343_v25 = vld [vmem:[#allocation7 + $0xa0] ss:$8 sps:$4 sm:$0xff]  }
 0xa39   : > { %v2798_v26 = vadd.f32 %v2794_v5, %v2774_v44  ;;  %2861 = vmatpush1.bf16.msra.mxu1 %v4222_v15  ;;  %v5347_v32 = vld [vmem:[#allocation7 + $0x94] ss:$8 sps:$4 sm:$0xff]   ;;  %v5349_v7 = vld [vmem:[#allocation7 + $0x90] ss:$8 sps:$4 sm:$0xff]   ;;  %v5353_v58 = vld [vmem:[#allocation7 + $0x84] ss:$8 sps:$4 sm:$0xff]  }
 0xa3a   : > { %v2775_v27 = vand.u32 2147483647, %v2767_v56  ;;  %vm2779_vm9 = vcmp.lt.f32.partialorder %v2771_v54, 1.0  ;;  %v2787_v30 = vmul.f32 %v2783_v20, %v2759_v1  ;;  %v4057_v31 = vadd.f32 -0.5, %v2771_v54  ;;  %2862 = vmatprep.subr.bf16.mxu1 %v4221_v12  ;;  %5563 = vst [vmem:[#allocation15_spill] sm:$0xff] %v5347_v32  ;;  %5564 = vst [vmem:[#allocation16_spill] sm:$0xff] %v5349_v7 }
 0xa3b   : > { %v2801_v59 = vadd.f32 %v2800_v10, %v2798_v26  ;;  %5565 = vst [vmem:[#allocation17_spill] sm:$0xff] %v5353_v58  ;;  %v5355_v49 = vld [vmem:[#allocation7 + $0x80] ss:$8 sps:$4 sm:$0xff]  }
 0xa3c   : > { %v2795_v35 = vsel %vm2779_vm9, %v2787_v30, %v4057_v31  ;;  %5566 = vst [vmem:[#allocation18_spill] sm:$0xff] %v5355_v49 }
 0xa3d   : > { %v2799_v38 = vadd.f32 %v2795_v35, %v2775_v27  ;;  %2863 = vmatpush1.bf16.msra.mxu1 %v4220_v34 }
 0xa3e   : > { %3097 = vmatprep.subr.bf16.mxu1 %v5257_v33 }
 0xa3f   : > { %v2802_v41 = vadd.f32 %v2801_v59, %v2799_v38 }
 0xa40   : > { %4064 = vmatmul.mubr.msk.bf16.vlgmr.msra.gmra.mxu1 %vm309_vm0, %v4410_v36 }
 0xa41   : > { %2890 = vmatprep.mubr.bf16.mxu1 %v5523_v14  ;;  %3098 = vmatpush1.bf16.msra.mxu1 %v5259_v39  ;;  %v5270_v43 = vadd.f32 %v2802_v41, %v5213_v29  ;;  %v5286_v29 = vld [vmem:[#allocation7 + $0x34] ss:$8 sps:$4 sm:$0xff]  }
 0xa42   : > { %3099 = vmatprep.subr.bf16.mxu1 %v5262_v40 }
 0xa45   : > { %3100 = vmatpush1.bf16.msra.mxu1 %v5267_v42 }
 0xa46   : > { %3101 = vmatprep.subr.bf16.mxu1 %v5273_v61 }
 0xa48   : > { %4065 = vmatmul.mubr.msk.bf16.gmra.mxu1 %vm309_vm0, %v4411_v47 }
 0xa49   : > { %3102 = vmatpush1.bf16.msra.mxu1 %v5276_v52 }
 0xa4a   : > { %3103 = vmatprep.subr.bf16.mxu1 %v5279_v11 }
 0xa4d   : > { %3104 = vmatpush1.bf16.msra.mxu1 %v5283_v2 }
 0xa4e   : > { %3105 = vmatprep.subr.bf16.mxu1 %v5286_v29 }
 0xa51   : > { %3106 = vmatpush1.bf16.msra.mxu1 %v5289_v62 }
 0xa52   : > { %3107 = vmatprep.subr.bf16.mxu1 %v5292_v8 }
 0xa55   : > { %3108 = vmatpush1.bf16.msra.mxu1 %v5295_v48 }
 0xa56   : > { %3109 = vmatprep.subr.bf16.mxu1 %v5298_v19 }
 0xa59   : > { %3110 = vmatpush1.bf16.msra.mxu1 %v5301_v6 }
 0xa5a   : > { %3111 = vmatprep.subr.bf16.mxu1 %v5304_v53 }
 0xa5d   : > { %3112 = vmatpush1.bf16.msra.mxu1 %v5307_v55 }
 0xa5e   : > { %3113 = vmatprep.subr.bf16.mxu1 %v5310_v50 }
 0xa61   : > { %3114 = vmatpush2.bf16.msra.mxu1 %v5313_v24 }
 0xa62   : > { %3115 = vmatprep.subr.bf16.mxu1 %v5316_v46 }
 0xa65   : > { %3116 = vmatpush2.bf16.msra.mxu1 %v5319_v60 }
 0xa66   : > { %3117 = vmatprep.subr.bf16.mxu1 %v5322_v0 }
 0xa69   : > { %3118 = vmatpush2.bf16.msra.mxu1 %v5325_v63 }
 0xa6a   : > { %3119 = vmatprep.subr.bf16.mxu1 %v5328_v13 }
 0xa6d   : > { %3120 = vmatpush2.bf16.msra.mxu1 %v5331_v16 }
 0xa6e   : > { %3121 = vmatprep.subr.bf16.mxu1 %v5334_v17 }
 0xa71   : > { %3122 = vmatpush2.bf16.msra.mxu1 %v5337_v18 }
 0xa72   : > { %3123 = vmatprep.subr.bf16.mxu1 %v5340_v23 }
 0xa75   : > { %3124 = vmatpush2.bf16.msra.mxu1 %v5343_v25 }
 0xa76   : > { %3125 = vmatprep.subr.bf16.mxu1 %v5347_v32 }
 0xa79   : > { %3126 = vmatpush2.bf16.msra.mxu1 %v5349_v7 }
 0xa7a   : > { %3127 = vmatprep.subr.bf16.mxu1 %v5353_v58 }
 0xa7d   : > { %3128 = vmatpush2.bf16.msra.mxu1 %v5355_v49 }
 0xb00   : > { %v2882_v37 = vpop.f32.mrf.mxu1 }
 0xb02   : > { %v2884_v4 = vpop.f32.mrf.mxu1 }
 0xb04   : > { %v2886_v45 = vpop.f32.mrf.mxu1 }
 0xb05   : > { %v2901_v21 = vpack.c.bf16 %v2886_v45, %v2882_v37 }
 0xb06   : > { %v2888_v44 = vpop.f32.mrf.mxu1 }
 0xb07   : > { %v2902_v51 = vpack.c.bf16 %v2888_v44, %v2884_v4 }
 0xb08   : > { %v2892_v1 = vpop.f32.mrf.mxu1 }
 0xb09   : > { %3129 = vmatprep.mubr.bf16.mxu1 %v2902_v51 }
 0xb0a   : > { %v2894_v28 = vpop.f32.mrf.mxu1  ;;  %3130 = vmatmul.mubr.bf16.vlgmr.msra.gmra.mxu1 %v2901_v21 }
 0xb0c   : > { %v2896_v10 = vpop.f32.mrf.mxu1 }
 0xb0d   : > { %v2903_v5 = vpack.c.bf16 %v2896_v10, %v2892_v1 }
 0xb0e   : > { %v2898_v12 = vpop.f32.mrf.mxu1 }
 0xb0f   : > { %v2904_v15 = vpack.c.bf16 %v2898_v12, %v2894_v28 }
 0xb11   : > { %3139 = vmatprep.mubr.bf16.mxu1 %v2904_v15 }
 0xb12   : > { %3140 = vmatmul.mubr.bf16.gmra.mxu1 %v2903_v5 }
 0xbca   : > { %v3131_v56 = vpop.f32.mrf.mxu1 }
 0xbcc   : > { %v3133_v54 = vpop.f32.mrf.mxu1 }
 0xbcd   : > { %v3178_v20 = vsub.f32 %v3131_v56, %v3133_v54 }
 0xbce   : > { %v3135_v26 = vpop.f32.mrf.mxu1 }
 0xbcf   : > { %v3190_v27 = vand.u32 2147483647, %v3178_v20  ;;  %v3202_v30 = vmul.f32 0.5, %v3178_v20  ;;  %v3186_v31 = vsub.f32 %v5558_v3, %v3178_v20 }
 0xbd0   : > { %v3137_v34 = vpop.f32.mrf.mxu1 }
 0xbd1   : > { %v3206_v59 = vmul.f32 %v3202_v30, %v3178_v20  ;;  %v4102_v35 = vadd.f32 -0.5, %v3190_v27  ;;  %vm5360_vm10 = vcmp.lt.f32.partialorder %v3190_v27, 1.0  ;;  %v3179_v38 = vsub.f32 %v3135_v26, %v3137_v34 }
 0xbd2   : > { %v3141_v41 = vpop.f32.mrf.mxu1  ;;  %v3194_v47 = vand.u32 2147483647, %v3186_v31 }
 0xbd3   : > { %v3187_v37 = vsub.f32 %v5561_v22, %v3179_v38  ;;  %v3191_v4 = vand.u32 2147483647, %v3179_v38  ;;  %v3203_v45 = vmul.f32 0.5, %v3179_v38  ;;  %v3214_v51 = vsel %vm5360_vm10, %v3206_v59, %v4102_v35 }
 0xbd4   : > { %v3143_v44 = vpop.f32.mrf.mxu1  ;;  %v3218_v27 = vadd.f32 %v3214_v51, %v3194_v47 }
 0xbd5   : > { %v3180_v21 = vsub.f32 %v3141_v41, %v3143_v44  ;;  %v3195_v1 = vand.u32 2147483647, %v3187_v37  ;;  %vm3199_vm11 = vcmp.lt.f32.partialorder %v3191_v4, 1.0  ;;  %v3207_v28 = vmul.f32 %v3203_v45, %v3179_v38 }
 0xbd6   : > { %v4103_v10 = vadd.f32 -0.5, %v3191_v4  ;;  %v3145_v12 = vpop.f32.mrf.mxu1  ;;  %v4225_v37 = vpack.c.bf16 %v3137_v34, %v3133_v54 }
 0xbd7   : > { %v3188_v15 = vsub.f32 %v5562_v57, %v3180_v21  ;;  %v3192_v5 = vand.u32 2147483647, %v3180_v21  ;;  %v3204_v20 = vmul.f32 0.5, %v3180_v21  ;;  %v4226_v7 = vpack.c.bf16 %v3145_v12, %v3141_v41 }
 0xbd8   : > { %v3215_v30 = vsel %vm3199_vm11, %v3207_v28, %v4103_v10  ;;  %v3147_v31 = vpop.f32.mrf.mxu1 }
 0xbd9   : > { %v3219_v3 = vadd.f32 %v3215_v30, %v3195_v1  ;;  %v3196_v22 = vand.u32 2147483647, %v3188_v15  ;;  %vm3200_vm12 = vcmp.lt.f32.partialorder %v3192_v5, 1.0  ;;  %v3208_v49 = vmul.f32 %v3204_v20, %v3180_v21  ;;  %v5579_v20 = vld [vmem:[#allocation21_spill] sm:$0xff] }
 0xbda   : > { %v4104_v58 = vadd.f32 -0.5, %v3192_v5  ;;  %v3181_v36 = vsub.f32 %v3145_v12, %v3147_v31  ;;  %v4227_v59 = vpack.c.bf16 %v3147_v31, %v3143_v44  ;;  %v4224_v21 = vpack.c.bf16 %v3135_v26, %v3131_v56  ;;  %v4460_v44 = vld [vmem:[#allocation4] sm:$0xff]  }
 0xbdb   : > { %v3222_v35 = vadd.f32 %v3219_v3, %v3218_v27 }
 0xbdc   : > { %v3216_v38 = vsel %vm3200_vm12, %v3208_v49, %v4104_v58  ;;  %v3189_v4 = vsub.f32 %v4946_v9, %v3181_v36  ;;  %v3193_v45 = vand.u32 2147483647, %v3181_v36  ;;  %v3205_v57 = vmul.f32 0.5, %v3181_v36  ;;  %3282 = vmatprep.subr.bf16.mxu0 %v4227_v59 }
 0xbdd   : > { %v3220_v32 = vadd.f32 %v3216_v38, %v3196_v22  ;;  %3283 = vmatpush1.bf16.msra.mxu0 %v4226_v7 }
 0xbde   : > { %v3197_v47 = vand.u32 2147483647, %v3189_v4  ;;  %vm3201_vm13 = vcmp.lt.f32.partialorder %v3193_v45, 1.0  ;;  %v3209_v51 = vmul.f32 %v3205_v57, %v3181_v36  ;;  %v4105_v1 = vadd.f32 -0.5, %v3193_v45  ;;  %3284 = vmatprep.subr.bf16.mxu0 %v4225_v37  ;;  %v4461_v57 = vld [vmem:[#allocation4 + $0x8] sm:$0xff]  }
 0xbdf   : > { %v3223_v28 = vadd.f32 %v3222_v35, %v3220_v32  ;;  %v5574_v32 = vld [vmem:[#allocation19_spill] sm:$0xff] }
 0xbe0   : > { %v3217_v10 = vsel %vm3201_vm13, %v3209_v51, %v4105_v1 }
 0xbe1   : > { %v3221_v3 = vadd.f32 %v3217_v10, %v3197_v47  ;;  %3285 = vmatpush1.bf16.msra.mxu0 %v4224_v21 }
 0xbe2   : > { %3519 = vmatprep.subr.bf16.mxu0 %v5257_v33  ;;  %v5570_v33 = vld [vmem:[#allocation16_spill] sm:$0xff] }
 0xbe3   : > { %v3224_v58 = vadd.f32 %v3223_v28, %v3221_v3 }
 0xbe4   : > { %4112 = vmatmul.mubr.msk.bf16.vlgmr.msra.gmra.mxu0 %vm309_vm0, %v4460_v44 }
 0xbe5   : > { %3312 = vmatprep.mubr.bf16.mxu0 %v5523_v14  ;;  %3520 = vmatpush1.bf16.msra.mxu0 %v5259_v39  ;;  %v5374_v22 = vadd.f32 %v3224_v58, %v5270_v43  ;;  %v5569_v14 = vld [vmem:[#allocation15_spill] sm:$0xff]  ;;  %v5571_v39 = vld [vmem:[#allocation17_spill] sm:$0xff] }
 0xbe6   : > { %3521 = vmatprep.subr.bf16.mxu0 %v5262_v40  ;;  %v5572_v40 = vld [vmem:[#allocation18_spill] sm:$0xff] }
 0xbe9   : > { %3522 = vmatpush1.bf16.msra.mxu0 %v5267_v42 }
 0xbea   : > { %3523 = vmatprep.subr.bf16.mxu0 %v5273_v61 }
 0xbec   : > { %4113 = vmatmul.mubr.msk.bf16.gmra.mxu0 %vm309_vm0, %v4461_v57 }
 0xbed   : > { %3524 = vmatpush1.bf16.msra.mxu0 %v5276_v52 }
 0xbee   : > { %3525 = vmatprep.subr.bf16.mxu0 %v5279_v11 }
 0xbf1   : > { %3526 = vmatpush1.bf16.msra.mxu0 %v5283_v2 }
 0xbf2   : > { %3527 = vmatprep.subr.bf16.mxu0 %v5286_v29 }
 0xbf5   : > { %3528 = vmatpush1.bf16.msra.mxu0 %v5289_v62 }
 0xbf6   : > { %3529 = vmatprep.subr.bf16.mxu0 %v5292_v8 }
 0xbf9   : > { %3530 = vmatpush1.bf16.msra.mxu0 %v5295_v48 }
 0xbfa   : > { %3531 = vmatprep.subr.bf16.mxu0 %v5298_v19 }
 0xbfd   : > { %3532 = vmatpush1.bf16.msra.mxu0 %v5301_v6 }
 0xbfe   : > { %3533 = vmatprep.subr.bf16.mxu0 %v5304_v53 }
 0xc01   : > { %3534 = vmatpush1.bf16.msra.mxu0 %v5307_v55 }
 0xc02   : > { %3535 = vmatprep.subr.bf16.mxu0 %v5310_v50 }
 0xc05   : > { %3536 = vmatpush2.bf16.msra.mxu0 %v5313_v24 }
 0xc06   : > { %3537 = vmatprep.subr.bf16.mxu0 %v5316_v46 }
 0xc09   : > { %3538 = vmatpush2.bf16.msra.mxu0 %v5319_v60 }
 0xc0a   : > { %3539 = vmatprep.subr.bf16.mxu0 %v5322_v0 }
 0xc0d   : > { %3540 = vmatpush2.bf16.msra.mxu0 %v5325_v63 }
 0xc0e   : > { %3541 = vmatprep.subr.bf16.mxu0 %v5328_v13 }
 0xc11   : > { %3542 = vmatpush2.bf16.msra.mxu0 %v5331_v16  ;;  %v5573_v16 = vld [vmem:[#allocation20_spill] sm:$0xff] }
 0xc12   : > { %3543 = vmatprep.subr.bf16.mxu0 %v5334_v17 }
 0xc15   : > { %3544 = vmatpush2.bf16.msra.mxu0 %v5337_v18 }
 0xc16   : > { %3545 = vmatprep.subr.bf16.mxu0 %v5340_v23 }
 0xc19   : > { %3546 = vmatpush2.bf16.msra.mxu0 %v5343_v25 }
 0xc1a   : > { %3547 = vmatprep.subr.bf16.mxu0 %v5569_v14 }
 0xc1d   : > { %3548 = vmatpush2.bf16.msra.mxu0 %v5570_v33 }
 0xc1e   : > { %3549 = vmatprep.subr.bf16.mxu0 %v5571_v39 }
 0xc21   : > { %3550 = vmatpush2.bf16.msra.mxu0 %v5572_v40 }
 0xca4   : > { %v3304_v42 = vpop.f32.mrf.mxu0 }
 0xca6   : > { %v3306_v43 = vpop.f32.mrf.mxu0 }
 0xca8   : > { %v3308_v61 = vpop.f32.mrf.mxu0 }
 0xca9   : > { %v3323_v2 = vpack.c.bf16 %v3308_v61, %v3304_v42 }
 0xcaa   : > { %v3310_v52 = vpop.f32.mrf.mxu0 }
 0xcab   : > { %v3324_v11 = vpack.c.bf16 %v3310_v52, %v3306_v43 }
 0xcac   : > { %v3314_v29 = vpop.f32.mrf.mxu0 }
 0xcad   : > { %3551 = vmatprep.mubr.bf16.mxu0 %v3324_v11 }
 0xcae   : > { %v3316_v62 = vpop.f32.mrf.mxu0  ;;  %3552 = vmatmul.mubr.bf16.vlgmr.msra.gmra.mxu0 %v3323_v2 }
 0xcb0   : > { %v3318_v8 = vpop.f32.mrf.mxu0 }
 0xcb1   : > { %v3325_v6 = vpack.c.bf16 %v3318_v8, %v3314_v29 }
 0xcb2   : > { %v3320_v48 = vpop.f32.mrf.mxu0 }
 0xcb3   : > { %v3326_v19 = vpack.c.bf16 %v3320_v48, %v3316_v62 }
 0xcb5   : > { %3561 = vmatprep.mubr.bf16.mxu0 %v3326_v19 }
 0xcb6   : > { %3562 = vmatmul.mubr.bf16.gmra.mxu0 %v3325_v6 }
 0xd6e   : > { %v3553_v53 = vpop.f32.mrf.mxu0 }
 0xd70   : > { %v3555_v55 = vpop.f32.mrf.mxu0 }
 0xd71   : > { %v3600_v50 = vsub.f32 %v3553_v53, %v3555_v55 }
 0xd72   : > { %v3557_v24 = vpop.f32.mrf.mxu0 }
 0xd73   : > { %v3612_v60 = vand.u32 2147483647, %v3600_v50  ;;  %v3624_v0 = vmul.f32 0.5, %v3600_v50  ;;  %v3608_v7 = vsub.f32 %v5574_v32, %v3600_v50 }
 0xd74   : > { %v3559_v46 = vpop.f32.mrf.mxu0 }
 0xd75   : > { %v3601_v63 = vsub.f32 %v3557_v24, %v3559_v46  ;;  %vm5409_vm0 = vcmp.lt.f32.partialorder %v3612_v60, 1.0  ;;  %v3628_v56 = vmul.f32 %v3624_v0, %v3600_v50  ;;  %v4150_v26 = vadd.f32 -0.5, %v3612_v60 }
 0xd76   : > { %v3563_v13 = vpop.f32.mrf.mxu0  ;;  %v3616_v35 = vand.u32 2147483647, %v3608_v7 }
 0xd77   : > { %v3609_v17 = vsub.f32 %v5573_v16, %v3601_v63  ;;  %v3613_v18 = vand.u32 2147483647, %v3601_v63  ;;  %v3625_v23 = vmul.f32 0.5, %v3601_v63  ;;  %v3636_v4 = vsel %vm5409_vm0, %v3628_v56, %v4150_v26 }
 0xd78   : > { %v3565_v25 = vpop.f32.mrf.mxu0  ;;  %v3640_v44 = vadd.f32 %v3636_v4, %v3616_v35 }
 0xd79   : > { %v3602_v54 = vsub.f32 %v3563_v13, %v3565_v25  ;;  %vm5413_vm14 = vcmp.lt.f32.partialorder %v3613_v18, 1.0  ;;  %v3629_v41 = vmul.f32 %v3625_v23, %v3601_v63  ;;  %v4151_v12 = vadd.f32 -0.5, %v3613_v18 }
 0xd7a   : > { %v3567_v15 = vpop.f32.mrf.mxu0  ;;  %v3617_v5 = vand.u32 2147483647, %v3609_v17 }
 0xd7b   : > { %v3610_v27 = vsub.f32 %v5579_v20, %v3602_v54  ;;  %v3614_v30 = vand.u32 2147483647, %v3602_v54  ;;  %v3626_v31 = vmul.f32 0.5, %v3602_v54  ;;  %v3637_v36 = vsel %vm5413_vm14, %v3629_v41, %v4151_v12 }
 0xd7c   : > { %v3569_v59 = vpop.f32.mrf.mxu0  ;;  %v3641_v51 = vadd.f32 %v3637_v36, %v3617_v5 }
 0xd7d   : > { %v3618_v37 = vand.u32 2147483647, %v3610_v27  ;;  %vm3622_vm15 = vcmp.lt.f32.partialorder %v3614_v30, 1.0  ;;  %v3630_v38 = vmul.f32 %v3626_v31, %v3602_v54  ;;  %v4152_v45 = vadd.f32 -0.5, %v3614_v30 }
 0xd7e   : > { %v3603_v47 = vsub.f32 %v3567_v15, %v3569_v59  ;;  %v3644_v33 = vadd.f32 %v3641_v51, %v3640_v44 }
 0xd7f   : > { %v3638_v1 = vsel %vm3622_vm15, %v3630_v38, %v4152_v45 }
 0xd80   : > { %v3611_v21 = vsub.f32 %v4946_v9, %v3603_v47  ;;  %v3615_v28 = vand.u32 2147483647, %v3603_v47  ;;  %v3627_v10 = vmul.f32 0.5, %v3603_v47  ;;  %v3642_v3 = vadd.f32 %v3638_v1, %v3618_v37 }
 0xd82   : > { %v3619_v58 = vand.u32 2147483647, %v3611_v21  ;;  %vm3623_vm1 = vcmp.lt.f32.partialorder %v3615_v28, 1.0  ;;  %v3631_v57 = vmul.f32 %v3627_v10, %v3603_v47  ;;  %v4153_v14 = vadd.f32 -0.5, %v3615_v28 }
 0xd83   : > { %v3645_v40 = vadd.f32 %v3644_v33, %v3642_v3 }
 0xd84   : > { %v3639_v39 = vsel %vm3623_vm1, %v3631_v57, %v4153_v14 }
 0xd85   : > { %v3643_v42 = vadd.f32 %v3639_v39, %v3619_v58 }
 0xd87   : > { %v3646_v43 = vadd.f32 %v3645_v40, %v3643_v42 }
 0xd89   : > { %v3647_v9 = vadd.f32 %v3646_v43, %v5374_v22 }
 0xd8b   : > { %3648 = vst [vmem:[%s216_s29] sm:$0xff] %v3647_v9 }
 0xd8c   : > { %4555 = shalt.err (!%p4552_p0)
}
 0xd8d   : > { %s4556_s5 = scalar_lea.hbm %s3661_s22, 128  ;;  %s4560_s10 = scalar_lea.hbm %s5463_s3, 256 }
 0xd8e   : > { %p4557_p2 = scmp.ne.s32.totalorder %s3661_s22, %s4556_s5  ;;  %p4561_p6 = scmp.lt.s32.totalorder %s3661_s22, %s5463_s3 }
 0xd8f   : > { %p4562_p13 = scmp.lt.s32.totalorder %s4560_s10, %s4556_s5 }
 0xd90   : > { %p4558_p3 = pnand %p4557_p2, %p5580_p11 }
 0xd91   : > { %p4563_p8 = por %p4562_p13, %p4561_p6 }
 0xd92   : > { %p4559_p7 = pneg %p4558_p3 }
 0xd94   : > { %p4564_p4 = pnand %p4563_p8, %p4559_p7 }
 0xd96   : > { %4567 = shalt.err (!%p4564_p4)
}
 0xd97   : > { %4238 = dma.vmem_to_hbm [thread:$0]  (%p5580_p11), %s3664_s4, 128, %s3661_s22, %s3650_s27  }
 0xd98 PF: > { %s3675_s8 = sand.u32 1, %s4602_s12   ;;  %p5581_p12 = scmp.ne.s32.totalorder %s5503_s25, 0 }
 0xd99   : > { %p5582_p9 = scmp.ge.s32.totalorder %s4614_s15, 2  ;;  %s3676_s9 = scalar_lea.sflag [#allocation6], %s3675_s8 }
 0xd9b   : > { %p4252_p10 = pnand %p5582_p9, %p5581_p12 }
 0xd9d   : > { %p4253_p1 = pneg %p4252_p10 }
 0xd9f   : > { %4597 = dma.done.wait (%p4253_p1), %s3676_s9, 128  }
 0xda0   : > { %4599 = vsyncadd (%p4253_p1), %s3676_s9, 4294967168  ;;  %p15_p5 = scmp.ge.s32.totalorder %s4672_s18, 4   ;;  %s5583_s12 = smov %s4606_s13 }
 0xda1   : > { %s5584_s13 = smov %s4610_s14  ;;  %s5585_s14 = smov %s4684_s21 }
 0xda2   : > { %s5586_s15 = smov %s4672_s18  ;;  %17 = sbr.rel (!%p15_p5) target bundleno = 7 (0x7), region = 84 }
 0xda7   :  { %3681 = vsyncpa [#allocation5], 1 }
 0xda8   :  { %3683 = vsyncpa [#allocation5 + $0x1], 1 }
 0xda9   :  { %3684 = vsyncpa [#allocation8], 1 }
 0xdaa   :  { %3685 = vsyncpa [#allocation6], 1 }
 0xdab   :  { %3687 = vsyncpa [#allocation6 + $0x1], 1 }

</bundles_post_ra>
